<compile_context>
chip_gen: v6e
topology: v6e:2x2x1
jax: 0.10.0
libtpu: 0.0.40
codegen_flags: <defaults>
</compile_context>

<pallas_src>
import jax
import jax.numpy as jnp
from jax.experimental import pallas as pl
from jax.experimental.pallas import tpu as pltpu


def _round_up(x, m):
    return ((x + m - 1) // m) * m


def _device_kind():
    try:
        return jax.devices()[0].device_kind.lower()
    except Exception:
        return ""


def _pick_batch_tile(B):
    """Batch tile: big enough to amortize the ~0.35us/step pipeline overhead,
    small enough to cap zero-row padding waste; v5e kept at <=256 (slower MXU,
    single vector-store slot)."""
    kind = _device_kind()
    max_tb = 256 if "v5" in kind else 512
    if B <= 16:
        tb = 16                      # bf16 packs 2 rows/sublane -> 16-row min tile
    else:
        tb = 32
        for t in (t for t in (512, 256, 128, 64, 32) if t <= max_tb):
            bp = _round_up(B, t)
            if (bp - B) / bp <= 0.25:   # largest tile with <=25% padding waste
                tb = t
                break
    # v7x has 2 TensorCores: make sure the parallel batch axis has >=2 steps.
    if "v7" in kind and _round_up(B, tb) // tb < 2 and tb >= 32:
        tb //= 2
    return tb


def _mlp_kernel(x_ref, w1_ref, b1_ref, w2_ref, b2_ref, w3_ref, b3_ref, o_ref):
    # Cast activations to bf16 in-kernel (input stays f32 in HBM).
    x = x_ref[...].astype(jnp.bfloat16)
    # Layer 1: Linear + ReLU   (Dropout -> identity at inference)
    h = jnp.dot(x, w1_ref[...], preferred_element_type=jnp.float32)
    h = jnp.maximum(h + b1_ref[...], 0.0).astype(jnp.bfloat16)   # fused ReLU+cast
    # Layer 2: Linear + ReLU   (Dropout -> identity at inference)
    h = jnp.dot(h, w2_ref[...], preferred_element_type=jnp.float32)
    h = jnp.maximum(h + b2_ref[...], 0.0).astype(jnp.bfloat16)   # fused ReLU+cast
    # Layer 3: Linear (logits), f32 accumulation + f32 store
    o_ref[...] = jnp.dot(h, w3_ref[...],
                         preferred_element_type=jnp.float32) + b3_ref[...]


def fclassifier_forward(feature_nchw, params, num_class=None):
    """feature_nchw: (B, C, 7, 7) float32.  Returns (B, num_class) f32 logits."""
    w1, b1, w2, b2, w3, b3 = params
    B = feature_nchw.shape[0]
    d_in, hidden = w1.shape
    NCp = w3.shape[1]                      # already padded to a 128 multiple
    if num_class is None:
        num_class = NCp

    # Flatten exactly like feature.view(x.size(0), -1); stays f32 (cast in-kernel).
    c = feature_nchw.reshape(B, -1)

    TB = _pick_batch_tile(B)
    Bp = _round_up(B, TB)
    if Bp != B:
        c = jnp.pad(c, ((0, Bp - B), (0, 0)))

    flops = 2 * Bp * (d_in + hidden + NCp) * hidden
    bytes_accessed = (
        (d_in * hidden + hidden * hidden + hidden * NCp) * 2   # bf16 weights
        + (2 * hidden + NCp) * 4                                # f32 biases
        + Bp * (d_in * 4 + NCp * 4)                             # f32 acts in/out
    )

    out = pl.pallas_call(
        _mlp_kernel,
        out_shape=jax.ShapeDtypeStruct((Bp, NCp), jnp.float32),
        grid_spec=pltpu.PrefetchScalarGridSpec(
            num_scalar_prefetch=0,
            grid=(Bp // TB,),
            in_specs=[
                # activations: tiled over batch, pipelined against compute
                pl.BlockSpec((TB, d_in), lambda i: (i, 0)),
                # weights / biases: constant block index -> VMEM-resident
                pl.BlockSpec((d_in, hidden), lambda i: (0, 0)),
                pl.BlockSpec((1, hidden), lambda i: (0, 0)),
                pl.BlockSpec((hidden, hidden), lambda i: (0, 0)),
                pl.BlockSpec((1, hidden), lambda i: (0, 0)),
                pl.BlockSpec((hidden, NCp), lambda i: (0, 0)),
                pl.BlockSpec((1, NCp), lambda i: (0, 0)),
            ],
            out_specs=pl.BlockSpec((TB, NCp), lambda i: (i, 0)),
        ),
        compiler_params=pltpu.CompilerParams(
            dimension_semantics=("parallel",),   # megacore-shard the batch axis
            vmem_limit_bytes=32 << 20,           # ~12 MiB peak @ TB=512; fits v7x
        ),
        cost_estimate=pl.CostEstimate(
            flops=flops, transcendentals=0, bytes_accessed=bytes_accessed),
    )(c, w1, b1, w2, b2, w3, b3)
    return out[:B, :num_class]


def init_params(key, encode_channels=8, num_class=128, hidden=1024):
    """PyTorch nn.Linear default init: U(-1/sqrt(fan_in), 1/sqrt(fan_in)).
    Weights stored as (in, out) == transposed PyTorch (out, in) layout, bf16
    (HBM-bandwidth bound head); biases stay f32.  The final layer is padded once
    here to a lane-dense multiple of 128 (zero columns -> sliced off in forward)."""
    d_in = encode_channels * 7 * 7
    ncp = _round_up(num_class, 128)
    dims = [(d_in, hidden), (hidden, hidden), (hidden, num_class)]
    params = []
    for li, (fi, fo) in enumerate(dims):
        key, kw, kb = jax.random.split(key, 3)
        bound = 1.0 / jnp.sqrt(jnp.float32(fi))
        w = jax.random.uniform(kw, (fi, fo), jnp.float32, -bound, bound)
        b = jax.random.uniform(kb, (1, fo), jnp.float32, -bound, bound)
        if li == 2 and ncp != fo:   # pad logits layer once, at init
            w = jnp.pad(w, ((0, 0), (0, ncp - fo)))
            b = jnp.pad(b, ((0, 0), (0, ncp - fo)))
        params += [w.astype(jnp.bfloat16), b]
    return tuple(params)


def _reference(feature_nchw, params, num_class):
    """Plain-JAX reference with the same bf16 rounding points as the kernel."""
    w1, b1, w2, b2, w3, b3 = params
    up = lambda a: a.astype(jnp.float32)
    rt = lambda a: a.astype(jnp.bfloat16).astype(jnp.float32)  # bf16 round-trip
    c = rt(feature_nchw.reshape(feature_nchw.shape[0], -1))
    h = jnp.maximum(c @ up(w1) + b1, 0.0)
    h = jnp.maximum(rt(h) @ up(w2) + b2, 0.0)
    out = rt(h) @ up(w3) + b3
    return out[:, :num_class]


if __name__ == "__main__":
    key = jax.random.PRNGKey(0)
    k_feat, k_par = jax.random.split(key)

    B, C = 2, 8            # small: encode_channels=8 -> flattened dim 8*7*7=392
    NUM_CLASS = 128
    feature = jax.random.normal(k_feat, (B, C, 7, 7), jnp.float32)
    params = init_params(k_par, encode_channels=C, num_class=NUM_CLASS)

    logits = fclassifier_forward(feature, params, num_class=NUM_CLASS)
    logits = jax.block_until_ready(logits)

    ref = _reference(feature, params, NUM_CLASS)
    assert logits.shape == (B, NUM_CLASS), logits.shape
    # bf16 weights/activations with f32 accumulation -> looser tolerance than f32.
    assert jnp.allclose(logits, ref, atol=1e-2, rtol=1e-2), "mismatch vs reference"

    print("KERNEL_OK")
</pallas_src>

<mosaic_0001>
module attributes {stable_mosaic.version = 11 : i64} {
  func.func @_mlp_kernel(%arg0: i32, %arg1: memref<16x392xf32, #tpu.memory_space<vmem>>, %arg2: memref<392x1024xbf16, #tpu.memory_space<vmem>>, %arg3: memref<1x1024xf32, #tpu.memory_space<vmem>>, %arg4: memref<1024x1024xbf16, #tpu.memory_space<vmem>>, %arg5: memref<1x1024xf32, #tpu.memory_space<vmem>>, %arg6: memref<1024x128xbf16, #tpu.memory_space<vmem>>, %arg7: memref<1x128xf32, #tpu.memory_space<vmem>>, %arg8: memref<16x128xf32, #tpu.memory_space<vmem>>) attributes {dimension_semantics = [#tpu.dimension_semantics<parallel>], iteration_bounds = array<i64: 1>, scalar_prefetch = 0 : i64, scratch_operands = 0 : i64, tpu.core_type = #tpu.core_type<tc>, window_params = [{transform_indices = @transform_0, window_bounds = array<i64: 16, 392>}, {pipeline_mode = #tpu.pipeline_mode<synchronous>, transform_indices = @transform_1, window_bounds = array<i64: 392, 1024>}, {pipeline_mode = #tpu.pipeline_mode<synchronous>, transform_indices = @transform_2, window_bounds = array<i64: 1, 1024>}, {pipeline_mode = #tpu.pipeline_mode<synchronous>, transform_indices = @transform_3, window_bounds = array<i64: 1024, 1024>}, {pipeline_mode = #tpu.pipeline_mode<synchronous>, transform_indices = @transform_4, window_bounds = array<i64: 1, 1024>}, {pipeline_mode = #tpu.pipeline_mode<synchronous>, transform_indices = @transform_5, window_bounds = array<i64: 1024, 128>}, {pipeline_mode = #tpu.pipeline_mode<synchronous>, transform_indices = @transform_6, window_bounds = array<i64: 1, 128>}, {transform_indices = @transform_7, window_bounds = array<i64: 16, 128>}]} {
    %c0 = arith.constant 0 : index
    %c0_0 = arith.constant 0 : index
    %0 = vector.load %arg1[%c0, %c0_0] : memref<16x392xf32, #tpu.memory_space<vmem>>, vector<16x392xf32>
    %1 = arith.truncf %0 : vector<16x392xf32> to vector<16x392xbf16>
    %c0_1 = arith.constant 0 : index
    %c0_2 = arith.constant 0 : index
    %2 = vector.load %arg2[%c0_1, %c0_2] : memref<392x1024xbf16, #tpu.memory_space<vmem>>, vector<392x1024xbf16>
    %cst = arith.constant dense<0.000000e+00> : vector<16x1024xf32>
    %3 = tpu.matmul %1, %2, %cst {dimension_numbers = #tpu.dot_dimension_numbers<[1], [0], [0], [1], [0, 0, 1, 1], [], []>} : vector<16x392xbf16>, vector<392x1024xbf16>, vector<16x1024xf32> -> vector<16x1024xf32>
    %c0_3 = arith.constant 0 : index
    %c0_4 = arith.constant 0 : index
    %4 = vector.load %arg3[%c0_3, %c0_4] : memref<1x1024xf32, #tpu.memory_space<vmem>>, vector<1x1024xf32>
    %5 = vector.broadcast %4 : vector<1x1024xf32> to vector<16x1024xf32>
    %6 = arith.addf %3, %5 : vector<16x1024xf32>
    %cst_5 = arith.constant 0.000000e+00 : f32
    %7 = vector.broadcast %cst_5 : f32 to vector<16x1024xf32>
    %8 = arith.maximumf %6, %7 : vector<16x1024xf32>
    %9 = arith.truncf %8 : vector<16x1024xf32> to vector<16x1024xbf16>
    %c0_6 = arith.constant 0 : index
    %c0_7 = arith.constant 0 : index
    %10 = vector.load %arg4[%c0_6, %c0_7] : memref<1024x1024xbf16, #tpu.memory_space<vmem>>, vector<1024x1024xbf16>
    %cst_8 = arith.constant dense<0.000000e+00> : vector<16x1024xf32>
    %11 = tpu.matmul %9, %10, %cst_8 {dimension_numbers = #tpu.dot_dimension_numbers<[1], [0], [0], [1], [0, 0, 1, 1], [], []>} : vector<16x1024xbf16>, vector<1024x1024xbf16>, vector<16x1024xf32> -> vector<16x1024xf32>
    %c0_9 = arith.constant 0 : index
    %c0_10 = arith.constant 0 : index
    %12 = vector.load %arg5[%c0_9, %c0_10] : memref<1x1024xf32, #tpu.memory_space<vmem>>, vector<1x1024xf32>
    %13 = vector.broadcast %12 : vector<1x1024xf32> to vector<16x1024xf32>
    %14 = arith.addf %11, %13 : vector<16x1024xf32>
    %cst_11 = arith.constant 0.000000e+00 : f32
    %15 = vector.broadcast %cst_11 : f32 to vector<16x1024xf32>
    %16 = arith.maximumf %14, %15 : vector<16x1024xf32>
    %17 = arith.truncf %16 : vector<16x1024xf32> to vector<16x1024xbf16>
    %c0_12 = arith.constant 0 : index
    %c0_13 = arith.constant 0 : index
    %18 = vector.load %arg6[%c0_12, %c0_13] : memref<1024x128xbf16, #tpu.memory_space<vmem>>, vector<1024x128xbf16>
    %cst_14 = arith.constant dense<0.000000e+00> : vector<16x128xf32>
    %19 = tpu.matmul %17, %18, %cst_14 {dimension_numbers = #tpu.dot_dimension_numbers<[1], [0], [0], [1], [0, 0, 1, 1], [], []>} : vector<16x1024xbf16>, vector<1024x128xbf16>, vector<16x128xf32> -> vector<16x128xf32>
    %c0_15 = arith.constant 0 : index
    %c0_16 = arith.constant 0 : index
    %20 = vector.load %arg7[%c0_15, %c0_16] : memref<1x128xf32, #tpu.memory_space<vmem>>, vector<1x128xf32>
    %21 = vector.broadcast %20 : vector<1x128xf32> to vector<16x128xf32>
    %22 = arith.addf %19, %21 : vector<16x128xf32>
    %c0_17 = arith.constant 0 : index
    %c0_18 = arith.constant 0 : index
    %23 = vector.load %arg8[%c0_17, %c0_18] : memref<16x128xf32, #tpu.memory_space<vmem>>, vector<16x128xf32>
    tpu.vector_store %arg8[%c0_17, %c0_18], %22 {strides = array<i32>} : memref<16x128xf32, #tpu.memory_space<vmem>>, vector<16x128xf32>,
    return
  }
  func.func @transform_0(%arg0: i32) -> (i32, i32) {
    %c0_i32 = arith.constant 0 : i32
    %c0_i32_0 = arith.constant 0 : i32
    return %arg0, %c0_i32 : i32, i32
  }
  func.func @transform_1(%arg0: i32) -> (i32, i32) {
    %c0_i32 = arith.constant 0 : i32
    %c0_i32_0 = arith.constant 0 : i32
    %c0_i32_1 = arith.constant 0 : i32
    return %c0_i32, %c0_i32_0 : i32, i32
  }
  func.func @transform_2(%arg0: i32) -> (i32, i32) {
    %c0_i32 = arith.constant 0 : i32
    %c0_i32_0 = arith.constant 0 : i32
    %c0_i32_1 = arith.constant 0 : i32
    return %c0_i32, %c0_i32_0 : i32, i32
  }
  func.func @transform_3(%arg0: i32) -> (i32, i32) {
    %c0_i32 = arith.constant 0 : i32
    %c0_i32_0 = arith.constant 0 : i32
    %c0_i32_1 = arith.constant 0 : i32
    return %c0_i32, %c0_i32_0 : i32, i32
  }
  func.func @transform_4(%arg0: i32) -> (i32, i32) {
    %c0_i32 = arith.constant 0 : i32
    %c0_i32_0 = arith.constant 0 : i32
    %c0_i32_1 = arith.constant 0 : i32
    return %c0_i32, %c0_i32_0 : i32, i32
  }
  func.func @transform_5(%arg0: i32) -> (i32, i32) {
    %c0_i32 = arith.constant 0 : i32
    %c0_i32_0 = arith.constant 0 : i32
    %c0_i32_1 = arith.constant 0 : i32
    return %c0_i32, %c0_i32_0 : i32, i32
  }
  func.func @transform_6(%arg0: i32) -> (i32, i32) {
    %c0_i32 = arith.constant 0 : i32
    %c0_i32_0 = arith.constant 0 : i32
    %c0_i32_1 = arith.constant 0 : i32
    return %c0_i32, %c0_i32_0 : i32, i32
  }
  func.func @transform_7(%arg0: i32) -> (i32, i32) {
    %c0_i32 = arith.constant 0 : i32
    %c0_i32_0 = arith.constant 0 : i32
    return %arg0, %c0_i32 : i32, i32
  }
}

</mosaic_0001>

<bundles_post_ra>
// kernel: tpu_custom_call.1
= control target key start
LH: loop header
LB: loop body
LE: loop exit
PB: predicated region body
PF: predicated region fallthrough
CT: control target
= control target key end

     0   :  { %12 = vsyncpa [#allocation3], 0  ;;  %s7721_s0 = inlined_call_operand.hbm [shape: f32[16,392], index: 0, kind: input, shape index: {}]   ;;  %s7722_s1 = inlined_call_operand.hbm [shape: bf16[392,1024], index: 1, kind: input, shape index: {}]   ;;  %s7723_s2 = inlined_call_operand.hbm [shape: f32[1,1024], index: 2, kind: input, shape index: {}]   ;;  %s7724_s3 = inlined_call_operand.hbm [shape: bf16[1024,1024], index: 3, kind: input, shape index: {}]   ;;  %s7725_s4 = inlined_call_operand.hbm [shape: f32[1,1024], index: 4, kind: input, shape index: {}]   ;;  %s7726_s5 = inlined_call_operand.hbm [shape: bf16[1024,128], index: 5, kind: input, shape index: {}]   ;;  %s7727_s6 = inlined_call_operand.hbm [shape: f32[1,128], index: 6, kind: input, shape index: {}]   ;;  %s7728_s7 = inlined_call_operand.hbm [shape: f32[16,128], index: 7, kind: output, shape index: {}]  }
   0x1   :  { %13 = vsyncpa [#allocation6], 0 }
   0x2   :  { %14 = vsyncpa [#allocation9], 0 }
   0x3   :  { %15 = vsyncpa [#allocation12], 0 }
   0x4   :  { %16 = vsyncpa [#allocation4], 0  ;;  %s7404_s24 = smov [#allocation5]   ;;  %s7405_s26 = smov [#allocation8]  }
   0x5   :  { %s34_s25 = sshll.u32 %s7404_s24, 4  ;;  %s56_s27 = sshll.u32 %s7405_s26, 4  ;;  %s35_s25 = int_to_ptr.vmem [resolvable:$true] %s34_s25  ;;  %s57_s27 = int_to_ptr.vmem [resolvable:$true] %s56_s27 }
   0x6   :  { %s7242_s28 = scalar_lea.vmem %s35_s25, 25088  ;;  %p7247_p1 = scmp.lt.s32.totalorder %s35_s25, %s35_s25 }
   0x7   :  { %p7243_p0 = scmp.ne.s32.totalorder %s35_s25, %s7242_s28  ;;  %p7248_p2 = scmp.lt.s32.totalorder %s7242_s28, %s7242_s28 }
   0x9   :  { %p7249_p3 = por %p7248_p2, %p7247_p1 }
   0xb   :  { %p7250_p4 = pnand %p7249_p3, %p7243_p0 }
   0xd   :  { %7253 = shalt.err (!%p7250_p4)
}
   0xe   :  { %s7406_s29 = smov 512   ;;  %s7407_s30 = smov 32  }
   0xf   :  { %40 = dma.hbm_to_vmem [thread:$0]  %s7722_s1, 25088, %s35_s25, [#allocation6], %s7406_s29, %s7406_s29, %s7407_s30  }
  0x10   :  { %s7262_s10 = scalar_lea.vmem %s57_s27, 65536  ;;  %p7267_p6 = scmp.lt.s32.totalorder %s57_s27, %s57_s27 }
  0x11   :  { %p7263_p5 = scmp.ne.s32.totalorder %s57_s27, %s7262_s10  ;;  %p7268_p7 = scmp.lt.s32.totalorder %s7262_s10, %s7262_s10 }
  0x13   :  { %p7269_p8 = por %p7268_p7, %p7267_p6 }
  0x15   :  { %p7270_p9 = pnand %p7269_p8, %p7263_p5 }
  0x17   :  { %7273 = shalt.err (!%p7270_p9)
}
  0x18   :  { %62 = dma.hbm_to_vmem [thread:$0]  %s7724_s3, 65536, %s57_s27, [#allocation9], %s7406_s29, %s7406_s29, %s7407_s30  }
  0x19   :  { %s7408_s13 = smov [#allocation11]  }
  0x1a   :  { %s78_s14 = sshll.u32 %s7408_s13, 4  ;;  %s79_s14 = int_to_ptr.vmem [resolvable:$true] %s78_s14 }
  0x1b   :  { %s7282_s15 = scalar_lea.vmem %s79_s14, 8192  ;;  %p7287_p11 = scmp.lt.s32.totalorder %s79_s14, %s79_s14 }
  0x1c   :  { %p7283_p10 = scmp.ne.s32.totalorder %s79_s14, %s7282_s15  ;;  %p7288_p12 = scmp.lt.s32.totalorder %s7282_s15, %s7282_s15 }
  0x1e   :  { %p7289_p13 = por %p7288_p12, %p7287_p11 }
  0x20   :  { %p7290_p0 = pnand %p7289_p13, %p7283_p10 }
  0x22   :  { %7293 = shalt.err (!%p7290_p0)
}
  0x23   :  { %s7409_s1 = smov 64   ;;  %s7410_s16 = smov 4  }
  0x24   :  { %84 = dma.hbm_to_vmem [thread:$0]  %s7726_s5, 8192, %s79_s14, [#allocation12], %s7409_s1, %s7409_s1, %s7410_s16  }
  0x25   :  { %s7411_s19 = smov [#allocation2]   ;;  %s7412_s3 = smov [#allocation7]  }
  0x26   :  { %s22_s20 = sshll.u32 %s7411_s19, 4  ;;  %s47_s21 = sshll.u32 %s7412_s3, 4  ;;  %s23_s20 = int_to_ptr.vmem [resolvable:$true] %s22_s20  ;;  %s48_s21 = int_to_ptr.vmem [resolvable:$true] %s47_s21 }
  0x27   :  { %s7302_s22 = scalar_lea.vmem %s23_s20, 1024  ;;  %p7307_p2 = scmp.lt.s32.totalorder %s23_s20, %s23_s20 }
  0x28   :  { %p7303_p1 = scmp.ne.s32.totalorder %s23_s20, %s7302_s22  ;;  %p7308_p3 = scmp.lt.s32.totalorder %s7302_s22, %s7302_s22 }
  0x2a   :  { %p7309_p4 = por %p7308_p3, %p7307_p2 }
  0x2c   :  { %p7310_p5 = pnand %p7309_p4, %p7303_p1 }
  0x2e   :  { %7313 = shalt.err (!%p7310_p5)
}
  0x2f   :  { %28 = dma.hbm_to_vmem [thread:$0]  %s7721_s0, 1024, %s23_s20, [#allocation3], %s7406_s29, %s7406_s29, %s7407_s30  }
  0x30   :  { %s7322_s5 = scalar_lea.vmem %s48_s21, 128  ;;  %p7327_p7 = scmp.lt.s32.totalorder %s48_s21, %s48_s21 }
  0x31   :  { %p7323_p6 = scmp.ne.s32.totalorder %s48_s21, %s7322_s5  ;;  %p7328_p8 = scmp.lt.s32.totalorder %s7322_s5, %s7322_s5 }
  0x33   :  { %p7329_p9 = por %p7328_p8, %p7327_p7 }
  0x35   :  { %p7330_p10 = pnand %p7329_p9, %p7323_p6 }
  0x37   :  { %7333 = shalt.err (!%p7330_p10)
}
  0x38   :  { %50 = dma.hbm_to_vmem [thread:$0]  %s7723_s2, 128, %s48_s21, [#allocation6]  }
  0x39   :  { %s7413_s27 = smov [#allocation10]   ;;  %s7414_s8 = smov [#allocation13]  }
  0x3a   :  { %s69_s28 = sshll.u32 %s7413_s27, 4  ;;  %s91_s9 = sshll.u32 %s7414_s8, 4  ;;  %s70_s28 = int_to_ptr.vmem [resolvable:$true] %s69_s28  ;;  %s92_s9 = int_to_ptr.vmem [resolvable:$true] %s91_s9 }
  0x3b   :  { %s7342_s10 = scalar_lea.vmem %s70_s28, 128  ;;  %p7347_p12 = scmp.lt.s32.totalorder %s70_s28, %s70_s28 }
  0x3c   :  { %p7343_p11 = scmp.ne.s32.totalorder %s70_s28, %s7342_s10  ;;  %p7348_p13 = scmp.lt.s32.totalorder %s7342_s10, %s7342_s10 }
  0x3e   :  { %p7349_p0 = por %p7348_p13, %p7347_p12 }
  0x40   :  { %p7350_p1 = pnand %p7349_p0, %p7343_p11 }
  0x42   :  { %7353 = shalt.err (!%p7350_p1)
}
  0x43   :  { %72 = dma.hbm_to_vmem [thread:$0]  %s7725_s4, 128, %s70_s28, [#allocation9]  }
  0x44   :  { %s7362_s30 = scalar_lea.vmem %s92_s9, 16  ;;  %s7366_s2 = scalar_lea.vmem %s92_s9, 32 }
  0x45   :  { %p7363_p2 = scmp.ne.s32.totalorder %s92_s9, %s7362_s30  ;;  %p7367_p3 = scmp.lt.s32.totalorder %s92_s9, %s92_s9 }
  0x46   :  { %p7368_p4 = scmp.lt.s32.totalorder %s7366_s2, %s7362_s30 }
  0x48   :  { %p7369_p5 = por %p7368_p4, %p7367_p3 }
  0x4a   :  { %p7370_p6 = pnand %p7369_p5, %p7363_p2 }
  0x4c   :  { %7373 = shalt.err (!%p7370_p6)
}
  0x4d   :  { %94 = dma.hbm_to_vmem [thread:$0]  %s7727_s6, 16, %s92_s9, [#allocation12]  }
  0x4e   :  { %7394 = dma.done.wait [#allocation3], 1024  }
  0x4f   :  { %7395 = vsyncadd [#allocation3], 4294966272 }
  0x50   :  { %7396 = dma.done.wait [#allocation6], 25216  }
  0x51   :  { %7397 = vsyncadd [#allocation6], 4294942080 }
  0x52   :  { %7398 = dma.done.wait [#allocation9], 65664  }
  0x53   :  { %7399 = vsyncadd [#allocation9], 4294901632 }
  0x54   :  { %7400 = dma.done.wait [#allocation12], 8208  }
  0x55   :  { %7401 = vsyncadd [#allocation12], 4294959088  ;;  %v185_v0 = vld [vmem:[#allocation5 + $0x1c0] sm:$0xff]  ;;  %v120_v34 = vld [vmem:[#allocation2 + $0x18] sm:$0xff]  ;;  %vm1347_vm0 = vcmask 64512   ;;  %vm1351_vm1 = vcmask 1043456  }
  0x56   :  { %v189_v1 = vld [vmem:[#allocation5 + $0x1e0] sm:$0xff]  ;;  %v124_v36 = vld [vmem:[#allocation2 + $0x38] sm:$0xff]  ;;  %v118_v59 = vld [vmem:[#allocation2 + $0x8] sm:$0xff]  ;;  %s7415_s4 = smov [#allocation14]  }
  0x57   :  { %v313_v2 = vld [vmem:[#allocation5 + $0x5c0] sm:$0xff]  ;;  %v6332_v3 = vcombine.high %v185_v0, %v189_v1  ;;  %v6331_v5 = vcombine.low %v185_v0, %v189_v1  ;;  %v7488_v39 = vpack.c.bf16 %v124_v36, %v120_v34  ;;  %v122_v60 = vld [vmem:[#allocation2 + $0x28] sm:$0xff]  ;;  %s6260_s6 = sshll.u32 %s7415_s4, 4  ;;  %s6261_s6 = int_to_ptr.vmem [resolvable:$true] %s6260_s6 }
  0x58   :  { %v317_v4 = vld [vmem:[#allocation5 + $0x5e0] sm:$0xff]  ;;  %v7492_v63 = vpack.c.bf16 %v122_v60, %v118_v59  ;;  %v174_v34 = vld [vmem:[#allocation5 + $0x168] sm:$0xff]  ;;  %s7374_s13 = scalar_lea.vmem %s6261_s6, 256  ;;  %p7379_p8 = scmp.lt.s32.totalorder %s6261_s6, %s6261_s6 }
  0x59   :  { %v177_v6 = vld [vmem:[#allocation5 + $0x180] sm:$0xff]  ;;  %v6460_v8 = vcombine.high %v313_v2, %v317_v4  ;;  %v6459_v9 = vcombine.low %v313_v2, %v317_v4  ;;  %1376 = vmatprep.subr.bf16.mxu0 %v6332_v3  ;;  %6476 = vmatprep.mubr.msk.bf16.mxu1 %vm1347_vm0, %v7488_v39  ;;  %v150_v59 = vld [vmem:[#allocation5 + $0xa8] sm:$0xff]  ;;  %p7375_p7 = scmp.ne.s32.totalorder %s6261_s6, %s7374_s13  ;;  %p7380_p9 = scmp.lt.s32.totalorder %s7374_s13, %s7374_s13 }
  0x5a   :  { %v181_v7 = vld [vmem:[#allocation5 + $0x1a0] sm:$0xff]  ;;  %1377 = vmatpush1.bf16.msra.mxu0 %v6331_v5  ;;  %1408 = vmatprep.mubr.bf16.mxu0 %v7492_v63 }
  0x5b   :  { %v6324_v10 = vcombine.high %v177_v6, %v181_v7  ;;  %v305_v11 = vld [vmem:[#allocation5 + $0x580] sm:$0xff]  ;;  %1419 = vmatprep.subr.bf16.mxu1 %v6460_v8  ;;  %v6323_v18 = vcombine.low %v177_v6, %v181_v7  ;;  %p7381_p10 = por %p7380_p9, %p7379_p8 }
  0x5c   :  { %v309_v12 = vld [vmem:[#allocation5 + $0x5a0] sm:$0xff]  ;;  %1420 = vmatpush1.bf16.msra.mxu1 %v6459_v9 }
  0x5d   :  { %v169_v13 = vld [vmem:[#allocation5 + $0x140] sm:$0xff]  ;;  %v6452_v14 = vcombine.high %v305_v11, %v309_v12  ;;  %1378 = vmatprep.subr.bf16.mxu0 %v6324_v10  ;;  %v6451_v19 = vcombine.low %v305_v11, %v309_v12  ;;  %p7382_p11 = pnand %p7381_p10, %p7375_p7 }
  0x5e   :  { %v173_v15 = vld [vmem:[#allocation5 + $0x160] sm:$0xff]  ;;  %1379 = vmatpush1.bf16.msra.mxu0 %v6323_v18  ;;  %v119_v18 = vld [vmem:[#allocation2 + $0x10] sm:$0xff] }
  0x5f   :  { %v297_v16 = vld [vmem:[#allocation5 + $0x540] sm:$0xff]  ;;  %v6316_v20 = vcombine.high %v169_v13, %v173_v15  ;;  %1421 = vmatprep.subr.bf16.mxu1 %v6452_v14  ;;  %v6315_v26 = vcombine.low %v169_v13, %v173_v15  ;;  %v186_v14 = vld [vmem:[#allocation5 + $0x1c8] sm:$0xff] }
  0x60   :  { %v301_v17 = vld [vmem:[#allocation5 + $0x560] sm:$0xff]  ;;  %1422 = vmatpush1.bf16.msra.mxu1 %v6451_v19  ;;  %v190_v15 = vld [vmem:[#allocation5 + $0x1e8] sm:$0xff]  ;;  %v123_v19 = vld [vmem:[#allocation2 + $0x30] sm:$0xff] }
  0x61   :  { %v6444_v21 = vcombine.high %v297_v16, %v301_v17  ;;  %v161_v22 = vld [vmem:[#allocation5 + $0x100] sm:$0xff]  ;;  %1380 = vmatprep.subr.bf16.mxu0 %v6316_v20  ;;  %v6443_v27 = vcombine.low %v297_v16, %v301_v17 }
  0x62   :  { %v165_v23 = vld [vmem:[#allocation5 + $0x120] sm:$0xff]  ;;  %1381 = vmatpush1.bf16.msra.mxu0 %v6315_v26  ;;  %v7497_v26 = vpack.c.bf16 %v123_v19, %v119_v18  ;;  %v306_v19 = vld [vmem:[#allocation5 + $0x588] sm:$0xff] }
  0x63   :  { %v289_v24 = vld [vmem:[#allocation5 + $0x500] sm:$0xff]  ;;  %v6308_v28 = vcombine.high %v161_v22, %v165_v23  ;;  %1423 = vmatprep.subr.bf16.mxu1 %v6444_v21  ;;  %v6307_v35 = vcombine.low %v161_v22, %v165_v23  ;;  %v6334_v21 = vcombine.high %v186_v14, %v190_v15 }
  0x64   :  { %v293_v25 = vld [vmem:[#allocation5 + $0x520] sm:$0xff]  ;;  %1424 = vmatpush1.bf16.msra.mxu1 %v6443_v27 }
  0x65   :  { %v6436_v29 = vcombine.high %v289_v24, %v293_v25  ;;  %v153_v30 = vld [vmem:[#allocation5 + $0xc0] sm:$0xff]  ;;  %1382 = vmatprep.subr.bf16.mxu0 %v6308_v28  ;;  %v6435_v37 = vcombine.low %v289_v24, %v293_v25  ;;  %v178_v24 = vld [vmem:[#allocation5 + $0x188] sm:$0xff]  ;;  %v6333_v28 = vcombine.low %v186_v14, %v190_v15 }
  0x66   :  { %v157_v31 = vld [vmem:[#allocation5 + $0xe0] sm:$0xff]  ;;  %1383 = vmatpush1.bf16.msra.mxu0 %v6307_v35  ;;  %v182_v25 = vld [vmem:[#allocation5 + $0x1a8] sm:$0xff] }
  0x67   :  { %v281_v32 = vld [vmem:[#allocation5 + $0x4c0] sm:$0xff]  ;;  %v6300_v38 = vcombine.high %v153_v30, %v157_v31  ;;  %1425 = vmatprep.subr.bf16.mxu1 %v6436_v29  ;;  %v6299_v45 = vcombine.low %v153_v30, %v157_v31  ;;  %v6326_v30 = vcombine.high %v178_v24, %v182_v25  ;;  %v6325_v36 = vcombine.low %v178_v24, %v182_v25 }
  0x68   :  { %v285_v33 = vld [vmem:[#allocation5 + $0x4e0] sm:$0xff]  ;;  %1426 = vmatpush1.bf16.msra.mxu1 %v6435_v37 }
  0x69   :  { %v6428_v40 = vcombine.high %v281_v32, %v285_v33  ;;  %v145_v41 = vld [vmem:[#allocation5 + $0x80] sm:$0xff]  ;;  %1384 = vmatprep.subr.bf16.mxu0 %v6300_v38  ;;  %v6427_v46 = vcombine.low %v281_v32, %v285_v33  ;;  %v170_v33 = vld [vmem:[#allocation5 + $0x148] sm:$0xff] }
  0x6a   :  { %v149_v42 = vld [vmem:[#allocation5 + $0xa0] sm:$0xff]  ;;  %1385 = vmatpush1.bf16.msra.mxu0 %v6299_v45  ;;  %v6318_v38 = vcombine.high %v170_v33, %v174_v34  ;;  %v6317_v45 = vcombine.low %v170_v33, %v174_v34 }
  0x6b   :  { %v273_v43 = vld [vmem:[#allocation5 + $0x480] sm:$0xff]  ;;  %v6292_v47 = vcombine.high %v145_v41, %v149_v42  ;;  %1427 = vmatprep.subr.bf16.mxu1 %v6428_v40  ;;  %v6291_v53 = vcombine.low %v145_v41, %v149_v42  ;;  %v162_v42 = vld [vmem:[#allocation5 + $0x108] sm:$0xff] }
  0x6c   :  { %v277_v44 = vld [vmem:[#allocation5 + $0x4a0] sm:$0xff]  ;;  %1428 = vmatpush1.bf16.msra.mxu1 %v6427_v46 }
  0x6d   :  { %v6420_v48 = vcombine.high %v273_v43, %v277_v44  ;;  %v137_v49 = vld [vmem:[#allocation5 + $0x40] sm:$0xff]  ;;  %1386 = vmatprep.subr.bf16.mxu0 %v6292_v47  ;;  %v6419_v54 = vcombine.low %v273_v43, %v277_v44  ;;  %v166_v43 = vld [vmem:[#allocation5 + $0x128] sm:$0xff] }
  0x6e   :  { %v141_v50 = vld [vmem:[#allocation5 + $0x60] sm:$0xff]  ;;  %1387 = vmatpush1.bf16.msra.mxu0 %v6291_v53  ;;  %v6310_v47 = vcombine.high %v162_v42, %v166_v43  ;;  %v6309_v53 = vcombine.low %v162_v42, %v166_v43  ;;  %v282_v43 = vld [vmem:[#allocation5 + $0x4c8] sm:$0xff] }
  0x6f   :  { %v265_v51 = vld [vmem:[#allocation5 + $0x440] sm:$0xff]  ;;  %v6284_v55 = vcombine.high %v137_v49, %v141_v50  ;;  %1429 = vmatprep.subr.bf16.mxu1 %v6420_v48  ;;  %v6283_v0 = vcombine.low %v137_v49, %v141_v50  ;;  %v154_v50 = vld [vmem:[#allocation5 + $0xc8] sm:$0xff] }
  0x70   :  { %v269_v52 = vld [vmem:[#allocation5 + $0x460] sm:$0xff]  ;;  %1430 = vmatpush1.bf16.msra.mxu1 %v6419_v54 }
  0x71   :  { %v129_v56 = vld [vmem:[#allocation5] sm:$0xff]  ;;  %v6412_v57 = vcombine.high %v265_v51, %v269_v52  ;;  %1388 = vmatprep.subr.bf16.mxu0 %v6284_v55  ;;  %v6411_v1 = vcombine.low %v265_v51, %v269_v52  ;;  %v158_v51 = vld [vmem:[#allocation5 + $0xe8] sm:$0xff] }
  0x72   :  { %v133_v58 = vld [vmem:[#allocation5 + $0x20] sm:$0xff]  ;;  %1389 = vmatpush1.bf16.msra.mxu0 %v6283_v0  ;;  %v6302_v55 = vcombine.high %v154_v50, %v158_v51 }
  0x73   :  { %v257_v61 = vld [vmem:[#allocation5 + $0x400] sm:$0xff]  ;;  %v6276_v2 = vcombine.high %v129_v56, %v133_v58  ;;  %1431 = vmatprep.subr.bf16.mxu1 %v6412_v57  ;;  %v6275_v7 = vcombine.low %v129_v56, %v133_v58  ;;  %v146_v58 = vld [vmem:[#allocation5 + $0x88] sm:$0xff] }
  0x74   :  { %v261_v62 = vld [vmem:[#allocation5 + $0x420] sm:$0xff]  ;;  %1432 = vmatpush1.bf16.msra.mxu1 %v6411_v1  ;;  %v6294_v0 = vcombine.high %v146_v58, %v150_v59 }
  0x75   :  { %v6404_v3 = vcombine.high %v257_v61, %v261_v62  ;;  %v249_v4 = vld [vmem:[#allocation5 + $0x3c0] sm:$0xff]  ;;  %1390 = vmatprep.subr.bf16.mxu0 %v6276_v2  ;;  %v6403_v8 = vcombine.low %v257_v61, %v261_v62  ;;  %v6301_v61 = vcombine.low %v154_v50, %v158_v51  ;;  %v274_v51 = vld [vmem:[#allocation5 + $0x488] sm:$0xff] }
  0x76   :  { %v253_v5 = vld [vmem:[#allocation5 + $0x3e0] sm:$0xff]  ;;  %1391 = vmatpush1.bf16.msra.mxu0 %v6275_v7 }
  0x77   :  { %v321_v6 = vld [vmem:[#allocation5 + $0x600] sm:$0xff]  ;;  %v6396_v9 = vcombine.high %v249_v4, %v253_v5  ;;  %1433 = vmatprep.subr.bf16.mxu1 %v6404_v3  ;;  %v6395_v16 = vcombine.low %v249_v4, %v253_v5  ;;  %v138_v3 = vld [vmem:[#allocation5 + $0x48] sm:$0xff] }
  0x78   :  { %v6468_v10 = vcombine.high %v321_v6, %v321_v6  ;;  %v6467_v11 = vcombine.low %v321_v6, %v321_v6  ;;  %v241_v12 = vld [vmem:[#allocation5 + $0x380] sm:$0xff]  ;;  %1434 = vmatpush1.bf16.msra.mxu1 %v6403_v8  ;;  %v142_v4 = vld [vmem:[#allocation5 + $0x68] sm:$0xff]  ;;  %v6293_v6 = vcombine.low %v146_v58, %v150_v59 }
  0x79   :  { %v245_v13 = vld [vmem:[#allocation5 + $0x3a0] sm:$0xff]  ;;  %1392 = vmatprep.subr.bf16.mxu0 %v6396_v9  ;;  %v6286_v8 = vcombine.high %v138_v3, %v142_v4  ;;  %v314_v9 = vld [vmem:[#allocation5 + $0x5c8] sm:$0xff] }
  0x7a   :  { %v6388_v17 = vcombine.high %v241_v12, %v245_v13  ;;  %6475 = vmatprep.subr.msk.bf16.mxu1 %vm1351_vm1, %v6468_v10  ;;  %v1353_v20 = vsel %vm1351_vm1, %v6467_v11, 0  ;;  %v233_v22 = vld [vmem:[#allocation5 + $0x340] sm:$0xff]  ;;  %1393 = vmatpush2.bf16.msra.mxu0 %v6395_v16  ;;  %v6387_v27 = vcombine.low %v241_v12, %v245_v13  ;;  %v318_v10 = vld [vmem:[#allocation5 + $0x5e8] sm:$0xff]  ;;  %v6285_v16 = vcombine.low %v138_v3, %v142_v4 }
  0x7b   :  { %v237_v23 = vld [vmem:[#allocation5 + $0x360] sm:$0xff]  ;;  %v130_v11 = vld [vmem:[#allocation5 + $0x8] sm:$0xff]  ;;  %v6461_v24 = vcombine.low %v314_v9, %v318_v10 }
  0x7c   :  { %1450 = vmatpush2.bf16.msra.mxu1 %v1353_v20  ;;  %1394 = vmatprep.subr.bf16.mxu0 %v6388_v17  ;;  %v6380_v29 = vcombine.high %v233_v22, %v237_v23  ;;  %v225_v31 = vld [vmem:[#allocation5 + $0x300] sm:$0xff]  ;;  %v6379_v35 = vcombine.low %v233_v22, %v237_v23  ;;  %v134_v12 = vld [vmem:[#allocation5 + $0x28] sm:$0xff]  ;;  %v6462_v17 = vcombine.high %v314_v9, %v318_v10 }
  0x7d   :  { %1462 = vmatprep.subr.bf16.mxu1 %v6334_v21  ;;  %v229_v32 = vld [vmem:[#allocation5 + $0x320] sm:$0xff]  ;;  %v6278_v18 = vcombine.high %v130_v11, %v134_v12  ;;  %v310_v20 = vld [vmem:[#allocation5 + $0x5a8] sm:$0xff]  ;;  %v6277_v25 = vcombine.low %v130_v11, %v134_v12 }
  0x7e   :  { %1395 = vmatpush2.bf16.msra.mxu0 %v6387_v27  ;;  %v6372_v37 = vcombine.high %v225_v31, %v229_v32  ;;  %v217_v40 = vld [vmem:[#allocation5 + $0x2c0] sm:$0xff]  ;;  %v6371_v44 = vcombine.low %v225_v31, %v229_v32  ;;  %v250_v22 = vld [vmem:[#allocation5 + $0x3c8] sm:$0xff]  ;;  %v6454_v27 = vcombine.high %v306_v19, %v310_v20  ;;  %v6453_v33 = vcombine.low %v306_v19, %v310_v20 }
  0x7f   :  { %1452 = vmatmul.mubr.bf16.vlgmr.msra.gmra.mxu1 %v7497_v26  ;;  %1396 = vmatprep.subr.bf16.mxu0 %v6380_v29  ;;  %v221_v41 = vld [vmem:[#allocation5 + $0x2e0] sm:$0xff]  ;;  %v254_v23 = vld [vmem:[#allocation5 + $0x3e8] sm:$0xff] }
  0x80   :  { %1463 = vmatpush1.bf16.msra.mxu1 %v6333_v28  ;;  %1494 = vmatprep.mubr.bf16.mxu1 %v7492_v63  ;;  %v6364_v46 = vcombine.high %v217_v40, %v221_v41  ;;  %v209_v48 = vld [vmem:[#allocation5 + $0x280] sm:$0xff]  ;;  %v6363_v52 = vcombine.low %v217_v40, %v221_v41  ;;  %v242_v28 = vld [vmem:[#allocation5 + $0x388] sm:$0xff]  ;;  %v6398_v29 = vcombine.high %v250_v22, %v254_v23 }
  0x81   :  { %1464 = vmatprep.subr.bf16.mxu1 %v6326_v30  ;;  %v213_v49 = vld [vmem:[#allocation5 + $0x2a0] sm:$0xff]  ;;  %v246_v30 = vld [vmem:[#allocation5 + $0x3a8] sm:$0xff]  ;;  %v6397_v34 = vcombine.low %v250_v22, %v254_v23  ;;  %v187_v22 = vld [vmem:[#allocation5 + $0x1d0] sm:$0xff] }
  0x82   :  { %1397 = vmatpush2.bf16.msra.mxu0 %v6379_v35  ;;  %v6356_v54 = vcombine.high %v209_v48, %v213_v49  ;;  %v201_v56 = vld [vmem:[#allocation5 + $0x240] sm:$0xff]  ;;  %v6355_v60 = vcombine.low %v209_v48, %v213_v49  ;;  %v298_v31 = vld [vmem:[#allocation5 + $0x548] sm:$0xff]  ;;  %v6390_v41 = vcombine.high %v242_v28, %v246_v30  ;;  %v191_v23 = vld [vmem:[#allocation5 + $0x1f0] sm:$0xff] }
  0x83   :  { %1398 = vmatprep.subr.bf16.mxu0 %v6372_v37  ;;  %v205_v57 = vld [vmem:[#allocation5 + $0x260] sm:$0xff]  ;;  %v302_v32 = vld [vmem:[#allocation5 + $0x568] sm:$0xff] }
  0x84   :  { %1465 = vmatpush1.bf16.msra.mxu1 %v6325_v36  ;;  %v6348_v62 = vcombine.high %v201_v56, %v205_v57  ;;  %v193_v1 = vld [vmem:[#allocation5 + $0x200] sm:$0xff]  ;;  %v6347_v5 = vcombine.low %v201_v56, %v205_v57  ;;  %v6446_v35 = vcombine.high %v298_v31, %v302_v32  ;;  %v234_v36 = vld [vmem:[#allocation5 + $0x348] sm:$0xff]  ;;  %v6445_v42 = vcombine.low %v298_v31, %v302_v32  ;;  %v183_v31 = vld [vmem:[#allocation5 + $0x1b0] sm:$0xff] }
  0x85   :  { %1466 = vmatprep.subr.bf16.mxu1 %v6318_v38  ;;  %v197_v2 = vld [vmem:[#allocation5 + $0x220] sm:$0xff]  ;;  %v238_v37 = vld [vmem:[#allocation5 + $0x368] sm:$0xff] }
  0x86   :  { %1399 = vmatpush2.bf16.msra.mxu0 %v6371_v44  ;;  %v6340_v7 = vcombine.high %v193_v1, %v197_v2  ;;  %v6339_v13 = vcombine.low %v193_v1, %v197_v2  ;;  %v117_v14 = vld [vmem:[#allocation2] sm:$0xff]  ;;  %v290_v38 = vld [vmem:[#allocation5 + $0x508] sm:$0xff]  ;;  %v6382_v49 = vcombine.high %v234_v36, %v238_v37 }
  0x87   :  { %1400 = vmatprep.subr.bf16.mxu0 %v6364_v46  ;;  %v121_v15 = vld [vmem:[#allocation2 + $0x20] sm:$0xff]  ;;  %v294_v40 = vld [vmem:[#allocation5 + $0x528] sm:$0xff] }
  0x88   :  { %1467 = vmatpush1.bf16.msra.mxu1 %v6317_v45  ;;  %v7501_v21 = vpack.c.bf16 %v121_v15, %v117_v14  ;;  %v286_v44 = vld [vmem:[#allocation5 + $0x4e8] sm:$0xff]  ;;  %v6389_v45 = vcombine.low %v242_v28, %v246_v30  ;;  %v6438_v46 = vcombine.high %v290_v38, %v294_v40  ;;  %v6437_v50 = vcombine.low %v290_v38, %v294_v40  ;;  %v319_v28 = vld [vmem:[#allocation5 + $0x5f0] sm:$0xff] }
  0x89   :  { %1468 = vmatprep.subr.bf16.mxu1 %v6310_v47  ;;  %v226_v47 = vld [vmem:[#allocation5 + $0x308] sm:$0xff]  ;;  %v6429_v58 = vcombine.low %v282_v43, %v286_v44  ;;  %v179_v30 = vld [vmem:[#allocation5 + $0x190] sm:$0xff] }
  0x8a   :  { %1401 = vmatpush2.bf16.msra.mxu0 %v6363_v52  ;;  %v230_v48 = vld [vmem:[#allocation5 + $0x328] sm:$0xff]  ;;  %v6381_v52 = vcombine.low %v234_v36, %v238_v37  ;;  %v6335_v37 = vcombine.low %v187_v22, %v191_v23  ;;  %v171_v38 = vld [vmem:[#allocation5 + $0x150] sm:$0xff] }
  0x8b   :  { %1402 = vmatprep.subr.bf16.mxu0 %v6356_v54  ;;  %v218_v54 = vld [vmem:[#allocation5 + $0x2c8] sm:$0xff]  ;;  %v6374_v57 = vcombine.high %v226_v47, %v230_v48  ;;  %v175_v40 = vld [vmem:[#allocation5 + $0x170] sm:$0xff] }
  0x8c   :  { %1469 = vmatpush1.bf16.msra.mxu1 %v6309_v53  ;;  %v6430_v53 = vcombine.high %v282_v43, %v286_v44  ;;  %v278_v56 = vld [vmem:[#allocation5 + $0x4a8] sm:$0xff]  ;;  %v299_v43 = vld [vmem:[#allocation5 + $0x550] sm:$0xff] }
  0x8d   :  { %1470 = vmatprep.subr.bf16.mxu1 %v6302_v55  ;;  %v222_v55 = vld [vmem:[#allocation5 + $0x2e8] sm:$0xff]  ;;  %v6421_v4 = vcombine.low %v274_v51, %v278_v56  ;;  %v303_v44 = vld [vmem:[#allocation5 + $0x570] sm:$0xff] }
  0x8e   :  { %1403 = vmatpush2.bf16.msra.mxu0 %v6355_v60  ;;  %v266_v59 = vld [vmem:[#allocation5 + $0x448] sm:$0xff]  ;;  %v6366_v3 = vcombine.high %v218_v54, %v222_v55 }
  0x8f   :  { %1404 = vmatprep.subr.bf16.mxu0 %v6348_v62  ;;  %v270_v60 = vld [vmem:[#allocation5 + $0x468] sm:$0xff]  ;;  %v6373_v62 = vcombine.low %v226_v47, %v230_v48  ;;  %v163_v47 = vld [vmem:[#allocation5 + $0x110] sm:$0xff] }
  0x90   :  { %1471 = vmatpush1.bf16.msra.mxu1 %v6301_v61  ;;  %v322_v61 = vld [vmem:[#allocation5 + $0x608] sm:$0xff]  ;;  %v6414_v9 = vcombine.high %v266_v59, %v270_v60  ;;  %v167_v48 = vld [vmem:[#allocation5 + $0x130] sm:$0xff] }
  0x91   :  { %1472 = vmatprep.subr.bf16.mxu1 %v6294_v0  ;;  %v6422_v0 = vcombine.high %v274_v51, %v278_v56  ;;  %v210_v1 = vld [vmem:[#allocation5 + $0x288] sm:$0xff]  ;;  %v291_v51 = vld [vmem:[#allocation5 + $0x510] sm:$0xff]  ;;  %v6312_v56 = vcombine.high %v163_v47, %v167_v48 }
  0x92   :  { %1405 = vmatpush2.bf16.msra.mxu0 %v6347_v5  ;;  %v214_v2 = vld [vmem:[#allocation5 + $0x2a8] sm:$0xff] }
  0x93   :  { %1406 = vmatprep.subr.bf16.mxu0 %v6340_v7  ;;  %v258_v5 = vld [vmem:[#allocation5 + $0x408] sm:$0xff]  ;;  %v6469_v7 = vcombine.low %v322_v61, %v322_v61  ;;  %v6358_v12 = vcombine.high %v210_v1, %v214_v2  ;;  %v6357_v15 = vcombine.low %v210_v1, %v214_v2  ;;  %v151_v1 = vld [vmem:[#allocation5 + $0xb0] sm:$0xff] }
  0x94   :  { %1473 = vmatpush1.bf16.msra.mxu1 %v6293_v6  ;;  %v262_v6 = vld [vmem:[#allocation5 + $0x428] sm:$0xff] }
  0x95   :  { %1474 = vmatprep.subr.bf16.mxu1 %v6286_v8  ;;  %v6365_v8 = vcombine.low %v218_v54, %v222_v55  ;;  %v202_v10 = vld [vmem:[#allocation5 + $0x248] sm:$0xff]  ;;  %v1359_v14 = vsel %vm1351_vm1, %v6469_v7, 0  ;;  %v6405_v20 = vcombine.low %v258_v5, %v262_v6  ;;  %v6319_v54 = vcombine.low %v171_v38, %v175_v40 }
  0x96   :  { %1407 = vmatpush2.bf16.msra.mxu0 %v6339_v13  ;;  %v206_v11 = vld [vmem:[#allocation5 + $0x268] sm:$0xff]  ;;  %v6413_v13 = vcombine.low %v266_v59, %v270_v60  ;;  %v6447_v55 = vcombine.low %v299_v43, %v303_v44  ;;  %v159_v59 = vld [vmem:[#allocation5 + $0xf0] sm:$0xff] }
  0x97   :  { %1505 = vmatprep.subr.bf16.mxu0 %v6462_v17  ;;  %v194_v17 = vld [vmem:[#allocation5 + $0x208] sm:$0xff]  ;;  %v6350_v19 = vcombine.high %v202_v10, %v206_v11  ;;  %v283_v60 = vld [vmem:[#allocation5 + $0x4d0] sm:$0xff] }
  0x98   :  { %1475 = vmatpush1.bf16.msra.mxu1 %v6285_v16  ;;  %v6406_v16 = vcombine.high %v258_v5, %v262_v6  ;;  %v279_v5 = vld [vmem:[#allocation5 + $0x4b0] sm:$0xff] }
  0x99   :  { %1476 = vmatprep.subr.bf16.mxu1 %v6278_v18  ;;  %1409 = vmatmul.mubr.bf16.vlgmr.msra.gmra.mxu0 %v7501_v21  ;;  %v198_v18 = vld [vmem:[#allocation5 + $0x228] sm:$0xff] }
  0x9a   :  { %1506 = vmatpush1.bf16.msra.mxu0 %v6461_v24  ;;  %6478 = vmatprep.mubr.msk.bf16.mxu0 %vm1347_vm0, %v7488_v39  ;;  %v6349_v24 = vcombine.low %v202_v10, %v206_v11  ;;  %v6341_v32 = vcombine.low %v194_v17, %v198_v18 }
  0x9b   :  { %1507 = vmatprep.subr.bf16.mxu0 %v6454_v27  ;;  %v315_v27 = vld [vmem:[#allocation5 + $0x5d0] sm:$0xff] }
  0x9c   :  { %1477 = vmatpush1.bf16.msra.mxu1 %v6277_v25  ;;  %v6470_v25 = vcombine.high %v322_v61, %v322_v61  ;;  %v6464_v36 = vcombine.high %v315_v27, %v319_v28  ;;  %v287_v61 = vld [vmem:[#allocation5 + $0x4f0] sm:$0xff] }
  0x9d   :  { %1478 = vmatprep.subr.bf16.mxu1 %v6398_v29  ;;  %v6342_v29 = vcombine.high %v194_v17, %v198_v18  ;;  %v6432_v6 = vcombine.high %v283_v60, %v287_v61  ;;  %v6431_v10 = vcombine.low %v283_v60, %v287_v61 }
  0x9e   :  { %1508 = vmatpush1.bf16.msra.mxu0 %v6453_v33  ;;  %v6336_v33 = vcombine.high %v187_v22, %v191_v23  ;;  %v259_v22 = vld [vmem:[#allocation5 + $0x410] sm:$0xff] }
  0x9f   :  { %1509 = vmatprep.subr.bf16.mxu0 %v6446_v35  ;;  %v311_v35 = vld [vmem:[#allocation5 + $0x5b0] sm:$0xff] }
  0xa0   :  { %1479 = vmatpush2.bf16.msra.mxu1 %v6397_v34  ;;  %v307_v34 = vld [vmem:[#allocation5 + $0x590] sm:$0xff] }
  0xa1   :  { %1480 = vmatprep.subr.bf16.mxu1 %v6390_v41  ;;  %v6463_v41 = vcombine.low %v315_v27, %v319_v28  ;;  %v263_v23 = vld [vmem:[#allocation5 + $0x430] sm:$0xff] }
  0xa2   :  { %1510 = vmatpush1.bf16.msra.mxu0 %v6445_v42  ;;  %v6328_v42 = vcombine.high %v179_v30, %v183_v31  ;;  %v6408_v28 = vcombine.high %v259_v22, %v263_v23 }
  0xa3   :  { %1511 = vmatprep.subr.bf16.mxu0 %v6438_v46  ;;  %v6327_v46 = vcombine.low %v179_v30, %v183_v31  ;;  %v255_v30 = vld [vmem:[#allocation5 + $0x3f0] sm:$0xff] }
  0xa4   :  { %1481 = vmatpush2.bf16.msra.mxu1 %v6389_v45  ;;  %v6456_v45 = vcombine.high %v307_v34, %v311_v35  ;;  %v323_v31 = vld [vmem:[#allocation5 + $0x610] sm:$0xff] }
  0xa5   :  { %1482 = vmatprep.subr.bf16.mxu1 %v6382_v49  ;;  %v6455_v49 = vcombine.low %v307_v34, %v311_v35  ;;  %v6472_v35 = vcombine.high %v323_v31, %v323_v31 }
  0xa6   :  { %1512 = vmatpush1.bf16.msra.mxu0 %v6437_v50  ;;  %v6320_v50 = vcombine.high %v171_v38, %v175_v40  ;;  %v247_v38 = vld [vmem:[#allocation5 + $0x3b0] sm:$0xff]  ;;  %v188_v40 = vld [vmem:[#allocation5 + $0x1d8] sm:$0xff] }
  0xa7   :  { %1513 = vmatprep.subr.bf16.mxu0 %v6430_v53  ;;  %v6448_v53 = vcombine.high %v299_v43, %v303_v44 }
  0xa8   :  { %1483 = vmatpush2.bf16.msra.mxu1 %v6381_v52  ;;  %v295_v52 = vld [vmem:[#allocation5 + $0x530] sm:$0xff] }
  0xa9   :  { %1484 = vmatprep.subr.bf16.mxu1 %v6374_v57  ;;  %v6440_v57 = vcombine.high %v291_v51, %v295_v52  ;;  %v6439_v2 = vcombine.low %v291_v51, %v295_v52 }
  0xaa   :  { %1514 = vmatpush1.bf16.msra.mxu0 %v6429_v58  ;;  %v155_v58 = vld [vmem:[#allocation5 + $0xd0] sm:$0xff] }
  0xab   :  { %1515 = vmatprep.subr.bf16.mxu0 %v6422_v0  ;;  %v147_v0 = vld [vmem:[#allocation5 + $0x90] sm:$0xff]  ;;  %v6303_v7 = vcombine.low %v155_v58, %v159_v59 }
  0xac   :  { %1485 = vmatpush2.bf16.msra.mxu1 %v6373_v62  ;;  %v6311_v62 = vcombine.low %v163_v47, %v167_v48  ;;  %v6296_v11 = vcombine.high %v147_v0, %v151_v1  ;;  %v239_v47 = vld [vmem:[#allocation5 + $0x370] sm:$0xff]  ;;  %v180_v48 = vld [vmem:[#allocation5 + $0x198] sm:$0xff] }
  0xad   :  { %1486 = vmatprep.subr.bf16.mxu1 %v6366_v3  ;;  %v6304_v3 = vcombine.high %v155_v58, %v159_v59 }
  0xae   :  { %1516 = vmatpush1.bf16.msra.mxu0 %v6421_v4  ;;  %v275_v4 = vld [vmem:[#allocation5 + $0x490] sm:$0xff] }
  0xaf   :  { %1517 = vmatprep.subr.bf16.mxu0 %v6414_v9  ;;  %v143_v9 = vld [vmem:[#allocation5 + $0x70] sm:$0xff] }
  0xb0   :  { %1487 = vmatpush2.bf16.msra.mxu1 %v6365_v8  ;;  %v139_v8 = vld [vmem:[#allocation5 + $0x50] sm:$0xff] }
  0xb1   :  { %1488 = vmatprep.subr.bf16.mxu1 %v6358_v12  ;;  %v267_v12 = vld [vmem:[#allocation5 + $0x450] sm:$0xff]  ;;  %v6288_v17 = vcombine.high %v139_v8, %v143_v9 }
  0xb2   :  { %1518 = vmatpush1.bf16.msra.mxu0 %v6413_v13  ;;  %v271_v13 = vld [vmem:[#allocation5 + $0x470] sm:$0xff] }
  0xb3   :  { %1519 = vmatprep.subr.bf16.mxu0 %v6406_v16  ;;  %v6423_v16 = vcombine.low %v275_v4, %v279_v5  ;;  %v6416_v18 = vcombine.high %v267_v12, %v271_v13 }
  0xb4   :  { %1489 = vmatpush2.bf16.msra.mxu1 %v6357_v15  ;;  %v6295_v15 = vcombine.low %v147_v0, %v151_v1  ;;  %v223_v0 = vld [vmem:[#allocation5 + $0x2f0] sm:$0xff]  ;;  %v164_v1 = vld [vmem:[#allocation5 + $0x118] sm:$0xff] }
  0xb5   :  { %1490 = vmatprep.subr.bf16.mxu1 %v6350_v19  ;;  %v131_v19 = vld [vmem:[#allocation5 + $0x10] sm:$0xff] }
  0xb6   :  { %1520 = vmatpush1.bf16.msra.mxu0 %v6405_v20  ;;  %v135_v20 = vld [vmem:[#allocation5 + $0x30] sm:$0xff] }
  0xb7   :  { %6477 = vmatprep.subr.msk.bf16.mxu0 %vm1351_vm1, %v6470_v25  ;;  %v6415_v25 = vcombine.low %v267_v12, %v271_v13  ;;  %v6280_v27 = vcombine.high %v131_v19, %v135_v20 }
  0xb8   :  { %1491 = vmatpush2.bf16.msra.mxu1 %v6349_v24  ;;  %v6287_v24 = vcombine.low %v139_v8, %v143_v9  ;;  %v215_v8 = vld [vmem:[#allocation5 + $0x2b0] sm:$0xff]  ;;  %v156_v9 = vld [vmem:[#allocation5 + $0xd8] sm:$0xff] }
  0xb9   :  { %1492 = vmatprep.subr.bf16.mxu1 %v6342_v29  ;;  %v251_v29 = vld [vmem:[#allocation5 + $0x3d0] sm:$0xff] }
  0xba   :  { %1536 = vmatpush2.bf16.msra.mxu0 %v1359_v14  ;;  %v6424_v14 = vcombine.high %v275_v4, %v279_v5  ;;  %v6400_v34 = vcombine.high %v251_v29, %v255_v30 }
  0xbb   :  { %1548 = vmatprep.subr.bf16.mxu0 %v6336_v33  ;;  %v6407_v33 = vcombine.low %v259_v22, %v263_v23  ;;  %v195_v23 = vld [vmem:[#allocation5 + $0x210] sm:$0xff] }
  0xbc   :  { %1493 = vmatpush2.bf16.msra.mxu1 %v6341_v32  ;;  %v6279_v32 = vcombine.low %v131_v19, %v135_v20 }
  0xbd   :  { %1591 = vmatprep.subr.bf16.mxu1 %v6464_v36  ;;  %1538 = vmatmul.mubr.bf16.vlgmr.msra.gmra.mxu0 %v7497_v26  ;;  %v6471_v36 = vcombine.low %v323_v31, %v323_v31 }
  0xbe   :  { %1549 = vmatpush1.bf16.msra.mxu0 %v6335_v37  ;;  %1580 = vmatprep.mubr.bf16.mxu0 %v7492_v63  ;;  %v243_v37 = vld [vmem:[#allocation5 + $0x390] sm:$0xff] }
  0xbf   :  { %1495 = vmatmul.mubr.bf16.vlgmr.msra.gmra.mxu1 %v7501_v21  ;;  %1550 = vmatprep.subr.bf16.mxu0 %v6328_v42  ;;  %v6399_v42 = vcombine.low %v251_v29, %v255_v30  ;;  %v6392_v43 = vcombine.high %v243_v37, %v247_v38  ;;  %v1365_v44 = vsel %vm1351_vm1, %v6471_v36, 0 }
  0xc0   :  { %1592 = vmatpush1.bf16.msra.mxu1 %v6463_v41  ;;  %6480 = vmatprep.mubr.msk.bf16.mxu1 %vm1347_vm0, %v7488_v39  ;;  %v192_v41 = vld [vmem:[#allocation5 + $0x1f8] sm:$0xff] }
  0xc1   :  { %1593 = vmatprep.subr.bf16.mxu1 %v6456_v45  ;;  %v6338_v45 = vcombine.high %v188_v40, %v192_v41  ;;  %v6337_v51 = vcombine.low %v188_v40, %v192_v41  ;;  %v308_v41 = vld [vmem:[#allocation5 + $0x598] sm:$0xff] }
  0xc2   :  { %1551 = vmatpush1.bf16.msra.mxu0 %v6327_v46  ;;  %v235_v46 = vld [vmem:[#allocation5 + $0x350] sm:$0xff] }
  0xc3   :  { %1552 = vmatprep.subr.bf16.mxu0 %v6320_v50  ;;  %v6391_v50 = vcombine.low %v243_v37, %v247_v38  ;;  %v6384_v52 = vcombine.high %v235_v46, %v239_v47  ;;  %v6383_v58 = vcombine.low %v235_v46, %v239_v47 }
  0xc4   :  { %1594 = vmatpush1.bf16.msra.mxu1 %v6455_v49  ;;  %v184_v49 = vld [vmem:[#allocation5 + $0x1b8] sm:$0xff] }
  0xc5   :  { %1595 = vmatprep.subr.bf16.mxu1 %v6448_v53  ;;  %v6330_v53 = vcombine.high %v180_v48, %v184_v49  ;;  %v6329_v59 = vcombine.low %v180_v48, %v184_v49  ;;  %v300_v49 = vld [vmem:[#allocation5 + $0x558] sm:$0xff] }
  0xc6   :  { %1553 = vmatpush1.bf16.msra.mxu0 %v6319_v54  ;;  %v227_v54 = vld [vmem:[#allocation5 + $0x310] sm:$0xff] }
  0xc7   :  { %1554 = vmatprep.subr.bf16.mxu0 %v6312_v56  ;;  %v172_v56 = vld [vmem:[#allocation5 + $0x158] sm:$0xff] }
  0xc8   :  { %1596 = vmatpush1.bf16.msra.mxu1 %v6447_v55  ;;  %v231_v55 = vld [vmem:[#allocation5 + $0x330] sm:$0xff] }
  0xc9   :  { %1597 = vmatprep.subr.bf16.mxu1 %v6440_v57  ;;  %v176_v57 = vld [vmem:[#allocation5 + $0x178] sm:$0xff]  ;;  %v6376_v60 = vcombine.high %v227_v54, %v231_v55 }
  0xca   :  { %1555 = vmatpush1.bf16.msra.mxu0 %v6311_v62  ;;  %v6322_v61 = vcombine.high %v172_v56, %v176_v57  ;;  %v219_v62 = vld [vmem:[#allocation5 + $0x2d0] sm:$0xff]  ;;  %v6321_v4 = vcombine.low %v172_v56, %v176_v57  ;;  %v292_v57 = vld [vmem:[#allocation5 + $0x518] sm:$0xff] }
  0xcb   :  { %1556 = vmatprep.subr.bf16.mxu0 %v6304_v3  ;;  %v6375_v3 = vcombine.low %v227_v54, %v231_v55  ;;  %v6368_v5 = vcombine.high %v219_v62, %v223_v0 }
  0xcc   :  { %1598 = vmatpush1.bf16.msra.mxu1 %v6439_v2  ;;  %v168_v2 = vld [vmem:[#allocation5 + $0x138] sm:$0xff] }
  0xcd   :  { %1599 = vmatprep.subr.bf16.mxu1 %v6432_v6  ;;  %v6314_v6 = vcombine.high %v164_v1, %v168_v2  ;;  %v6313_v12 = vcombine.low %v164_v1, %v168_v2  ;;  %v284_v2 = vld [vmem:[#allocation5 + $0x4d8] sm:$0xff] }
  0xce   :  { %1557 = vmatpush1.bf16.msra.mxu0 %v6303_v7  ;;  %v211_v7 = vld [vmem:[#allocation5 + $0x290] sm:$0xff] }
  0xcf   :  { %1558 = vmatprep.subr.bf16.mxu0 %v6296_v11  ;;  %v6367_v11 = vcombine.low %v219_v62, %v223_v0 }
  0xd0   :  { %1600 = vmatpush1.bf16.msra.mxu1 %v6431_v10  ;;  %v160_v10 = vld [vmem:[#allocation5 + $0xf8] sm:$0xff] }
  0xd1   :  { %1601 = vmatprep.subr.bf16.mxu1 %v6424_v14  ;;  %v6306_v13 = vcombine.high %v156_v9, %v160_v10  ;;  %v203_v14 = vld [vmem:[#allocation5 + $0x250] sm:$0xff]  ;;  %v6305_v19 = vcombine.low %v156_v9, %v160_v10  ;;  %v276_v9 = vld [vmem:[#allocation5 + $0x498] sm:$0xff] }
  0xd2   :  { %1559 = vmatpush1.bf16.msra.mxu0 %v6295_v15  ;;  %v207_v15 = vld [vmem:[#allocation5 + $0x270] sm:$0xff]  ;;  %v280_v10 = vld [vmem:[#allocation5 + $0x4b8] sm:$0xff] }
  0xd3   :  { %1560 = vmatprep.subr.bf16.mxu0 %v6288_v17  ;;  %v152_v17 = vld [vmem:[#allocation5 + $0xb8] sm:$0xff]  ;;  %v6352_v20 = vcombine.high %v203_v14, %v207_v15 }
  0xd4   :  { %1602 = vmatpush1.bf16.msra.mxu1 %v6423_v16  ;;  %v148_v16 = vld [vmem:[#allocation5 + $0x98] sm:$0xff] }
  0xd5   :  { %1603 = vmatprep.subr.bf16.mxu1 %v6416_v18  ;;  %v6359_v18 = vcombine.low %v211_v7, %v215_v8  ;;  %v6298_v22 = vcombine.high %v148_v16, %v152_v17  ;;  %v6297_v29 = vcombine.low %v148_v16, %v152_v17  ;;  %v268_v16 = vld [vmem:[#allocation5 + $0x458] sm:$0xff] }
  0xd6   :  { %1561 = vmatpush1.bf16.msra.mxu0 %v6287_v24  ;;  %v199_v24 = vld [vmem:[#allocation5 + $0x230] sm:$0xff]  ;;  %v272_v17 = vld [vmem:[#allocation5 + $0x478] sm:$0xff] }
  0xd7   :  { %1562 = vmatprep.subr.bf16.mxu0 %v6280_v27  ;;  %v144_v27 = vld [vmem:[#allocation5 + $0x78] sm:$0xff]  ;;  %v6344_v30 = vcombine.high %v195_v23, %v199_v24  ;;  %v6343_v36 = vcombine.low %v195_v23, %v199_v24  ;;  %v6418_v23 = vcombine.high %v268_v16, %v272_v17 }
  0xd8   :  { %1604 = vmatpush1.bf16.msra.mxu1 %v6415_v25  ;;  %v140_v25 = vld [vmem:[#allocation5 + $0x58] sm:$0xff] }
  0xd9   :  { %1605 = vmatprep.subr.bf16.mxu1 %v6408_v28  ;;  %v6351_v28 = vcombine.low %v203_v14, %v207_v15  ;;  %v6290_v31 = vcombine.high %v140_v25, %v144_v27  ;;  %v6289_v37 = vcombine.low %v140_v25, %v144_v27  ;;  %v6426_v14 = vcombine.high %v276_v9, %v280_v10  ;;  %v260_v25 = vld [vmem:[#allocation5 + $0x418] sm:$0xff] }
  0xda   :  { %1563 = vmatpush1.bf16.msra.mxu0 %v6279_v32  ;;  %v316_v32 = vld [vmem:[#allocation5 + $0x5d8] sm:$0xff] }
  0xdb   :  { %1564 = vmatprep.subr.bf16.mxu0 %v6400_v34  ;;  %v132_v34 = vld [vmem:[#allocation5 + $0x18] sm:$0xff] }
  0xdc   :  { %1606 = vmatpush1.bf16.msra.mxu1 %v6407_v33  ;;  %v320_v33 = vld [vmem:[#allocation5 + $0x5f8] sm:$0xff] }
  0xdd   :  { %6479 = vmatprep.subr.msk.bf16.mxu1 %vm1351_vm1, %v6472_v35  ;;  %v136_v35 = vld [vmem:[#allocation5 + $0x38] sm:$0xff]  ;;  %v6466_v38 = vcombine.high %v316_v32, %v320_v33 }
  0xde   :  { %1565 = vmatpush2.bf16.msra.mxu0 %v6399_v42  ;;  %v6282_v40 = vcombine.high %v132_v34, %v136_v35  ;;  %v312_v42 = vld [vmem:[#allocation5 + $0x5b8] sm:$0xff]  ;;  %v6281_v46 = vcombine.low %v132_v34, %v136_v35 }
  0xdf   :  { %1566 = vmatprep.subr.bf16.mxu0 %v6392_v43  ;;  %v252_v43 = vld [vmem:[#allocation5 + $0x3d8] sm:$0xff]  ;;  %v6458_v47 = vcombine.high %v308_v41, %v312_v42 }
  0xe0   :  { %1622 = vmatpush2.bf16.msra.mxu1 %v1365_v44  ;;  %v256_v44 = vld [vmem:[#allocation5 + $0x3f8] sm:$0xff] }
  0xe1   :  { %1634 = vmatprep.subr.bf16.mxu1 %v6338_v45  ;;  %v6465_v45 = vcombine.low %v316_v32, %v320_v33  ;;  %v6402_v48 = vcombine.high %v252_v43, %v256_v44  ;;  %v6401_v54 = vcombine.low %v252_v43, %v256_v44  ;;  %v264_v27 = vld [vmem:[#allocation5 + $0x438] sm:$0xff]  ;;  %v1800_v43 = vld [vmem:[#allocation8 + $0x1c0] sm:$0xff] }
  0xe2   :  { %1567 = vmatpush2.bf16.msra.mxu0 %v6391_v50  ;;  %v304_v50 = vld [vmem:[#allocation5 + $0x578] sm:$0xff]  ;;  %v6410_v32 = vcombine.high %v260_v25, %v264_v27  ;;  %v1804_v44 = vld [vmem:[#allocation8 + $0x1e0] sm:$0xff] }
  0xe3   :  { %1624 = vmatmul.mubr.bf16.vlgmr.msra.gmra.mxu1 %v7497_v26  ;;  %1568 = vmatprep.subr.bf16.mxu0 %v6384_v52  ;;  %v248_v52 = vld [vmem:[#allocation5 + $0x3b8] sm:$0xff]  ;;  %v6450_v55 = vcombine.high %v300_v49, %v304_v50 }
  0xe4   :  { %1635 = vmatpush1.bf16.msra.mxu1 %v6337_v51  ;;  %1666 = vmatprep.mubr.bf16.mxu1 %v7492_v63  ;;  %v6360_v63 = vcombine.high %v211_v7, %v215_v8  ;;  %v244_v51 = vld [vmem:[#allocation5 + $0x398] sm:$0xff] }
  0xe5   :  { %1636 = vmatprep.subr.bf16.mxu1 %v6330_v53  ;;  %v6457_v53 = vcombine.low %v308_v41, %v312_v42  ;;  %v6394_v56 = vcombine.high %v244_v51, %v248_v52  ;;  %v6393_v62 = vcombine.low %v244_v51, %v248_v52  ;;  %v324_v34 = vld [vmem:[#allocation5 + $0x618] sm:$0xff]  ;;  %v1796_v51 = vld [vmem:[#allocation8 + $0x1a0] sm:$0xff] }
  0xe6   :  { %1569 = vmatpush2.bf16.msra.mxu0 %v6383_v58  ;;  %v296_v58 = vld [vmem:[#allocation5 + $0x538] sm:$0xff]  ;;  %v6473_v41 = vcombine.low %v324_v34, %v324_v34 }
  0xe7   :  { %1570 = vmatprep.subr.bf16.mxu0 %v6376_v60  ;;  %v240_v60 = vld [vmem:[#allocation5 + $0x378] sm:$0xff]  ;;  %v6442_v0 = vcombine.high %v292_v57, %v296_v58 }
  0xe8   :  { %1637 = vmatpush1.bf16.msra.mxu1 %v6329_v59  ;;  %v236_v59 = vld [vmem:[#allocation5 + $0x358] sm:$0xff] }
  0xe9   :  { %1638 = vmatprep.subr.bf16.mxu1 %v6322_v61  ;;  %v6449_v61 = vcombine.low %v300_v49, %v304_v50  ;;  %v6386_v1 = vcombine.high %v236_v59, %v240_v60  ;;  %v196_v35 = vld [vmem:[#allocation5 + $0x218] sm:$0xff]  ;;  %v6540_v49 = vcombine.high %v1800_v43, %v1804_v44  ;;  %v1792_v50 = vld [vmem:[#allocation8 + $0x180] sm:$0xff] }
  0xea   :  { %1571 = vmatpush2.bf16.msra.mxu0 %v6375_v3  ;;  %v228_v3 = vld [vmem:[#allocation5 + $0x318] sm:$0xff] }
  0xeb   :  { %1572 = vmatprep.subr.bf16.mxu0 %v6368_v5  ;;  %v6441_v5 = vcombine.low %v292_v57, %v296_v58  ;;  %v1784_v58 = vld [vmem:[#allocation8 + $0x140] sm:$0xff] }
  0xec   :  { %1639 = vmatpush1.bf16.msra.mxu1 %v6321_v4  ;;  %v232_v4 = vld [vmem:[#allocation5 + $0x338] sm:$0xff] }
  0xed   :  { %1640 = vmatprep.subr.bf16.mxu1 %v6314_v6  ;;  %v6385_v6 = vcombine.low %v236_v59, %v240_v60  ;;  %v6378_v8 = vcombine.high %v228_v3, %v232_v4  ;;  %v1788_v59 = vld [vmem:[#allocation8 + $0x160] sm:$0xff] }
  0xee   :  { %1573 = vmatpush2.bf16.msra.mxu0 %v6367_v11  ;;  %v220_v11 = vld [vmem:[#allocation5 + $0x2d8] sm:$0xff] }
  0xef   :  { %1574 = vmatprep.subr.bf16.mxu0 %v6360_v63 }
  0xf0   :  { %1641 = vmatpush1.bf16.msra.mxu1 %v6313_v12  ;;  %v224_v12 = vld [vmem:[#allocation5 + $0x2f8] sm:$0xff] }
  0xf1   :  { %1642 = vmatprep.subr.bf16.mxu1 %v6306_v13  ;;  %v6377_v13 = vcombine.low %v228_v3, %v232_v4  ;;  %v6370_v15 = vcombine.high %v220_v11, %v224_v12  ;;  %v1780_v3 = vld [vmem:[#allocation8 + $0x120] sm:$0xff] }
  0xf2   :  { %1575 = vmatpush2.bf16.msra.mxu0 %v6359_v18  ;;  %v212_v18 = vld [vmem:[#allocation5 + $0x298] sm:$0xff] }
  0xf3   :  { %1576 = vmatprep.subr.bf16.mxu0 %v6352_v20  ;;  %v6425_v20 = vcombine.low %v276_v9, %v280_v10  ;;  %v1768_v9 = vld [vmem:[#allocation8 + $0xc0] sm:$0xff] }
  0xf4   :  { %1643 = vmatpush1.bf16.msra.mxu1 %v6305_v19  ;;  %v216_v19 = vld [vmem:[#allocation5 + $0x2b8] sm:$0xff] }
  0xf5   :  { %1644 = vmatprep.subr.bf16.mxu1 %v6298_v22  ;;  %v6369_v22 = vcombine.low %v220_v11, %v224_v12  ;;  %v6362_v24 = vcombine.high %v212_v18, %v216_v19  ;;  %v1896_v11 = vld [vmem:[#allocation8 + $0x4c0] sm:$0xff] }
  0xf6   :  { %1577 = vmatpush2.bf16.msra.mxu0 %v6351_v28  ;;  %v204_v28 = vld [vmem:[#allocation5 + $0x258] sm:$0xff]  ;;  %v1900_v12 = vld [vmem:[#allocation8 + $0x4e0] sm:$0xff] }
  0xf7   :  { %1578 = vmatprep.subr.bf16.mxu0 %v6344_v30  ;;  %v6417_v30 = vcombine.low %v268_v16, %v272_v17  ;;  %v1764_v16 = vld [vmem:[#allocation8 + $0xa0] sm:$0xff]  ;;  %v6636_v17 = vcombine.high %v1896_v11, %v1900_v12 }
  0xf8   :  { %1645 = vmatpush1.bf16.msra.mxu1 %v6297_v29  ;;  %v208_v29 = vld [vmem:[#allocation5 + $0x278] sm:$0xff] }
  0xf9   :  { %1646 = vmatprep.subr.bf16.mxu1 %v6290_v31  ;;  %v6361_v31 = vcombine.low %v212_v18, %v216_v19  ;;  %v6354_v33 = vcombine.high %v204_v28, %v208_v29  ;;  %v1888_v18 = vld [vmem:[#allocation8 + $0x480] sm:$0xff] }
  0xfa   :  { %1579 = vmatpush2.bf16.msra.mxu0 %v6343_v36  ;;  %v200_v36 = vld [vmem:[#allocation5 + $0x238] sm:$0xff]  ;;  %v1892_v19 = vld [vmem:[#allocation8 + $0x4a0] sm:$0xff] }
  0xfb   :  { %1677 = vmatprep.subr.bf16.mxu0 %v6466_v38  ;;  %v6353_v38 = vcombine.low %v204_v28, %v208_v29  ;;  %v6346_v42 = vcombine.high %v196_v35, %v200_v36  ;;  %v1880_v28 = vld [vmem:[#allocation8 + $0x440] sm:$0xff] }
  0xfc   :  { %1647 = vmatpush1.bf16.msra.mxu1 %v6289_v37  ;;  %v6409_v37 = vcombine.low %v260_v25, %v264_v27  ;;  %v1756_v25 = vld [vmem:[#allocation8 + $0x60] sm:$0xff]  ;;  %v6628_v27 = vcombine.high %v1888_v18, %v1892_v19 }
  0xfd   :  { %1648 = vmatprep.subr.bf16.mxu1 %v6282_v40  ;;  %1581 = vmatmul.mubr.bf16.vlgmr.msra.gmra.mxu0 %v7501_v21  ;;  %v6474_v40 = vcombine.high %v324_v34, %v324_v34  ;;  %v1884_v29 = vld [vmem:[#allocation8 + $0x460] sm:$0xff] }
  0xfe   :  { %1678 = vmatpush1.bf16.msra.mxu0 %v6465_v45  ;;  %6482 = vmatprep.mubr.msk.bf16.mxu0 %vm1347_vm0, %v7488_v39  ;;  %v288_v39 = vld [vmem:[#allocation5 + $0x4f8] sm:$0xff]  ;;  %v1928_v45 = vld [vmem:[#allocation8 + $0x5c0] sm:$0xff] }
  0xff   :  { %1679 = vmatprep.subr.bf16.mxu0 %v6458_v47  ;;  %v6434_v7 = vcombine.high %v284_v2, %v288_v39  ;;  %v6433_v63 = vcombine.low %v284_v2, %v288_v39  ;;  %v6345_v47 = vcombine.low %v196_v35, %v200_v36  ;;  %v1776_v39 = vld [vmem:[#allocation8 + $0x100] sm:$0xff]  ;;  %v6620_v35 = vcombine.high %v1880_v28, %v1884_v29 }
 0x100   :  { %1649 = vmatpush1.bf16.msra.mxu1 %v6281_v46  ;;  %v1932_v46 = vld [vmem:[#allocation8 + $0x5e0] sm:$0xff] }
 0x101   :  { %1650 = vmatprep.subr.bf16.mxu1 %v6402_v48  ;;  %v1371_v48 = vsel %vm1351_vm1, %v6473_v41, 0  ;;  %v6668_v52 = vcombine.high %v1928_v45, %v1932_v46  ;;  %v6667_v57 = vcombine.low %v1928_v45, %v1932_v46  ;;  %v1748_v34 = vld [vmem:[#allocation8 + $0x20] sm:$0xff]  ;;  %v6619_v41 = vcombine.low %v1880_v28, %v1884_v29 }
 0x102   :  { %1680 = vmatpush1.bf16.msra.mxu0 %v6457_v53  ;;  %v1920_v53 = vld [vmem:[#allocation8 + $0x580] sm:$0xff] }
 0x103   :  { %1681 = vmatprep.subr.bf16.mxu0 %v6450_v55  ;;  %v6539_v55 = vcombine.low %v1800_v43, %v1804_v44  ;;  %v1872_v36 = vld [vmem:[#allocation8 + $0x400] sm:$0xff] }
 0x104   :  { %1651 = vmatpush2.bf16.msra.mxu1 %v6401_v54  ;;  %v1924_v54 = vld [vmem:[#allocation8 + $0x5a0] sm:$0xff] }
 0x105   :  { %1652 = vmatprep.subr.bf16.mxu1 %v6394_v56  ;;  %v6532_v56 = vcombine.high %v1792_v50, %v1796_v51  ;;  %v6660_v60 = vcombine.high %v1920_v53, %v1924_v54  ;;  %v6659_v2 = vcombine.low %v1920_v53, %v1924_v54  ;;  %v1868_v43 = vld [vmem:[#allocation8 + $0x3e0] sm:$0xff] }
 0x106   :  { %1682 = vmatpush1.bf16.msra.mxu0 %v6449_v61  ;;  %v1912_v61 = vld [vmem:[#allocation8 + $0x540] sm:$0xff] }
 0x107   :  { %1683 = vmatprep.subr.bf16.mxu0 %v6442_v0  ;;  %v6531_v0 = vcombine.low %v1792_v50, %v1796_v51  ;;  %v1992_v45 = vld [vmem:[#allocation8 + $0x7c0] sm:$0xff] }
 0x108   :  { %1653 = vmatpush2.bf16.msra.mxu1 %v6393_v62  ;;  %v1916_v62 = vld [vmem:[#allocation8 + $0x560] sm:$0xff] }
 0x109   :  { %1654 = vmatprep.subr.bf16.mxu1 %v6386_v1  ;;  %v6524_v1 = vcombine.high %v1784_v58, %v1788_v59  ;;  %v6652_v4 = vcombine.high %v1912_v61, %v1916_v62  ;;  %v1996_v46 = vld [vmem:[#allocation8 + $0x7e0] sm:$0xff] }
 0x10a   :  { %1684 = vmatpush1.bf16.msra.mxu0 %v6441_v5  ;;  %v1904_v5 = vld [vmem:[#allocation8 + $0x500] sm:$0xff] }
 0x10b   :  { %1685 = vmatprep.subr.bf16.mxu0 %v6434_v7  ;;  %v6523_v7 = vcombine.low %v1784_v58, %v1788_v59  ;;  %v1856_v50 = vld [vmem:[#allocation8 + $0x380] sm:$0xff] }
 0x10c   :  { %1655 = vmatpush2.bf16.msra.mxu1 %v6385_v6  ;;  %v1908_v6 = vld [vmem:[#allocation8 + $0x520] sm:$0xff] }
 0x10d   :  { %1656 = vmatprep.subr.bf16.mxu1 %v6378_v8  ;;  %v6651_v8 = vcombine.low %v1912_v61, %v1916_v62  ;;  %v6644_v10 = vcombine.high %v1904_v5, %v1908_v6  ;;  %v1860_v51 = vld [vmem:[#allocation8 + $0x3a0] sm:$0xff] }
 0x10e   :  { %1686 = vmatpush1.bf16.msra.mxu0 %v6433_v63  ;;  %v6515_v63 = vcombine.low %v1776_v39, %v1780_v3  ;;  %v1984_v53 = vld [vmem:[#allocation8 + $0x780] sm:$0xff] }
 0x10f   :  { %1687 = vmatprep.subr.bf16.mxu0 %v6426_v14  ;;  %v6643_v14 = vcombine.low %v1904_v5, %v1908_v6  ;;  %v1988_v54 = vld [vmem:[#allocation8 + $0x7a0] sm:$0xff] }
 0x110   :  { %1657 = vmatpush2.bf16.msra.mxu1 %v6377_v13  ;;  %v1848_v58 = vld [vmem:[#allocation8 + $0x340] sm:$0xff] }
 0x111   :  { %1658 = vmatprep.subr.bf16.mxu1 %v6370_v15  ;;  %v1760_v15 = vld [vmem:[#allocation8 + $0x80] sm:$0xff] }
 0x112   :  { %1688 = vmatpush1.bf16.msra.mxu0 %v6425_v20  ;;  %v1852_v59 = vld [vmem:[#allocation8 + $0x360] sm:$0xff] }
 0x113   :  { %1689 = vmatprep.subr.bf16.mxu0 %v6418_v23  ;;  %v6635_v23 = vcombine.low %v1896_v11, %v1900_v12  ;;  %v1976_v61 = vld [vmem:[#allocation8 + $0x740] sm:$0xff] }
 0x114   :  { %1659 = vmatpush2.bf16.msra.mxu1 %v6369_v22  ;;  %v6500_v22 = vcombine.high %v1760_v15, %v1764_v16  ;;  %v1980_v62 = vld [vmem:[#allocation8 + $0x760] sm:$0xff] }
 0x115   :  { %1660 = vmatprep.subr.bf16.mxu1 %v6362_v24  ;;  %v1752_v24 = vld [vmem:[#allocation8 + $0x40] sm:$0xff] }
 0x116   :  { %1690 = vmatpush1.bf16.msra.mxu0 %v6417_v30  ;;  %v6499_v30 = vcombine.low %v1760_v15, %v1764_v16  ;;  %v1968_v5 = vld [vmem:[#allocation8 + $0x700] sm:$0xff] }
 0x117   :  { %1691 = vmatprep.subr.bf16.mxu0 %v6410_v32  ;;  %v6627_v32 = vcombine.low %v1888_v18, %v1892_v19  ;;  %v1972_v6 = vld [vmem:[#allocation8 + $0x720] sm:$0xff]  ;;  %v327_v18 = vlaneseq }
 0x118   :  { %1661 = vmatpush2.bf16.msra.mxu1 %v6361_v31  ;;  %v6492_v31 = vcombine.high %v1752_v24, %v1756_v25  ;;  %v1960_v11 = vld [vmem:[#allocation8 + $0x6c0] sm:$0xff] }
 0x119   :  { %1662 = vmatprep.subr.bf16.mxu1 %v6354_v33  ;;  %v1744_v33 = vld [vmem:[#allocation8] sm:$0xff]  ;;  %v7524_v29 = vshrl.u32 %v327_v18, 7 }
 0x11a   :  { %1692 = vmatpush1.bf16.msra.mxu0 %v6409_v37  ;;  %v1876_v37 = vld [vmem:[#allocation8 + $0x420] sm:$0xff] }
 0x11b   :  { %6481 = vmatprep.subr.msk.bf16.mxu0 %vm1351_vm1, %v6474_v40  ;;  %v6484_v40 = vcombine.high %v1744_v33, %v1748_v34  ;;  %v6612_v44 = vcombine.high %v1872_v36, %v1876_v37  ;;  %v1964_v12 = vld [vmem:[#allocation8 + $0x6e0] sm:$0xff] }
 0x11c   :  { %1663 = vmatpush2.bf16.msra.mxu1 %v6353_v38  ;;  %v6491_v38 = vcombine.low %v1752_v24, %v1756_v25  ;;  %v1824_v15 = vld [vmem:[#allocation8 + $0x280] sm:$0xff]  ;;  %v6699_v24 = vcombine.low %v1960_v11, %v1964_v12 }
 0x11d   :  { %1664 = vmatprep.subr.bf16.mxu1 %v6346_v42  ;;  %v1864_v42 = vld [vmem:[#allocation8 + $0x3c0] sm:$0xff] }
 0x11e   :  { %1708 = vmatpush2.bf16.msra.mxu0 %v1371_v48  ;;  %v6604_v48 = vcombine.high %v1864_v42, %v1868_v43  ;;  %v1828_v16 = vld [vmem:[#allocation8 + $0x2a0] sm:$0xff] }
 0x11f   :  { %4858 = vmatprep.subr.bf16.mxu0 %v6540_v49  ;;  %v6611_v49 = vcombine.low %v1872_v36, %v1876_v37  ;;  %v1952_v19 = vld [vmem:[#allocation8 + $0x680] sm:$0xff] }
 0x120   :  { %1665 = vmatpush2.bf16.msra.mxu1 %v6345_v47  ;;  %v6483_v47 = vcombine.low %v1744_v33, %v1748_v34  ;;  %v1816_v25 = vld [vmem:[#allocation8 + $0x240] sm:$0xff] }
 0x121   :  { %4901 = vmatprep.subr.bf16.mxu1 %v6668_v52  ;;  %1710 = vmatmul.mubr.bf16.vlgmr.msra.gmra.mxu0 %v7497_v26  ;;  %v6516_v26 = vcombine.high %v1776_v39, %v1780_v3  ;;  %v6732_v52 = vcombine.high %v1992_v45, %v1996_v46  ;;  %v1840_v39 = vld [vmem:[#allocation8 + $0x300] sm:$0xff] }
 0x122   :  { %4859 = vmatpush1.bf16.msra.mxu0 %v6539_v55  ;;  %v6603_v55 = vcombine.low %v1864_v42, %v1868_v43  ;;  %v1844_v3 = vld [vmem:[#allocation8 + $0x320] sm:$0xff] }
 0x123   :  { %1667 = vmatmul.mubr.bf16.vlgmr.msra.gmra.mxu1 %v7501_v21  ;;  %4860 = vmatprep.subr.bf16.mxu0 %v6532_v56  ;;  %v1772_v21 = vld [vmem:[#allocation8 + $0xe0] sm:$0xff]  ;;  %v6596_v56 = vcombine.high %v1856_v50, %v1860_v51 }
 0x124   :  { %4902 = vmatpush1.bf16.msra.mxu1 %v6667_v57  ;;  %v6508_v13 = vcombine.high %v1768_v9, %v1772_v21  ;;  %v6507_v20 = vcombine.low %v1768_v9, %v1772_v21  ;;  %v6731_v57 = vcombine.low %v1992_v45, %v1996_v46  ;;  %v1832_v9 = vld [vmem:[#allocation8 + $0x2c0] sm:$0xff] }
 0x125   :  { %4903 = vmatprep.subr.bf16.mxu1 %v6660_v60  ;;  %v6724_v60 = vcombine.high %v1984_v53, %v1988_v54  ;;  %v1836_v21 = vld [vmem:[#allocation8 + $0x2e0] sm:$0xff] }
 0x126   :  { %4861 = vmatpush1.bf16.msra.mxu0 %v6531_v0  ;;  %v6595_v0 = vcombine.low %v1856_v50, %v1860_v51  ;;  %v1808_v36 = vld [vmem:[#allocation8 + $0x200] sm:$0xff] }
 0x127   :  { %4862 = vmatprep.subr.bf16.mxu0 %v6524_v1  ;;  %v6588_v1 = vcombine.high %v1848_v58, %v1852_v59  ;;  %v1812_v37 = vld [vmem:[#allocation8 + $0x220] sm:$0xff] }
 0x128   :  { %4904 = vmatpush1.bf16.msra.mxu1 %v6659_v2  ;;  %v6723_v2 = vcombine.low %v1984_v53, %v1988_v54  ;;  %v1936_v42 = vld [vmem:[#allocation8 + $0x600] sm:$0xff]  ;;  %v6548_v46 = vcombine.high %v1808_v36, %v1812_v37 }
 0x129   :  { %4905 = vmatprep.subr.bf16.mxu1 %v6652_v4  ;;  %v6716_v4 = vcombine.high %v1976_v61, %v1980_v62  ;;  %v1940_v43 = vld [vmem:[#allocation8 + $0x620] sm:$0xff] }
 0x12a   :  { %4863 = vmatpush1.bf16.msra.mxu0 %v6523_v7  ;;  %v6587_v7 = vcombine.low %v1848_v58, %v1852_v59  ;;  %v2056_v50 = vld [vmem:[#allocation8 + $0x9c0] sm:$0xff]  ;;  %v6675_v59 = vcombine.low %v1936_v42, %v1940_v43 }
 0x12b   :  { %4864 = vmatprep.subr.bf16.mxu0 %v6516_v26  ;;  %v6580_v26 = vcombine.high %v1840_v39, %v1844_v3  ;;  %v2060_v51 = vld [vmem:[#allocation8 + $0x9e0] sm:$0xff] }
 0x12c   :  { %4906 = vmatpush1.bf16.msra.mxu1 %v6651_v8  ;;  %v6715_v8 = vcombine.low %v1976_v61, %v1980_v62  ;;  %v2044_v18 = vld [vmem:[#allocation8 + $0x960] sm:$0xff] }
 0x12d   :  { %4907 = vmatprep.subr.bf16.mxu1 %v6644_v10  ;;  %v6708_v10 = vcombine.high %v1968_v5, %v1972_v6 }
 0x12e   :  { %4865 = vmatpush1.bf16.msra.mxu0 %v6515_v63  ;;  %v6579_v63 = vcombine.low %v1840_v39, %v1844_v3 }
 0x12f   :  { %4866 = vmatprep.subr.bf16.mxu0 %v6508_v13  ;;  %v6572_v13 = vcombine.high %v1832_v9, %v1836_v21 }
 0x130   :  { %4908 = vmatpush1.bf16.msra.mxu1 %v6643_v14  ;;  %v6707_v14 = vcombine.low %v1968_v5, %v1972_v6 }
 0x131   :  { %4909 = vmatprep.subr.bf16.mxu1 %v6636_v17  ;;  %v6700_v17 = vcombine.high %v1960_v11, %v1964_v12  ;;  %v2048_v11 = vld [vmem:[#allocation8 + $0x980] sm:$0xff] }
 0x132   :  { %4867 = vmatpush1.bf16.msra.mxu0 %v6507_v20  ;;  %v1956_v20 = vld [vmem:[#allocation8 + $0x6a0] sm:$0xff] }
 0x133   :  { %4868 = vmatprep.subr.bf16.mxu0 %v6500_v22  ;;  %v6571_v22 = vcombine.low %v1832_v9, %v1836_v21  ;;  %v6692_v28 = vcombine.high %v1952_v19, %v1956_v20  ;;  %v6691_v34 = vcombine.low %v1952_v19, %v1956_v20  ;;  %v2052_v12 = vld [vmem:[#allocation8 + $0x9a0] sm:$0xff] }
 0x134   :  { %4910 = vmatpush1.bf16.msra.mxu1 %v6635_v23  ;;  %v6564_v23 = vcombine.high %v1824_v15, %v1828_v16  ;;  %v6787_v19 = vcombine.low %v2048_v11, %v2052_v12 }
 0x135   :  { %4911 = vmatprep.subr.bf16.mxu1 %v6628_v27  ;;  %v1820_v27 = vld [vmem:[#allocation8 + $0x260] sm:$0xff] }
 0x136   :  { %4869 = vmatpush1.bf16.msra.mxu0 %v6499_v30  ;;  %v1944_v30 = vld [vmem:[#allocation8 + $0x640] sm:$0xff]  ;;  %v6556_v33 = vcombine.high %v1816_v25, %v1820_v27  ;;  %v6555_v45 = vcombine.low %v1816_v25, %v1820_v27 }
 0x137   :  { %4870 = vmatprep.subr.bf16.mxu0 %v6492_v31  ;;  %v1948_v31 = vld [vmem:[#allocation8 + $0x660] sm:$0xff] }
 0x138   :  { %4912 = vmatpush1.bf16.msra.mxu1 %v6627_v32  ;;  %v6563_v32 = vcombine.low %v1824_v15, %v1828_v16  ;;  %v6788_v16 = vcombine.high %v2048_v11, %v2052_v12  ;;  %v2024_v27 = vld [vmem:[#allocation8 + $0x8c0] sm:$0xff] }
 0x139   :  { %4913 = vmatprep.subr.bf16.mxu1 %v6620_v35  ;;  %v333_v35 = vsub.s32 1, %v7524_v29 }
 0x13a   :  { %4871 = vmatpush1.bf16.msra.mxu0 %v6491_v38  ;;  %v6684_v38 = vcombine.high %v1944_v30, %v1948_v31 }
 0x13b   :  { %4872 = vmatprep.subr.bf16.mxu0 %v6484_v40 }
 0x13c   :  { %4914 = vmatpush1.bf16.msra.mxu1 %v6619_v41  ;;  %v329_v41 = vsub.s32 0, %v7524_v29 }
 0x13d   :  { %4915 = vmatprep.subr.bf16.mxu1 %v6612_v44  ;;  %v7528_v44 = vld [vmem:[#allocation7] sm:$0xff] }
 0x13e   :  { %4873 = vmatpush1.bf16.msra.mxu0 %v6483_v47  ;;  %v6683_v47 = vcombine.low %v1944_v30, %v1948_v31  ;;  %v330_v53 = vrot.slane %v7528_v44, %v329_v41 }
 0x13f   :  { %4874 = vmatprep.subr.bf16.mxu0 %v6604_v48  ;;  %v1453_v40 = vpop.f32.mrf.mxu1  ;;  %v334_v48 = vrot.slane %v7528_v44, %v333_v35 }
 0x140   :  { %4916 = vmatpush1.bf16.msra.mxu1 %v6611_v49  ;;  %v6676_v49 = vcombine.high %v1936_v42, %v1940_v43  ;;  %v337_v42 = vsub.s32 2, %v7524_v29 }
 0x141   :  { %4917 = vmatprep.subr.bf16.mxu1 %v6732_v52  ;;  %v1455_v52 = vpop.f32.mrf.mxu1 }
 0x142   :  { %4875 = vmatpush2.bf16.msra.mxu0 %v6603_v55  ;;  %v7536_v55 = vld [vmem:[#allocation8 + $0xdc0] sm:$0xff] }
 0x143   :  { %4876 = vmatprep.subr.bf16.mxu0 %v6596_v56  ;;  %v7538_v56 = vld [vmem:[#allocation8 + $0xde0] sm:$0xff] }
 0x144   :  { %4918 = vmatpush2.bf16.msra.mxu1 %v6731_v57  ;;  %v6547_v57 = vcombine.low %v1808_v36, %v1812_v37  ;;  %v6924_v62 = vcombine.high %v7536_v55, %v7538_v56  ;;  %v2008_v37 = vld [vmem:[#allocation8 + $0x840] sm:$0xff] }
 0x145   :  { %4919 = vmatprep.subr.bf16.mxu1 %v6724_v60  ;;  %v6796_v60 = vcombine.high %v2056_v50, %v2060_v51 }
 0x146   :  { %4877 = vmatpush2.bf16.msra.mxu0 %v6595_v0  ;;  %v1457_v0 = vpop.f32.mrf.mxu1 }
 0x147   :  { %4878 = vmatprep.subr.bf16.mxu0 %v6588_v1 }
 0x148   :  { %4920 = vmatpush2.bf16.msra.mxu1 %v6723_v2 }
 0x149   :  { %4921 = vmatprep.subr.bf16.mxu1 %v6716_v4 }
 0x14a   :  { %4879 = vmatpush2.bf16.msra.mxu0 %v6587_v7  ;;  %v1459_v7 = vpop.f32.mrf.mxu1 }
 0x14b   :  { %4880 = vmatprep.subr.bf16.mxu0 %v6580_v26 }
 0x14c   :  { %4922 = vmatpush2.bf16.msra.mxu1 %v6715_v8 }
 0x14d   :  { %4923 = vmatprep.subr.bf16.mxu1 %v6708_v10 }
 0x14e   :  { %4881 = vmatpush2.bf16.msra.mxu0 %v6579_v63 }
 0x14f   :  { %4882 = vmatprep.subr.bf16.mxu0 %v6572_v13 }
 0x150   :  { %4924 = vmatpush2.bf16.msra.mxu1 %v6707_v14  ;;  %v6795_v14 = vcombine.low %v2056_v50, %v2060_v51  ;;  %v338_v50 = vrot.slane %v7528_v44, %v337_v42 }
 0x151   :  { %4925 = vmatprep.subr.bf16.mxu1 %v6700_v17  ;;  %v2040_v17 = vld [vmem:[#allocation8 + $0x940] sm:$0xff] }
 0x152   :  { %4883 = vmatpush2.bf16.msra.mxu0 %v6571_v22  ;;  %v6780_v20 = vcombine.high %v2040_v17, %v2044_v18  ;;  %v2032_v22 = vld [vmem:[#allocation8 + $0x900] sm:$0xff] }
 0x153   :  { %4884 = vmatprep.subr.bf16.mxu0 %v6564_v23  ;;  %v2036_v23 = vld [vmem:[#allocation8 + $0x920] sm:$0xff] }
 0x154   :  { %4926 = vmatpush2.bf16.msra.mxu1 %v6699_v24  ;;  %v6779_v24 = vcombine.low %v2040_v17, %v2044_v18  ;;  %v6772_v25 = vcombine.high %v2032_v22, %v2036_v23  ;;  %v6771_v30 = vcombine.low %v2032_v22, %v2036_v23  ;;  %v2176_v18 = vld [vmem:[#allocation8 + $0xd80] sm:$0xff] }
 0x155   :  { %4927 = vmatprep.subr.bf16.mxu1 %v6692_v28  ;;  %v2028_v28 = vld [vmem:[#allocation8 + $0x8e0] sm:$0xff] }
 0x156   :  { %4885 = vmatpush2.bf16.msra.mxu0 %v6563_v32  ;;  %v6764_v31 = vcombine.high %v2024_v27, %v2028_v28  ;;  %v2016_v32 = vld [vmem:[#allocation8 + $0x880] sm:$0xff] }
 0x157   :  { %4886 = vmatprep.subr.bf16.mxu0 %v6556_v33  ;;  %v2020_v33 = vld [vmem:[#allocation8 + $0x8a0] sm:$0xff] }
 0x158   :  { %4928 = vmatpush2.bf16.msra.mxu1 %v6691_v34  ;;  %v6763_v34 = vcombine.low %v2024_v27, %v2028_v28  ;;  %v6756_v36 = vcombine.high %v2016_v32, %v2020_v33  ;;  %v6755_v43 = vcombine.low %v2016_v32, %v2020_v33  ;;  %v2168_v32 = vld [vmem:[#allocation8 + $0xd40] sm:$0xff] }
 0x159   :  { %4929 = vmatprep.subr.bf16.mxu1 %v6684_v38  ;;  %v1410_v54 = vpop.f32.mrf.mxu0  ;;  %v2012_v38 = vld [vmem:[#allocation8 + $0x860] sm:$0xff] }
 0x15a   :  { %4887 = vmatpush2.bf16.msra.mxu0 %v6555_v45  ;;  %v1411_v1 = vadd.f32 %v1410_v54, %v330_v53  ;;  %v6748_v45 = vcombine.high %v2008_v37, %v2012_v38  ;;  %v2172_v33 = vld [vmem:[#allocation8 + $0xd60] sm:$0xff] }
 0x15b   :  { %v1412_v58 = vpop.f32.mrf.mxu0  ;;  %4888 = vmatprep.subr.bf16.mxu0 %v6548_v46  ;;  %v2000_v46 = vld [vmem:[#allocation8 + $0x800] sm:$0xff] }
 0x15c   :  { %4930 = vmatpush2.bf16.msra.mxu1 %v6683_v47  ;;  %v1413_v61 = vadd.f32 %v1412_v58, %v334_v48  ;;  %v1454_v26 = vadd.f32 %v1453_v40, %v1411_v1  ;;  %v341_v40 = vsub.s32 3, %v7524_v29  ;;  %v2004_v47 = vld [vmem:[#allocation8 + $0x820] sm:$0xff] }
 0x15d   :  { %4931 = vmatprep.subr.bf16.mxu1 %v6676_v49  ;;  %v1414_v2 = vpop.f32.mrf.mxu0  ;;  %v6740_v54 = vcombine.high %v2000_v46, %v2004_v47  ;;  %v2120_v58 = vld [vmem:[#allocation8 + $0xbc0] sm:$0xff]  ;;  %v6739_v1 = vcombine.low %v2000_v46, %v2004_v47  ;;  %v6907_v47 = vcombine.low %v2168_v32, %v2172_v33 }
 0x15e   :  { %v1415_v39 = vadd.f32 %v1414_v2, %v330_v53  ;;  %4889 = vmatpush2.bf16.msra.mxu0 %v6547_v57  ;;  %v1456_v4 = vadd.f32 %v1455_v52, %v1413_v61  ;;  %v1720_v63 = vmax.f32 %v1454_v26, 0.0  ;;  %v342_v49 = vrot.slane %v7528_v44, %v341_v40 }
 0x15f   :  { %v1416_v3 = vpop.f32.mrf.mxu0  ;;  %4944 = vmatprep.subr.bf16.mxu0 %v6796_v60  ;;  %v6747_v52 = vcombine.low %v2008_v37, %v2012_v38  ;;  %v2092_v38 = vld [vmem:[#allocation8 + $0xae0] sm:$0xff] }
 0x160   :  { %4932 = vmatpush2.bf16.msra.mxu1 %v6675_v59  ;;  %v1458_v5 = vadd.f32 %v1457_v0, %v1415_v39  ;;  %v1417_v6 = vadd.f32 %v1416_v3, %v334_v48  ;;  %v1721_v21 = vmax.f32 %v1456_v4, 0.0  ;;  %v2124_v59 = vld [vmem:[#allocation8 + $0xbe0] sm:$0xff] }
 0x161   :  { %4987 = vmatprep.subr.bf16.mxu1 %v6924_v62  ;;  %v6860_v39 = vcombine.high %v2120_v58, %v2124_v59  ;;  %v2112_v4 = vld [vmem:[#allocation8 + $0xb80] sm:$0xff] }
 0x162   :  { %v1460_v8 = vadd.f32 %v1459_v7, %v1417_v6  ;;  %v1728_v9 = vmax.f32 %v1458_v5, 0.0  ;;  %v2116_v5 = vld [vmem:[#allocation8 + $0xba0] sm:$0xff] }
 0x163   :  { %v6852_v11 = vcombine.high %v2112_v4, %v2116_v5  ;;  %v6851_v22 = vcombine.low %v2112_v4, %v2116_v5  ;;  %v2064_v4 = vld [vmem:[#allocation8 + $0xa00] sm:$0xff] }
 0x164   :  { %v1729_v10 = vmax.f32 %v1460_v8, 0.0  ;;  %v7544_v15 = vpack.c.bf16 %v1728_v9, %v1720_v63  ;;  %v2104_v63 = vld [vmem:[#allocation8 + $0xb40] sm:$0xff] }
 0x165   :  { %v2068_v5 = vld [vmem:[#allocation8 + $0xa20] sm:$0xff] }
 0x166   :  { %v7542_v13 = vpack.c.bf16 %v1729_v10, %v1721_v21  ;;  %v6859_v21 = vcombine.low %v2120_v58, %v2124_v59 }
 0x168   :  { %4890 = vmatprep.mubr.bf16.mxu0 %v7542_v13 }
 0x169   :  { %4891 = vmatmul.mubr.bf16.vlgmr.msra.gmra.mxu0 %v7544_v15 }
 0x16a   :  { %4945 = vmatpush1.bf16.msra.mxu0 %v6795_v14  ;;  %v2108_v14 = vld [vmem:[#allocation8 + $0xb60] sm:$0xff] }
 0x16b   :  { %4946 = vmatprep.subr.bf16.mxu0 %v6788_v16 }
 0x16e   :  { %4947 = vmatpush1.bf16.msra.mxu0 %v6787_v19  ;;  %v2180_v19 = vld [vmem:[#allocation8 + $0xda0] sm:$0xff] }
 0x16f   :  { %4948 = vmatprep.subr.bf16.mxu0 %v6780_v20  ;;  %v6916_v28 = vcombine.high %v2176_v18, %v2180_v19 }
 0x172   :  { %4949 = vmatpush1.bf16.msra.mxu0 %v6779_v24  ;;  %v6923_v24 = vcombine.low %v7536_v55, %v7538_v56  ;;  %v6908_v55 = vcombine.high %v2168_v32, %v2172_v33  ;;  %v2088_v56 = vld [vmem:[#allocation8 + $0xac0] sm:$0xff] }
 0x173   :  { %4950 = vmatprep.subr.bf16.mxu0 %v6772_v25  ;;  %v6844_v25 = vcombine.high %v2104_v63, %v2108_v14  ;;  %v2232_v32 = vld [vmem:[#allocation8 + $0xf40] sm:$0xff] }
 0x174   :  { %v2236_v33 = vld [vmem:[#allocation8 + $0xf60] sm:$0xff] }
 0x176   :  { %4951 = vmatpush1.bf16.msra.mxu0 %v6771_v30  ;;  %v2096_v30 = vld [vmem:[#allocation8 + $0xb00] sm:$0xff] }
 0x177   :  { %4952 = vmatprep.subr.bf16.mxu0 %v6764_v31  ;;  %v2100_v31 = vld [vmem:[#allocation8 + $0xb20] sm:$0xff] }
 0x178   :  { %v6836_v37 = vcombine.high %v2096_v30, %v2100_v31  ;;  %v6835_v46 = vcombine.low %v2096_v30, %v2100_v31 }
 0x17a   :  { %4953 = vmatpush1.bf16.msra.mxu0 %v6763_v34  ;;  %v6843_v34 = vcombine.low %v2104_v63, %v2108_v14  ;;  %v2132_v63 = vld [vmem:[#allocation8 + $0xc20] sm:$0xff]  ;;  %v6803_v14 = vcombine.low %v2064_v4, %v2068_v5 }
 0x17b   :  { %4954 = vmatprep.subr.bf16.mxu0 %v6756_v36  ;;  %v6915_v36 = vcombine.low %v2176_v18, %v2180_v19  ;;  %v2248_v19 = vld [vmem:[#allocation8 + $0xfc0] sm:$0xff] }
 0x17d   :  { %v1539_v48 = vpop.f32.mrf.mxu0 }
 0x17e   :  { %4955 = vmatpush1.bf16.msra.mxu0 %v6755_v43  ;;  %v2160_v43 = vld [vmem:[#allocation8 + $0xd00] sm:$0xff] }
 0x17f   :  { %v1496_v51 = vpop.f32.mrf.mxu1  ;;  %v1541_v53 = vpop.f32.mrf.mxu0  ;;  %4956 = vmatprep.subr.bf16.mxu0 %v6748_v45  ;;  %v2164_v45 = vld [vmem:[#allocation8 + $0xd20] sm:$0xff] }
 0x180   :  { %v1497_v61 = vadd.f32 %v1496_v51, %v338_v50  ;;  %v2084_v51 = vld [vmem:[#allocation8 + $0xaa0] sm:$0xff] }
 0x181   :  { %v1498_v57 = vpop.f32.mrf.mxu1  ;;  %v1543_v0 = vpop.f32.mrf.mxu0 }
 0x182   :  { %v1499_v60 = vadd.f32 %v1498_v57, %v342_v49  ;;  %4957 = vmatpush1.bf16.msra.mxu0 %v6747_v52  ;;  %v1540_v8 = vadd.f32 %v1539_v48, %v1497_v61  ;;  %v6828_v48 = vcombine.high %v2088_v56, %v2092_v38  ;;  %v2152_v52 = vld [vmem:[#allocation8 + $0xcc0] sm:$0xff]  ;;  %v6899_v57 = vcombine.low %v2160_v43, %v2164_v45 }
 0x183   :  { %v1500_v62 = vpop.f32.mrf.mxu1  ;;  %4958 = vmatprep.subr.bf16.mxu0 %v6740_v54  ;;  %v1545_v9 = vpop.f32.mrf.mxu0  ;;  %v6827_v54 = vcombine.low %v2088_v56, %v2092_v38  ;;  %v2076_v61 = vld [vmem:[#allocation8 + $0xa60] sm:$0xff]  ;;  %v6971_v56 = vcombine.low %v2232_v32, %v2236_v33 }
 0x184   :  { %v1501_v2 = vadd.f32 %v1500_v62, %v338_v50  ;;  %v1542_v6 = vadd.f32 %v1541_v53, %v1499_v60  ;;  %v1722_v20 = vmax.f32 %v1540_v8, 0.0  ;;  %v2080_v50 = vld [vmem:[#allocation8 + $0xa80] sm:$0xff] }
 0x185   :  { %v1502_v3 = vpop.f32.mrf.mxu1  ;;  %v2156_v53 = vld [vmem:[#allocation8 + $0xce0] sm:$0xff]  ;;  %v6820_v58 = vcombine.high %v2080_v50, %v2084_v51 }
 0x186   :  { %v1544_v7 = vadd.f32 %v1543_v0, %v1501_v2  ;;  %v1503_v26 = vadd.f32 %v1502_v3, %v342_v49  ;;  %4959 = vmatpush1.bf16.msra.mxu0 %v6739_v1  ;;  %v1723_v16 = vmax.f32 %v1542_v6, 0.0  ;;  %v6900_v49 = vcombine.high %v2160_v43, %v2164_v45  ;;  %v2072_v60 = vld [vmem:[#allocation8 + $0xa40] sm:$0xff] }
 0x187   :  { %4960 = vmatprep.subr.bf16.mxu0 %v6860_v39  ;;  %v6892_v59 = vcombine.high %v2152_v52, %v2156_v53  ;;  %v2144_v62 = vld [vmem:[#allocation8 + $0xc80] sm:$0xff]  ;;  %v6819_v1 = vcombine.low %v2080_v50, %v2084_v51  ;;  %v6891_v2 = vcombine.low %v2152_v52, %v2156_v53  ;;  %v6812_v39 = vcombine.high %v2072_v60, %v2076_v61 }
 0x188   :  { %v1546_v10 = vadd.f32 %v1545_v9, %v1503_v26  ;;  %v1730_v12 = vmax.f32 %v1544_v7, 0.0  ;;  %v2148_v0 = vld [vmem:[#allocation8 + $0xca0] sm:$0xff]  ;;  %v6811_v26 = vcombine.low %v2072_v60, %v2076_v61  ;;  %v6804_v9 = vcombine.high %v2064_v4, %v2068_v5 }
 0x189   :  { %v6884_v3 = vcombine.high %v2144_v62, %v2148_v0  ;;  %v2136_v6 = vld [vmem:[#allocation8 + $0xc40] sm:$0xff]  ;;  %v6883_v8 = vcombine.low %v2144_v62, %v2148_v0  ;;  %v345_v50 = vsub.s32 4, %v7524_v29 }
 0x18a   :  { %v1731_v17 = vmax.f32 %v1546_v10, 0.0  ;;  %4961 = vmatpush2.bf16.msra.mxu0 %v6859_v21  ;;  %v7560_v27 = vpack.c.bf16 %v1730_v12, %v1722_v20  ;;  %v2140_v7 = vld [vmem:[#allocation8 + $0xc60] sm:$0xff]  ;;  %v7564_v10 = vld [vmem:[#allocation8 + $0x1c8] sm:$0xff] }
 0x18b   :  { %4962 = vmatprep.subr.bf16.mxu0 %v6852_v11  ;;  %v6876_v21 = vcombine.high %v2136_v6, %v2140_v7  ;;  %v7566_v11 = vld [vmem:[#allocation8 + $0x1e8] sm:$0xff]  ;;  %v2128_v12 = vld [vmem:[#allocation8 + $0xc00] sm:$0xff] }
 0x18c   :  { %v7556_v23 = vpack.c.bf16 %v1731_v17, %v1723_v16  ;;  %v6875_v16 = vcombine.low %v2136_v6, %v2140_v7  ;;  %v6542_v17 = vcombine.high %v7564_v10, %v7566_v11  ;;  %v6868_v18 = vcombine.high %v2128_v12, %v2132_v63  ;;  %v2252_v20 = vld [vmem:[#allocation8 + $0xfe0] sm:$0xff] }
 0x18d   :  { %v6987_v30 = vcombine.low %v2248_v19, %v2252_v20  ;;  %v2216_v43 = vld [vmem:[#allocation8 + $0xec0] sm:$0xff] }
 0x18e   :  { %4933 = vmatprep.mubr.bf16.mxu1 %v7556_v23  ;;  %4963 = vmatpush2.bf16.msra.mxu0 %v6851_v22  ;;  %v6867_v22 = vcombine.low %v2128_v12, %v2132_v63  ;;  %v2220_v45 = vld [vmem:[#allocation8 + $0xee0] sm:$0xff] }
 0x18f   :  { %4934 = vmatmul.mubr.bf16.vlgmr.msra.gmra.mxu1 %v7560_v27  ;;  %4964 = vmatprep.subr.bf16.mxu0 %v6844_v25  ;;  %v2240_v25 = vld [vmem:[#allocation8 + $0xf80] sm:$0xff]  ;;  %v6955_v53 = vcombine.low %v2216_v43, %v2220_v45 }
 0x190   :  { %4988 = vmatpush1.bf16.msra.mxu1 %v6923_v24  ;;  %v6988_v24 = vcombine.high %v2248_v19, %v2252_v20  ;;  %v2208_v51 = vld [vmem:[#allocation8 + $0xe80] sm:$0xff]  ;;  %v7580_v19 = vld [vmem:[#allocation8 + $0x5e8] sm:$0xff] }
 0x191   :  { %4989 = vmatprep.subr.bf16.mxu1 %v6916_v28  ;;  %v2244_v28 = vld [vmem:[#allocation8 + $0xfa0] sm:$0xff] }
 0x192   :  { %4965 = vmatpush2.bf16.msra.mxu0 %v6843_v34  ;;  %v6980_v31 = vcombine.high %v2240_v25, %v2244_v28  ;;  %v6979_v34 = vcombine.low %v2240_v25, %v2244_v28  ;;  %v2212_v52 = vld [vmem:[#allocation8 + $0xea0] sm:$0xff] }
 0x193   :  { %4966 = vmatprep.subr.bf16.mxu0 %v6836_v37  ;;  %v2224_v37 = vld [vmem:[#allocation8 + $0xf00] sm:$0xff] }
 0x194   :  { %4990 = vmatpush1.bf16.msra.mxu1 %v6915_v36  ;;  %v6972_v36 = vcombine.high %v2232_v32, %v2236_v33  ;;  %v2200_v61 = vld [vmem:[#allocation8 + $0xe40] sm:$0xff] }
 0x195   :  { %4991 = vmatprep.subr.bf16.mxu1 %v6908_v55  ;;  %v2228_v55 = vld [vmem:[#allocation8 + $0xf20] sm:$0xff] }
 0x196   :  { %4967 = vmatpush2.bf16.msra.mxu0 %v6835_v46  ;;  %v6964_v38 = vcombine.high %v2224_v37, %v2228_v55  ;;  %v6963_v46 = vcombine.low %v2224_v37, %v2228_v55  ;;  %v2204_v62 = vld [vmem:[#allocation8 + $0xe60] sm:$0xff] }
 0x197   :  { %4968 = vmatprep.subr.bf16.mxu0 %v6828_v48  ;;  %v6956_v48 = vcombine.high %v2216_v43, %v2220_v45  ;;  %v2192_v6 = vld [vmem:[#allocation8 + $0xe00] sm:$0xff] }
 0x198   :  { %4992 = vmatpush1.bf16.msra.mxu1 %v6907_v47  ;;  %v349_v47 = vsub.s32 5, %v7524_v29  ;;  %v2196_v7 = vld [vmem:[#allocation8 + $0xe20] sm:$0xff] }
 0x199   :  { %4993 = vmatprep.subr.bf16.mxu1 %v6900_v49 }
 0x19a   :  { %4969 = vmatpush2.bf16.msra.mxu0 %v6827_v54  ;;  %v350_v54 = vrot.slane %v7528_v44, %v349_v47 }
 0x19b   :  { %4970 = vmatprep.subr.bf16.mxu0 %v6820_v58 }
 0x19c   :  { %4994 = vmatpush1.bf16.msra.mxu1 %v6899_v57  ;;  %v6948_v57 = vcombine.high %v2208_v51, %v2212_v52 }
 0x19d   :  { %4995 = vmatprep.subr.bf16.mxu1 %v6892_v59  ;;  %v346_v59 = vrot.slane %v7528_v44, %v345_v50 }
 0x19e   :  { %4971 = vmatpush2.bf16.msra.mxu0 %v6819_v1  ;;  %v6947_v1 = vcombine.low %v2208_v51, %v2212_v52  ;;  %v1773_v51 = vld [vmem:[#allocation8 + $0xe8] sm:$0xff] }
 0x19f   :  { %4972 = vmatprep.subr.bf16.mxu0 %v6812_v39  ;;  %v6940_v39 = vcombine.high %v2200_v61, %v2204_v62 }
 0x1a0   :  { %4996 = vmatpush1.bf16.msra.mxu1 %v6891_v2 }
 0x1a1   :  { %4997 = vmatprep.subr.bf16.mxu1 %v6884_v3 }
 0x1a2   :  { %4973 = vmatpush2.bf16.msra.mxu0 %v6811_v26 }
 0x1a3   :  { %4974 = vmatprep.subr.bf16.mxu0 %v6804_v9  ;;  %v1625_v49 = vpop.f32.mrf.mxu1  ;;  %v6939_v9 = vcombine.low %v2200_v61, %v2204_v62  ;;  %v1757_v61 = vld [vmem:[#allocation8 + $0x68] sm:$0xff]  ;;  %v357_v62 = vsub.s32 7, %v7524_v29 }
 0x1a4   :  { %4998 = vmatpush1.bf16.msra.mxu1 %v6883_v8 }
 0x1a5   :  { %4999 = vmatprep.subr.bf16.mxu1 %v6876_v21  ;;  %v1627_v58 = vpop.f32.mrf.mxu1 }
 0x1a6   :  { %4975 = vmatpush2.bf16.msra.mxu0 %v6803_v14  ;;  %v6932_v14 = vcombine.high %v2192_v6, %v2196_v7 }
 0x1a7   :  { %5030 = vmatprep.subr.bf16.mxu0 %v6542_v17  ;;  %v1629_v3 = vpop.f32.mrf.mxu1 }
 0x1a8   :  { %5000 = vmatpush1.bf16.msra.mxu1 %v6875_v16 }
 0x1a9   :  { %5001 = vmatprep.subr.bf16.mxu1 %v6868_v18  ;;  %v1631_v16 = vpop.f32.mrf.mxu1  ;;  %v7578_v18 = vld [vmem:[#allocation8 + $0x5c8] sm:$0xff] }
 0x1aa   :  { %v6670_v32 = vcombine.high %v7578_v18, %v7580_v19 }
 0x1ac   :  { %5002 = vmatpush1.bf16.msra.mxu1 %v6867_v22 }
 0x1ad   :  { %5003 = vmatprep.subr.bf16.mxu1 %v6988_v24  ;;  %v6931_v24 = vcombine.low %v2192_v6, %v2196_v7 }
 0x1b0   :  { %5004 = vmatpush2.bf16.msra.mxu1 %v6987_v30  ;;  %v1793_v30 = vld [vmem:[#allocation8 + $0x188] sm:$0xff] }
 0x1b1   :  { %5005 = vmatprep.subr.bf16.mxu1 %v6980_v31  ;;  %v1797_v31 = vld [vmem:[#allocation8 + $0x1a8] sm:$0xff] }
 0x1b2   :  { %v6534_v55 = vcombine.high %v1793_v30, %v1797_v31  ;;  %v6533_v43 = vcombine.low %v1793_v30, %v1797_v31  ;;  %v1861_v30 = vld [vmem:[#allocation8 + $0x3a8] sm:$0xff] }
 0x1b4   :  { %5006 = vmatpush2.bf16.msra.mxu1 %v6979_v34 }
 0x1b5   :  { %5007 = vmatprep.subr.bf16.mxu1 %v6972_v36  ;;  %v6541_v36 = vcombine.low %v7564_v10, %v7566_v11 }
 0x1b8   :  { %5008 = vmatpush2.bf16.msra.mxu1 %v6971_v56  ;;  %v1785_v56 = vld [vmem:[#allocation8 + $0x148] sm:$0xff] }
 0x1b9   :  { %5009 = vmatprep.subr.bf16.mxu1 %v6964_v38  ;;  %v1789_v38 = vld [vmem:[#allocation8 + $0x168] sm:$0xff] }
 0x1ba   :  { %v6526_v45 = vcombine.high %v1785_v56, %v1789_v38  ;;  %v6525_v10 = vcombine.low %v1785_v56, %v1789_v38 }
 0x1bc   :  { %5010 = vmatpush2.bf16.msra.mxu1 %v6963_v46  ;;  %v1777_v46 = vld [vmem:[#allocation8 + $0x108] sm:$0xff] }
 0x1bd   :  { %5011 = vmatprep.subr.bf16.mxu1 %v6956_v48  ;;  %v1582_v60 = vpop.f32.mrf.mxu0  ;;  %v1781_v48 = vld [vmem:[#allocation8 + $0x128] sm:$0xff] }
 0x1be   :  { %v1583_v4 = vadd.f32 %v1582_v60, %v346_v59  ;;  %v6518_v11 = vcombine.high %v1777_v46, %v1781_v48  ;;  %v6517_v52 = vcombine.low %v1777_v46, %v1781_v48  ;;  %v1753_v60 = vld [vmem:[#allocation8 + $0x48] sm:$0xff] }
 0x1bf   :  { %v1584_v0 = vpop.f32.mrf.mxu0  ;;  %v1849_v46 = vld [vmem:[#allocation8 + $0x348] sm:$0xff] }
 0x1c0   :  { %5012 = vmatpush2.bf16.msra.mxu1 %v6955_v53  ;;  %v1585_v2 = vadd.f32 %v1584_v0, %v350_v54  ;;  %v1626_v17 = vadd.f32 %v1625_v49, %v1583_v4  ;;  %v1769_v49 = vld [vmem:[#allocation8 + $0xc8] sm:$0xff] }
 0x1c1   :  { %5013 = vmatprep.subr.bf16.mxu1 %v6948_v57  ;;  %v1586_v5 = vpop.f32.mrf.mxu0  ;;  %v6510_v53 = vcombine.high %v1769_v49, %v1773_v51  ;;  %v1765_v57 = vld [vmem:[#allocation8 + $0xa8] sm:$0xff] }
 0x1c2   :  { %v1587_v26 = vadd.f32 %v1586_v5, %v346_v59  ;;  %v1628_v21 = vadd.f32 %v1627_v58, %v1585_v2  ;;  %v1724_v33 = vmax.f32 %v1626_v17, 0.0  ;;  %v6509_v58 = vcombine.low %v1769_v49, %v1773_v51  ;;  %v1921_v49 = vld [vmem:[#allocation8 + $0x588] sm:$0xff] }
 0x1c3   :  { %v1588_v8 = vpop.f32.mrf.mxu0  ;;  %v6494_v2 = vcombine.high %v1753_v60, %v1757_v61  ;;  %v358_v5 = vrot.slane %v7528_v44, %v357_v62  ;;  %v1925_v51 = vld [vmem:[#allocation8 + $0x5a8] sm:$0xff] }
 0x1c4   :  { %5014 = vmatpush2.bf16.msra.mxu1 %v6947_v1  ;;  %v1630_v12 = vadd.f32 %v1629_v3, %v1587_v26  ;;  %v1589_v63 = vadd.f32 %v1588_v8, %v350_v54  ;;  %v1725_v25 = vmax.f32 %v1628_v21, 0.0  ;;  %v1761_v54 = vld [vmem:[#allocation8 + $0x88] sm:$0xff]  ;;  %v353_v1 = vsub.s32 6, %v7524_v29 }
 0x1c5   :  { %5015 = vmatprep.subr.bf16.mxu1 %v6940_v39  ;;  %v6502_v59 = vcombine.high %v1761_v54, %v1765_v57  ;;  %v6501_v0 = vcombine.low %v1761_v54, %v1765_v57  ;;  %v1745_v39 = vld [vmem:[#allocation8 + $0x8] sm:$0xff]  ;;  %v6493_v26 = vcombine.low %v1753_v60, %v1757_v61  ;;  %v6669_v57 = vcombine.low %v7578_v18, %v7580_v19 }
 0x1c6   :  { %v1632_v20 = vadd.f32 %v1631_v16, %v1589_v63  ;;  %v1732_v22 = vmax.f32 %v1630_v12, 0.0  ;;  %v1749_v3 = vld [vmem:[#allocation8 + $0x28] sm:$0xff]  ;;  %v354_v6 = vrot.slane %v7528_v44, %v353_v1  ;;  %v6662_v60 = vcombine.high %v1921_v49, %v1925_v51 }
 0x1c7   :  { %v1865_v12 = vld [vmem:[#allocation8 + $0x3c8] sm:$0xff] }
 0x1c8   :  { %5016 = vmatpush2.bf16.msra.mxu1 %v6939_v9  ;;  %v1733_v28 = vmax.f32 %v1632_v20, 0.0  ;;  %v7588_v37 = vpack.c.bf16 %v1732_v22, %v1724_v33  ;;  %v6486_v9 = vcombine.high %v1745_v39, %v1749_v3  ;;  %v1869_v63 = vld [vmem:[#allocation8 + $0x3e8] sm:$0xff]  ;;  %v6485_v22 = vcombine.low %v1745_v39, %v1749_v3 }
 0x1c9   :  { %5017 = vmatprep.subr.bf16.mxu1 %v6932_v14  ;;  %v1857_v44 = vld [vmem:[#allocation8 + $0x388] sm:$0xff]  ;;  %v6605_v56 = vcombine.low %v1865_v12, %v1869_v63 }
 0x1ca   :  { %v7584_v34 = vpack.c.bf16 %v1733_v28, %v1725_v25  ;;  %v6606_v25 = vcombine.high %v1865_v12, %v1869_v63  ;;  %v1841_v61 = vld [vmem:[#allocation8 + $0x308] sm:$0xff] }
 0x1cb   :  { %v1917_v39 = vld [vmem:[#allocation8 + $0x568] sm:$0xff] }
 0x1cc   :  { %5018 = vmatpush2.bf16.msra.mxu1 %v6931_v24  ;;  %4976 = vmatprep.mubr.bf16.mxu0 %v7584_v34  ;;  %v1833_v19 = vld [vmem:[#allocation8 + $0x2c8] sm:$0xff] }
 0x1cd   :  { %5073 = vmatprep.subr.bf16.mxu1 %v6670_v32  ;;  %4977 = vmatmul.mubr.bf16.vlgmr.msra.gmra.mxu0 %v7588_v37  ;;  %v1825_v63 = vld [vmem:[#allocation8 + $0x288] sm:$0xff] }
 0x1ce   :  { %5031 = vmatpush1.bf16.msra.mxu0 %v6541_v36  ;;  %5062 = vmatprep.mubr.bf16.mxu0 %v7542_v13 }
 0x1cf   :  { %5032 = vmatprep.subr.bf16.mxu0 %v6534_v55 }
 0x1d2   :  { %5033 = vmatpush1.bf16.msra.mxu0 %v6533_v43  ;;  %v6598_v43 = vcombine.high %v1857_v44, %v1861_v30 }
 0x1d3   :  { %5034 = vmatprep.subr.bf16.mxu0 %v6526_v45 }
 0x1d6   :  { %5035 = vmatpush1.bf16.msra.mxu0 %v6525_v10 }
 0x1d7   :  { %5036 = vmatprep.subr.bf16.mxu0 %v6518_v11  ;;  %v1853_v11 = vld [vmem:[#allocation8 + $0x368] sm:$0xff] }
 0x1d8   :  { %v6589_v3 = vcombine.low %v1849_v46, %v1853_v11 }
 0x1da   :  { %5037 = vmatpush1.bf16.msra.mxu0 %v6517_v52 }
 0x1db   :  { %5038 = vmatprep.subr.bf16.mxu0 %v6510_v53  ;;  %v6597_v53 = vcombine.low %v1857_v44, %v1861_v30  ;;  %v1821_v44 = vld [vmem:[#allocation8 + $0x268] sm:$0xff] }
 0x1dc   :  { %v1889_v30 = vld [vmem:[#allocation8 + $0x488] sm:$0xff] }
 0x1de   :  { %5039 = vmatpush1.bf16.msra.mxu0 %v6509_v58 }
 0x1df   :  { %5040 = vmatprep.subr.bf16.mxu0 %v6502_v59  ;;  %v6590_v59 = vcombine.high %v1849_v46, %v1853_v11 }
 0x1e1   :  { %v1711_v4 = vpop.f32.mrf.mxu0 }
 0x1e2   :  { %5041 = vmatpush1.bf16.msra.mxu0 %v6501_v0  ;;  %v1845_v0 = vld [vmem:[#allocation8 + $0x328] sm:$0xff] }
 0x1e3   :  { %v1668_v7 = vpop.f32.mrf.mxu1  ;;  %v1713_v8 = vpop.f32.mrf.mxu0  ;;  %5042 = vmatprep.subr.bf16.mxu0 %v6494_v2  ;;  %v1913_v2 = vld [vmem:[#allocation8 + $0x548] sm:$0xff] }
 0x1e4   :  { %v1669_v16 = vadd.f32 %v1668_v7, %v354_v6  ;;  %v6654_v18 = vcombine.high %v1913_v2, %v1917_v39  ;;  %v1905_v7 = vld [vmem:[#allocation8 + $0x508] sm:$0xff] }
 0x1e5   :  { %v1670_v21 = vpop.f32.mrf.mxu1  ;;  %v1715_v20 = vpop.f32.mrf.mxu0 }
 0x1e6   :  { %v1671_v14 = vadd.f32 %v1670_v21, %v358_v5  ;;  %5043 = vmatpush1.bf16.msra.mxu0 %v6493_v26  ;;  %v1712_v36 = vadd.f32 %v1711_v4, %v1669_v16  ;;  %v6661_v4 = vcombine.low %v1921_v49, %v1925_v51  ;;  %v1909_v26 = vld [vmem:[#allocation8 + $0x528] sm:$0xff] }
 0x1e7   :  { %v1672_v17 = vpop.f32.mrf.mxu1  ;;  %5044 = vmatprep.subr.bf16.mxu0 %v6486_v9  ;;  %v1717_v55 = vpop.f32.mrf.mxu0  ;;  %v6653_v9 = vcombine.low %v1913_v2, %v1917_v39  ;;  %v6646_v12 = vcombine.high %v1905_v7, %v1909_v26  ;;  %v1897_v16 = vld [vmem:[#allocation8 + $0x4c8] sm:$0xff] }
 0x1e8   :  { %v1673_v24 = vadd.f32 %v1672_v17, %v354_v6  ;;  %v1714_v31 = vadd.f32 %v1713_v8, %v1671_v14  ;;  %v1726_v52 = vmax.f32 %v1712_v36, 0.0  ;;  %v1837_v6 = vld [vmem:[#allocation8 + $0x2e8] sm:$0xff]  ;;  %v6581_v8 = vcombine.low %v1841_v61, %v1845_v0 }
 0x1e9   :  { %v1674_v28 = vpop.f32.mrf.mxu1  ;;  %v6574_v21 = vcombine.high %v1833_v19, %v1837_v6  ;;  %v1829_v14 = vld [vmem:[#allocation8 + $0x2a8] sm:$0xff] }
 0x1ea   :  { %v1716_v32 = vadd.f32 %v1715_v20, %v1673_v24  ;;  %v1675_v33 = vadd.f32 %v1674_v28, %v358_v5  ;;  %5045 = vmatpush1.bf16.msra.mxu0 %v6485_v22  ;;  %v1727_v48 = vmax.f32 %v1714_v31, 0.0  ;;  %v6582_v5 = vcombine.high %v1841_v61, %v1845_v0  ;;  %v1901_v17 = vld [vmem:[#allocation8 + $0x4e8] sm:$0xff] }
 0x1eb   :  { %5046 = vmatprep.subr.bf16.mxu0 %v6606_v25  ;;  %v6573_v20 = vcombine.low %v1833_v19, %v1837_v6  ;;  %v6645_v22 = vcombine.low %v1905_v7, %v1909_v26  ;;  %v6566_v24 = vcombine.high %v1825_v63, %v1829_v14  ;;  %v6638_v25 = vcombine.high %v1897_v16, %v1901_v17  ;;  %v1817_v28 = vld [vmem:[#allocation8 + $0x248] sm:$0xff] }
 0x1ec   :  { %v1718_v38 = vadd.f32 %v1717_v55, %v1675_v33  ;;  %v1734_v45 = vmax.f32 %v1716_v32, 0.0  ;;  %v1893_v31 = vld [vmem:[#allocation8 + $0x4a8] sm:$0xff]  ;;  %v6565_v32 = vcombine.low %v1825_v63, %v1829_v14  ;;  %v6637_v33 = vcombine.low %v1897_v16, %v1901_v17 }
 0x1ed   :  { %v6558_v36 = vcombine.high %v1817_v28, %v1821_v44  ;;  %v6630_v55 = vcombine.high %v1889_v30, %v1893_v31  ;;  %v6557_v46 = vcombine.low %v1817_v28, %v1821_v44  ;;  %v2057_v49 = vld [vmem:[#allocation8 + $0x9c8] sm:$0xff] }
 0x1ee   :  { %v1735_v10 = vmax.f32 %v1718_v38, 0.0  ;;  %5047 = vmatpush2.bf16.msra.mxu0 %v6605_v56  ;;  %v7605_v58 = vpack.c.bf16 %v1734_v45, %v1726_v52  ;;  %v1809_v56 = vld [vmem:[#allocation8 + $0x208] sm:$0xff] }
 0x1ef   :  { %5048 = vmatprep.subr.bf16.mxu0 %v6598_v43  ;;  %v1813_v38 = vld [vmem:[#allocation8 + $0x228] sm:$0xff] }
 0x1f0   :  { %v7601_v54 = vpack.c.bf16 %v1735_v10, %v1727_v48  ;;  %v1881_v43 = vld [vmem:[#allocation8 + $0x448] sm:$0xff]  ;;  %v6629_v48 = vcombine.low %v1889_v30, %v1893_v31  ;;  %v6550_v10 = vcombine.high %v1809_v56, %v1813_v38 }
 0x1f1   :  { %v1885_v45 = vld [vmem:[#allocation8 + $0x468] sm:$0xff] }
 0x1f2   :  { %5019 = vmatprep.mubr.bf16.mxu1 %v7601_v54  ;;  %5049 = vmatpush2.bf16.msra.mxu0 %v6597_v53  ;;  %v6622_v11 = vcombine.high %v1881_v43, %v1885_v45  ;;  %v2061_v51 = vld [vmem:[#allocation8 + $0x9e8] sm:$0xff] }
 0x1f3   :  { %5020 = vmatmul.mubr.bf16.vlgmr.msra.gmra.mxu1 %v7605_v58  ;;  %5050 = vmatprep.subr.bf16.mxu0 %v6590_v59  ;;  %v1873_v52 = vld [vmem:[#allocation8 + $0x408] sm:$0xff]  ;;  %v6621_v59 = vcombine.low %v1881_v43, %v1885_v45 }
 0x1f4   :  { %5074 = vmatpush1.bf16.msra.mxu1 %v6669_v57  ;;  %5105 = vmatprep.mubr.bf16.mxu1 %v7556_v23  ;;  %v1877_v53 = vld [vmem:[#allocation8 + $0x428] sm:$0xff]  ;;  %v6549_v57 = vcombine.low %v1809_v56, %v1813_v38 }
 0x1f5   :  { %5075 = vmatprep.subr.bf16.mxu1 %v6662_v60  ;;  %v6798_v60 = vcombine.high %v2057_v49, %v2061_v51  ;;  %v6614_v61 = vcombine.high %v1873_v52, %v1877_v53  ;;  %v2049_v0 = vld [vmem:[#allocation8 + $0x988] sm:$0xff] }
 0x1f6   :  { %5051 = vmatpush2.bf16.msra.mxu0 %v6589_v3  ;;  %v2053_v2 = vld [vmem:[#allocation8 + $0x9a8] sm:$0xff] }
 0x1f7   :  { %5052 = vmatprep.subr.bf16.mxu0 %v6582_v5  ;;  %v1993_v39 = vld [vmem:[#allocation8 + $0x7c8] sm:$0xff]  ;;  %v6613_v5 = vcombine.low %v1873_v52, %v1877_v53 }
 0x1f8   :  { %5076 = vmatpush1.bf16.msra.mxu1 %v6661_v4  ;;  %v1997_v3 = vld [vmem:[#allocation8 + $0x7e8] sm:$0xff]  ;;  %v6797_v4 = vcombine.low %v2057_v49, %v2061_v51 }
 0x1f9   :  { %5077 = vmatprep.subr.bf16.mxu1 %v6654_v18  ;;  %v6790_v18 = vcombine.high %v2049_v0, %v2053_v2  ;;  %v6734_v19 = vcombine.high %v1993_v39, %v1997_v3  ;;  %v2041_v6 = vld [vmem:[#allocation8 + $0x948] sm:$0xff] }
 0x1fa   :  { %5053 = vmatpush2.bf16.msra.mxu0 %v6581_v8  ;;  %v2045_v7 = vld [vmem:[#allocation8 + $0x968] sm:$0xff] }
 0x1fb   :  { %5054 = vmatprep.subr.bf16.mxu0 %v6574_v21  ;;  %v1985_v26 = vld [vmem:[#allocation8 + $0x788] sm:$0xff]  ;;  %v6733_v21 = vcombine.low %v1993_v39, %v1997_v3 }
 0x1fc   :  { %5078 = vmatpush1.bf16.msra.mxu1 %v6653_v9  ;;  %v1989_v8 = vld [vmem:[#allocation8 + $0x7a8] sm:$0xff]  ;;  %v6789_v9 = vcombine.low %v2049_v0, %v2053_v2 }
 0x1fd   :  { %5079 = vmatprep.subr.bf16.mxu1 %v6646_v12  ;;  %v6782_v12 = vcombine.high %v2041_v6, %v2045_v7  ;;  %v6726_v63 = vcombine.high %v1985_v26, %v1989_v8  ;;  %v2033_v14 = vld [vmem:[#allocation8 + $0x908] sm:$0xff] }
 0x1fe   :  { %5055 = vmatpush2.bf16.msra.mxu0 %v6573_v20  ;;  %v2037_v16 = vld [vmem:[#allocation8 + $0x928] sm:$0xff] }
 0x1ff   :  { %5056 = vmatprep.subr.bf16.mxu0 %v6566_v24  ;;  %v1977_v17 = vld [vmem:[#allocation8 + $0x748] sm:$0xff]  ;;  %v6725_v24 = vcombine.low %v1985_v26, %v1989_v8 }
 0x200   :  { %5080 = vmatpush1.bf16.msra.mxu1 %v6645_v22  ;;  %v1981_v20 = vld [vmem:[#allocation8 + $0x768] sm:$0xff]  ;;  %v6781_v22 = vcombine.low %v2041_v6, %v2045_v7 }
 0x201   :  { %5081 = vmatprep.subr.bf16.mxu1 %v6638_v25  ;;  %v6774_v25 = vcombine.high %v2033_v14, %v2037_v16  ;;  %v6718_v28 = vcombine.high %v1977_v17, %v1981_v20  ;;  %v2025_v44 = vld [vmem:[#allocation8 + $0x8c8] sm:$0xff] }
 0x202   :  { %5057 = vmatpush2.bf16.msra.mxu0 %v6565_v32  ;;  %v2029_v30 = vld [vmem:[#allocation8 + $0x8e8] sm:$0xff] }
 0x203   :  { %5058 = vmatprep.subr.bf16.mxu0 %v6558_v36  ;;  %v1969_v31 = vld [vmem:[#allocation8 + $0x708] sm:$0xff]  ;;  %v6717_v36 = vcombine.low %v1977_v17, %v1981_v20 }
 0x204   :  { %5082 = vmatpush1.bf16.msra.mxu1 %v6637_v33  ;;  %v1973_v32 = vld [vmem:[#allocation8 + $0x728] sm:$0xff]  ;;  %v6773_v33 = vcombine.low %v2033_v14, %v2037_v16 }
 0x205   :  { %5083 = vmatprep.subr.bf16.mxu1 %v6630_v55  ;;  %v6766_v55 = vcombine.high %v2025_v44, %v2029_v30  ;;  %v6710_v56 = vcombine.high %v1969_v31, %v1973_v32  ;;  %v2017_v38 = vld [vmem:[#allocation8 + $0x888] sm:$0xff] }
 0x206   :  { %5059 = vmatpush2.bf16.msra.mxu0 %v6557_v46  ;;  %v2021_v43 = vld [vmem:[#allocation8 + $0x8a8] sm:$0xff] }
 0x207   :  { %5060 = vmatprep.subr.bf16.mxu0 %v6550_v10  ;;  %v1961_v45 = vld [vmem:[#allocation8 + $0x6c8] sm:$0xff]  ;;  %v6709_v10 = vcombine.low %v1969_v31, %v1973_v32 }
 0x208   :  { %5084 = vmatpush1.bf16.msra.mxu1 %v6629_v48  ;;  %v1965_v46 = vld [vmem:[#allocation8 + $0x6e8] sm:$0xff]  ;;  %v6765_v48 = vcombine.low %v2025_v44, %v2029_v30 }
 0x209   :  { %5085 = vmatprep.subr.bf16.mxu1 %v6622_v11  ;;  %v6758_v11 = vcombine.high %v2017_v38, %v2021_v43  ;;  %v6702_v49 = vcombine.high %v1961_v45, %v1965_v46  ;;  %v2009_v51 = vld [vmem:[#allocation8 + $0x848] sm:$0xff] }
 0x20a   :  { %5061 = vmatpush2.bf16.msra.mxu0 %v6549_v57  ;;  %v2013_v52 = vld [vmem:[#allocation8 + $0x868] sm:$0xff] }
 0x20b   :  { %5116 = vmatprep.subr.bf16.mxu0 %v6798_v60  ;;  %v1953_v53 = vld [vmem:[#allocation8 + $0x688] sm:$0xff]  ;;  %v6701_v60 = vcombine.low %v1961_v45, %v1965_v46 }
 0x20c   :  { %5086 = vmatpush1.bf16.msra.mxu1 %v6621_v59  ;;  %v1957_v57 = vld [vmem:[#allocation8 + $0x6a8] sm:$0xff]  ;;  %v6757_v59 = vcombine.low %v2017_v38, %v2021_v43 }
 0x20d   :  { %5087 = vmatprep.subr.bf16.mxu1 %v6614_v61  ;;  %5063 = vmatmul.mubr.bf16.vlgmr.msra.gmra.mxu0 %v7544_v15  ;;  %v6750_v61 = vcombine.high %v2009_v51, %v2013_v52  ;;  %v6694_v0 = vcombine.high %v1953_v53, %v1957_v57  ;;  %v2001_v2 = vld [vmem:[#allocation8 + $0x808] sm:$0xff] }
 0x20e   :  { %5117 = vmatpush1.bf16.msra.mxu0 %v6797_v4  ;;  %5148 = vmatprep.mubr.bf16.mxu0 %v7584_v34  ;;  %v2005_v39 = vld [vmem:[#allocation8 + $0x828] sm:$0xff] }
 0x20f   :  { %5118 = vmatprep.subr.bf16.mxu0 %v6790_v18  ;;  %v1945_v3 = vld [vmem:[#allocation8 + $0x648] sm:$0xff]  ;;  %v6693_v18 = vcombine.low %v1953_v53, %v1957_v57 }
 0x210   :  { %5088 = vmatpush1.bf16.msra.mxu1 %v6613_v5  ;;  %v1949_v4 = vld [vmem:[#allocation8 + $0x668] sm:$0xff]  ;;  %v6749_v5 = vcombine.low %v2009_v51, %v2013_v52 }
 0x211   :  { %5089 = vmatprep.subr.bf16.mxu1 %v6734_v19  ;;  %v6742_v19 = vcombine.high %v2001_v2, %v2005_v39  ;;  %v6686_v6 = vcombine.high %v1945_v3, %v1949_v4  ;;  %v2121_v7 = vld [vmem:[#allocation8 + $0xbc8] sm:$0xff] }
 0x212   :  { %5119 = vmatpush1.bf16.msra.mxu0 %v6789_v9  ;;  %v2125_v26 = vld [vmem:[#allocation8 + $0xbe8] sm:$0xff] }
 0x213   :  { %5120 = vmatprep.subr.bf16.mxu0 %v6782_v12  ;;  %v1937_v8 = vld [vmem:[#allocation8 + $0x608] sm:$0xff]  ;;  %v6685_v12 = vcombine.low %v1945_v3, %v1949_v4 }
 0x214   :  { %5090 = vmatpush2.bf16.msra.mxu1 %v6733_v21  ;;  %v1941_v9 = vld [vmem:[#allocation8 + $0x628] sm:$0xff]  ;;  %v6741_v21 = vcombine.low %v2001_v2, %v2005_v39 }
 0x215   :  { %5091 = vmatprep.subr.bf16.mxu1 %v6726_v63  ;;  %v6862_v63 = vcombine.high %v2121_v7, %v2125_v26  ;;  %v6678_v14 = vcombine.high %v1937_v8, %v1941_v9  ;;  %v2113_v16 = vld [vmem:[#allocation8 + $0xb88] sm:$0xff] }
 0x216   :  { %5121 = vmatpush1.bf16.msra.mxu0 %v6781_v22  ;;  %v2117_v17 = vld [vmem:[#allocation8 + $0xba8] sm:$0xff] }
 0x217   :  { %5122 = vmatprep.subr.bf16.mxu0 %v6774_v25  ;;  %v2185_v20 = vld [vmem:[#allocation8 + $0xdc8] sm:$0xff]  ;;  %v6677_v25 = vcombine.low %v1937_v8, %v1941_v9 }
 0x218   :  { %5092 = vmatpush2.bf16.msra.mxu1 %v6725_v24  ;;  %v2189_v22 = vld [vmem:[#allocation8 + $0xde8] sm:$0xff]  ;;  %v6861_v24 = vcombine.low %v2121_v7, %v2125_v26 }
 0x219   :  { %5093 = vmatprep.subr.bf16.mxu1 %v6718_v28  ;;  %v6854_v28 = vcombine.high %v2113_v16, %v2117_v17  ;;  %v6926_v44 = vcombine.high %v2185_v20, %v2189_v22  ;;  %v2105_v30 = vld [vmem:[#allocation8 + $0xb48] sm:$0xff] }
 0x21a   :  { %5123 = vmatpush1.bf16.msra.mxu0 %v6773_v33  ;;  %v2109_v31 = vld [vmem:[#allocation8 + $0xb68] sm:$0xff] }
 0x21b   :  { %5124 = vmatprep.subr.bf16.mxu0 %v6766_v55  ;;  %v2177_v32 = vld [vmem:[#allocation8 + $0xd88] sm:$0xff]  ;;  %v6925_v55 = vcombine.low %v2185_v20, %v2189_v22 }
 0x21c   :  { %5094 = vmatpush2.bf16.msra.mxu1 %v6717_v36  ;;  %v2181_v33 = vld [vmem:[#allocation8 + $0xda8] sm:$0xff]  ;;  %v6853_v36 = vcombine.low %v2113_v16, %v2117_v17 }
 0x21d   :  { %5095 = vmatprep.subr.bf16.mxu1 %v6710_v56  ;;  %v6846_v56 = vcombine.high %v2105_v30, %v2109_v31  ;;  %v6918_v38 = vcombine.high %v2177_v32, %v2181_v33  ;;  %v2097_v43 = vld [vmem:[#allocation8 + $0xb08] sm:$0xff] }
 0x21e   :  { %5125 = vmatpush1.bf16.msra.mxu0 %v6765_v48  ;;  %v2101_v45 = vld [vmem:[#allocation8 + $0xb28] sm:$0xff] }
 0x21f   :  { %5126 = vmatprep.subr.bf16.mxu0 %v6758_v11  ;;  %v2169_v46 = vld [vmem:[#allocation8 + $0xd48] sm:$0xff]  ;;  %v6917_v11 = vcombine.low %v2177_v32, %v2181_v33  ;;  %v1806_v32 = vld [vmem:[#allocation8 + $0x1f0] sm:$0xff] }
 0x220   :  { %5096 = vmatpush2.bf16.msra.mxu1 %v6709_v10  ;;  %v2173_v48 = vld [vmem:[#allocation8 + $0xd68] sm:$0xff]  ;;  %v6845_v10 = vcombine.low %v2105_v30, %v2109_v31  ;;  %v1802_v31 = vld [vmem:[#allocation8 + $0x1d0] sm:$0xff] }
 0x221   :  { %5097 = vmatprep.subr.bf16.mxu1 %v6702_v49  ;;  %v6838_v49 = vcombine.high %v2097_v43, %v2101_v45  ;;  %v6910_v51 = vcombine.high %v2169_v46, %v2173_v48  ;;  %v2089_v52 = vld [vmem:[#allocation8 + $0xac8] sm:$0xff] }
 0x222   :  { %5127 = vmatpush1.bf16.msra.mxu0 %v6757_v59  ;;  %v2093_v53 = vld [vmem:[#allocation8 + $0xae8] sm:$0xff] }
 0x223   :  { %5128 = vmatprep.subr.bf16.mxu0 %v6750_v61  ;;  %v2161_v57 = vld [vmem:[#allocation8 + $0xd08] sm:$0xff]  ;;  %v6909_v61 = vcombine.low %v2169_v46, %v2173_v48  ;;  %v1798_v46 = vld [vmem:[#allocation8 + $0x1b0] sm:$0xff] }
 0x224   :  { %5098 = vmatpush2.bf16.msra.mxu1 %v6701_v60  ;;  %v2165_v59 = vld [vmem:[#allocation8 + $0xd28] sm:$0xff]  ;;  %v6837_v60 = vcombine.low %v2097_v43, %v2101_v45  ;;  %v1794_v45 = vld [vmem:[#allocation8 + $0x190] sm:$0xff] }
 0x225   :  { %5099 = vmatprep.subr.bf16.mxu1 %v6694_v0  ;;  %v6830_v0 = vcombine.high %v2089_v52, %v2093_v53  ;;  %v6902_v2 = vcombine.high %v2161_v57, %v2165_v59  ;;  %v2081_v39 = vld [vmem:[#allocation8 + $0xa88] sm:$0xff] }
 0x226   :  { %5129 = vmatpush1.bf16.msra.mxu0 %v6749_v5  ;;  %v2085_v3 = vld [vmem:[#allocation8 + $0xaa8] sm:$0xff] }
 0x227   :  { %5130 = vmatprep.subr.bf16.mxu0 %v6742_v19  ;;  %v2153_v4 = vld [vmem:[#allocation8 + $0xcc8] sm:$0xff]  ;;  %v6901_v19 = vcombine.low %v2161_v57, %v2165_v59  ;;  %v1790_v57 = vld [vmem:[#allocation8 + $0x170] sm:$0xff] }
 0x228   :  { %5100 = vmatpush2.bf16.msra.mxu1 %v6693_v18  ;;  %v2157_v5 = vld [vmem:[#allocation8 + $0xce8] sm:$0xff]  ;;  %v6829_v18 = vcombine.low %v2089_v52, %v2093_v53  ;;  %v1786_v53 = vld [vmem:[#allocation8 + $0x150] sm:$0xff] }
 0x229   :  { %5101 = vmatprep.subr.bf16.mxu1 %v6686_v6  ;;  %v6822_v6 = vcombine.high %v2081_v39, %v2085_v3  ;;  %v6894_v7 = vcombine.high %v2153_v4, %v2157_v5  ;;  %v2073_v26 = vld [vmem:[#allocation8 + $0xa48] sm:$0xff] }
 0x22a   :  { %5131 = vmatpush1.bf16.msra.mxu0 %v6741_v21  ;;  %v2077_v8 = vld [vmem:[#allocation8 + $0xa68] sm:$0xff] }
 0x22b   :  { %5132 = vmatprep.subr.bf16.mxu0 %v6862_v63  ;;  %v2145_v9 = vld [vmem:[#allocation8 + $0xc88] sm:$0xff]  ;;  %v6893_v63 = vcombine.low %v2153_v4, %v2157_v5  ;;  %v1782_v4 = vld [vmem:[#allocation8 + $0x130] sm:$0xff] }
 0x22c   :  { %5102 = vmatpush2.bf16.msra.mxu1 %v6685_v12  ;;  %v2149_v21 = vld [vmem:[#allocation8 + $0xca8] sm:$0xff]  ;;  %v6821_v12 = vcombine.low %v2081_v39, %v2085_v3  ;;  %v1778_v3 = vld [vmem:[#allocation8 + $0x110] sm:$0xff] }
 0x22d   :  { %5103 = vmatprep.subr.bf16.mxu1 %v6678_v14  ;;  %v6814_v14 = vcombine.high %v2073_v26, %v2077_v8  ;;  %v6886_v16 = vcombine.high %v2145_v9, %v2149_v21  ;;  %v2065_v17 = vld [vmem:[#allocation8 + $0xa08] sm:$0xff] }
 0x22e   :  { %5133 = vmatpush2.bf16.msra.mxu0 %v6861_v24  ;;  %v2069_v20 = vld [vmem:[#allocation8 + $0xa28] sm:$0xff] }
 0x22f   :  { %5134 = vmatprep.subr.bf16.mxu0 %v6854_v28  ;;  %v2137_v22 = vld [vmem:[#allocation8 + $0xc48] sm:$0xff]  ;;  %v6885_v28 = vcombine.low %v2145_v9, %v2149_v21  ;;  %v1774_v9 = vld [vmem:[#allocation8 + $0xf0] sm:$0xff] }
 0x230   :  { %5104 = vmatpush2.bf16.msra.mxu1 %v6677_v25  ;;  %v2141_v24 = vld [vmem:[#allocation8 + $0xc68] sm:$0xff]  ;;  %v6813_v25 = vcombine.low %v2073_v26, %v2077_v8  ;;  %v1770_v8 = vld [vmem:[#allocation8 + $0xd0] sm:$0xff] }
 0x231   :  { %5159 = vmatprep.subr.bf16.mxu1 %v6926_v44  ;;  %v6806_v44 = vcombine.high %v2065_v17, %v2069_v20  ;;  %v6878_v30 = vcombine.high %v2137_v22, %v2141_v24  ;;  %v2129_v33 = vld [vmem:[#allocation8 + $0xc08] sm:$0xff] }
 0x232   :  { %5135 = vmatpush2.bf16.msra.mxu0 %v6853_v36  ;;  %v2133_v36 = vld [vmem:[#allocation8 + $0xc28] sm:$0xff] }
 0x233   :  { %5106 = vmatmul.mubr.bf16.vlgmr.msra.gmra.mxu1 %v7560_v27  ;;  %5136 = vmatprep.subr.bf16.mxu0 %v6846_v56  ;;  %v6877_v56 = vcombine.low %v2137_v22, %v2141_v24  ;;  %v6870_v43 = vcombine.high %v2129_v33, %v2133_v36  ;;  %v2249_v48 = vld [vmem:[#allocation8 + $0xfc8] sm:$0xff]  ;;  %v1766_v22 = vld [vmem:[#allocation8 + $0xb0] sm:$0xff] }
 0x234   :  { %5160 = vmatpush1.bf16.msra.mxu1 %v6925_v55  ;;  %5191 = vmatprep.mubr.bf16.mxu1 %v7601_v54  ;;  %v6805_v55 = vcombine.low %v2065_v17, %v2069_v20  ;;  %v2241_v59 = vld [vmem:[#allocation8 + $0xf88] sm:$0xff]  ;;  %v1762_v20 = vld [vmem:[#allocation8 + $0x90] sm:$0xff] }
 0x235   :  { %5161 = vmatprep.subr.bf16.mxu1 %v6918_v38  ;;  %v6544_v38 = vcombine.high %v1802_v31, %v1806_v32  ;;  %v2233_v5 = vld [vmem:[#allocation8 + $0xf48] sm:$0xff] }
 0x236   :  { %5137 = vmatpush2.bf16.msra.mxu0 %v6845_v10  ;;  %v2253_v10 = vld [vmem:[#allocation8 + $0xfe8] sm:$0xff] }
 0x237   :  { %5138 = vmatprep.subr.bf16.mxu0 %v6838_v49  ;;  %v6869_v49 = vcombine.low %v2129_v33, %v2133_v36  ;;  %v6990_v52 = vcombine.high %v2249_v48, %v2253_v10  ;;  %v2225_v21 = vld [vmem:[#allocation8 + $0xf08] sm:$0xff]  ;;  %v1758_v33 = vld [vmem:[#allocation8 + $0x70] sm:$0xff] }
 0x238   :  { %5162 = vmatpush1.bf16.msra.mxu1 %v6917_v11  ;;  %v6543_v11 = vcombine.low %v1802_v31, %v1806_v32  ;;  %v2217_v24 = vld [vmem:[#allocation8 + $0xec8] sm:$0xff]  ;;  %v1754_v32 = vld [vmem:[#allocation8 + $0x50] sm:$0xff] }
 0x239   :  { %5163 = vmatprep.subr.bf16.mxu1 %v6910_v51  ;;  %v6536_v51 = vcombine.high %v1794_v45, %v1798_v46  ;;  %v2209_v36 = vld [vmem:[#allocation8 + $0xe88] sm:$0xff] }
 0x23a   :  { %5139 = vmatpush2.bf16.msra.mxu0 %v6837_v60  ;;  %v2245_v60 = vld [vmem:[#allocation8 + $0xfa8] sm:$0xff] }
 0x23b   :  { %5140 = vmatprep.subr.bf16.mxu0 %v6830_v0  ;;  %v6989_v0 = vcombine.low %v2249_v48, %v2253_v10  ;;  %v6982_v39 = vcombine.high %v2241_v59, %v2245_v60  ;;  %v1750_v48 = vld [vmem:[#allocation8 + $0x30] sm:$0xff]  ;;  %v2201_v10 = vld [vmem:[#allocation8 + $0xe48] sm:$0xff] }
 0x23c   :  { %5164 = vmatpush1.bf16.msra.mxu1 %v6909_v61  ;;  %v6535_v61 = vcombine.low %v1794_v45, %v1798_v46  ;;  %v1746_v46 = vld [vmem:[#allocation8 + $0x10] sm:$0xff] }
 0x23d   :  { %5165 = vmatprep.subr.bf16.mxu1 %v6902_v2  ;;  %v6528_v2 = vcombine.high %v1786_v53, %v1790_v57 }
 0x23e   :  { %5141 = vmatpush2.bf16.msra.mxu0 %v6829_v18  ;;  %v2237_v18 = vld [vmem:[#allocation8 + $0xf68] sm:$0xff] }
 0x23f   :  { %5142 = vmatprep.subr.bf16.mxu0 %v6822_v6  ;;  %v6981_v6 = vcombine.low %v2241_v59, %v2245_v60  ;;  %v6974_v26 = vcombine.high %v2233_v5, %v2237_v18  ;;  %v1870_v59 = vld [vmem:[#allocation8 + $0x3f0] sm:$0xff]  ;;  %v2193_v60 = vld [vmem:[#allocation8 + $0xe08] sm:$0xff] }
 0x240   :  { %5166 = vmatpush1.bf16.msra.mxu1 %v6901_v19  ;;  %v6527_v19 = vcombine.low %v1786_v53, %v1790_v57  ;;  %v1866_v57 = vld [vmem:[#allocation8 + $0x3d0] sm:$0xff] }
 0x241   :  { %5167 = vmatprep.subr.bf16.mxu1 %v6894_v7  ;;  %v6520_v7 = vcombine.high %v1778_v3, %v1782_v4 }
 0x242   :  { %5143 = vmatpush2.bf16.msra.mxu0 %v6821_v12  ;;  %v2229_v12 = vld [vmem:[#allocation8 + $0xf28] sm:$0xff] }
 0x243   :  { %5144 = vmatprep.subr.bf16.mxu0 %v6814_v14  ;;  %v6973_v14 = vcombine.low %v2233_v5, %v2237_v18  ;;  %v6966_v17 = vcombine.high %v2225_v21, %v2229_v12  ;;  %v1862_v5 = vld [vmem:[#allocation8 + $0x3b0] sm:$0xff] }
 0x244   :  { %5168 = vmatpush1.bf16.msra.mxu1 %v6893_v63  ;;  %v6519_v63 = vcombine.low %v1778_v3, %v1782_v4  ;;  %v1858_v4 = vld [vmem:[#allocation8 + $0x390] sm:$0xff] }
 0x245   :  { %5169 = vmatprep.subr.bf16.mxu1 %v6886_v16  ;;  %v6512_v16 = vcombine.high %v1770_v8, %v1774_v9  ;;  %v1930_v18 = vld [vmem:[#allocation8 + $0x5d0] sm:$0xff] }
 0x246   :  { %5145 = vmatpush2.bf16.msra.mxu0 %v6813_v25  ;;  %v2221_v25 = vld [vmem:[#allocation8 + $0xee8] sm:$0xff] }
 0x247   :  { %5146 = vmatprep.subr.bf16.mxu0 %v6806_v44  ;;  %v6965_v44 = vcombine.low %v2225_v21, %v2229_v12  ;;  %v6958_v31 = vcombine.high %v2217_v24, %v2221_v25  ;;  %v1854_v21 = vld [vmem:[#allocation8 + $0x370] sm:$0xff] }
 0x248   :  { %5170 = vmatpush1.bf16.msra.mxu1 %v6885_v28  ;;  %v6511_v28 = vcombine.low %v1770_v8, %v1774_v9  ;;  %v1850_v9 = vld [vmem:[#allocation8 + $0x350] sm:$0xff] }
 0x249   :  { %5171 = vmatprep.subr.bf16.mxu1 %v6878_v30  ;;  %v6504_v30 = vcombine.high %v1762_v20, %v1766_v22  ;;  %v1922_v12 = vld [vmem:[#allocation8 + $0x590] sm:$0xff] }
 0x24a   :  { %5147 = vmatpush2.bf16.msra.mxu0 %v6805_v55  ;;  %v2213_v55 = vld [vmem:[#allocation8 + $0xea8] sm:$0xff] }
 0x24b   :  { %5202 = vmatprep.subr.bf16.mxu0 %v6544_v38  ;;  %v6957_v38 = vcombine.low %v2217_v24, %v2221_v25  ;;  %v6950_v45 = vcombine.high %v2209_v36, %v2213_v55  ;;  %v1846_v24 = vld [vmem:[#allocation8 + $0x330] sm:$0xff] }
 0x24c   :  { %5172 = vmatpush1.bf16.msra.mxu1 %v6877_v56  ;;  %v6503_v56 = vcombine.low %v1762_v20, %v1766_v22  ;;  %v1842_v22 = vld [vmem:[#allocation8 + $0x310] sm:$0xff] }
 0x24d   :  { %5173 = vmatprep.subr.bf16.mxu1 %v6870_v43  ;;  %5149 = vmatmul.mubr.bf16.vlgmr.msra.gmra.mxu0 %v7588_v37  ;;  %v6496_v43 = vcombine.high %v1754_v32, %v1758_v33  ;;  %v1914_v25 = vld [vmem:[#allocation8 + $0x550] sm:$0xff] }
 0x24e   :  { %5203 = vmatpush1.bf16.msra.mxu0 %v6543_v11  ;;  %5234 = vmatprep.mubr.bf16.mxu0 %v7542_v13  ;;  %v2205_v11 = vld [vmem:[#allocation8 + $0xe68] sm:$0xff] }
 0x24f   :  { %5204 = vmatprep.subr.bf16.mxu0 %v6536_v51  ;;  %v6949_v51 = vcombine.low %v2209_v36, %v2213_v55  ;;  %v6942_v53 = vcombine.high %v2201_v10, %v2205_v11  ;;  %v1838_v36 = vld [vmem:[#allocation8 + $0x2f0] sm:$0xff] }
 0x250   :  { %5174 = vmatpush1.bf16.msra.mxu1 %v6869_v49  ;;  %v6495_v49 = vcombine.low %v1754_v32, %v1758_v33  ;;  %v1834_v33 = vld [vmem:[#allocation8 + $0x2d0] sm:$0xff] }
 0x251   :  { %5175 = vmatprep.subr.bf16.mxu1 %v6990_v52  ;;  %v6488_v52 = vcombine.high %v1746_v46, %v1750_v48  ;;  %v1906_v55 = vld [vmem:[#allocation8 + $0x510] sm:$0xff] }
 0x252   :  { %5205 = vmatpush1.bf16.msra.mxu0 %v6535_v61  ;;  %v2197_v61 = vld [vmem:[#allocation8 + $0xe28] sm:$0xff] }
 0x253   :  { %5206 = vmatprep.subr.bf16.mxu0 %v6528_v2  ;;  %v6941_v2 = vcombine.low %v2201_v10, %v2205_v11  ;;  %v6934_v3 = vcombine.high %v2193_v60, %v2197_v61  ;;  %v1830_v10 = vld [vmem:[#allocation8 + $0x2b0] sm:$0xff] }
 0x254   :  { %5176 = vmatpush2.bf16.msra.mxu1 %v6989_v0  ;;  %v6487_v0 = vcombine.low %v1746_v46, %v1750_v48  ;;  %v1826_v48 = vld [vmem:[#allocation8 + $0x290] sm:$0xff] }
 0x255   :  { %5177 = vmatprep.subr.bf16.mxu1 %v6982_v39  ;;  %v6608_v39 = vcombine.high %v1866_v57, %v1870_v59  ;;  %v1898_v11 = vld [vmem:[#allocation8 + $0x4d0] sm:$0xff] }
 0x256   :  { %5207 = vmatpush1.bf16.msra.mxu0 %v6527_v19  ;;  %v1934_v19 = vld [vmem:[#allocation8 + $0x5f0] sm:$0xff] }
 0x257   :  { %5208 = vmatprep.subr.bf16.mxu0 %v6520_v7  ;;  %v6933_v7 = vcombine.low %v2193_v60, %v2197_v61  ;;  %v6672_v8 = vcombine.high %v1930_v18, %v1934_v19  ;;  %v1822_v60 = vld [vmem:[#allocation8 + $0x270] sm:$0xff] }
 0x258   :  { %5178 = vmatpush2.bf16.msra.mxu1 %v6981_v6  ;;  %v6607_v6 = vcombine.low %v1866_v57, %v1870_v59  ;;  %v1818_v59 = vld [vmem:[#allocation8 + $0x250] sm:$0xff] }
 0x259   :  { %5179 = vmatprep.subr.bf16.mxu1 %v6974_v26  ;;  %v6600_v26 = vcombine.high %v1858_v4, %v1862_v5  ;;  %v1890_v61 = vld [vmem:[#allocation8 + $0x490] sm:$0xff] }
 0x25a   :  { %5209 = vmatpush1.bf16.msra.mxu0 %v6519_v63  ;;  %v1926_v63 = vld [vmem:[#allocation8 + $0x5b0] sm:$0xff] }
 0x25b   :  { %5210 = vmatprep.subr.bf16.mxu0 %v6512_v16  ;;  %v6671_v16 = vcombine.low %v1930_v18, %v1934_v19  ;;  %v6664_v20 = vcombine.high %v1922_v12, %v1926_v63  ;;  %v1814_v18 = vld [vmem:[#allocation8 + $0x230] sm:$0xff] }
 0x25c   :  { %5180 = vmatpush2.bf16.msra.mxu1 %v6973_v14  ;;  %v6599_v14 = vcombine.low %v1858_v4, %v1862_v5  ;;  %v1810_v5 = vld [vmem:[#allocation8 + $0x210] sm:$0xff] }
 0x25d   :  { %5181 = vmatprep.subr.bf16.mxu1 %v6966_v17  ;;  %v6592_v17 = vcombine.high %v1850_v9, %v1854_v21  ;;  %v1882_v19 = vld [vmem:[#allocation8 + $0x450] sm:$0xff] }
 0x25e   :  { %5211 = vmatpush1.bf16.msra.mxu0 %v6511_v28  ;;  %v1918_v28 = vld [vmem:[#allocation8 + $0x570] sm:$0xff] }
 0x25f   :  { %5212 = vmatprep.subr.bf16.mxu0 %v6504_v30  ;;  %v6663_v30 = vcombine.low %v1922_v12, %v1926_v63  ;;  %v6656_v32 = vcombine.high %v1914_v25, %v1918_v28  ;;  %v2062_v12 = vld [vmem:[#allocation8 + $0x9f0] sm:$0xff] }
 0x260   :  { %5182 = vmatpush2.bf16.msra.mxu1 %v6965_v44  ;;  %v6591_v44 = vcombine.low %v1850_v9, %v1854_v21  ;;  %v2058_v21 = vld [vmem:[#allocation8 + $0x9d0] sm:$0xff] }
 0x261   :  { %5183 = vmatprep.subr.bf16.mxu1 %v6958_v31  ;;  %v6584_v31 = vcombine.high %v1842_v22, %v1846_v24  ;;  %v1874_v63 = vld [vmem:[#allocation8 + $0x410] sm:$0xff] }
 0x262   :  { %5213 = vmatpush1.bf16.msra.mxu0 %v6503_v56  ;;  %v1910_v56 = vld [vmem:[#allocation8 + $0x530] sm:$0xff] }
 0x263   :  { %5214 = vmatprep.subr.bf16.mxu0 %v6496_v43  ;;  %v6655_v43 = vcombine.low %v1914_v25, %v1918_v28  ;;  %v6648_v46 = vcombine.high %v1906_v55, %v1910_v56  ;;  %v2054_v25 = vld [vmem:[#allocation8 + $0x9b0] sm:$0xff] }
 0x264   :  { %5184 = vmatpush2.bf16.msra.mxu1 %v6957_v38  ;;  %v6583_v38 = vcombine.low %v1842_v22, %v1846_v24  ;;  %v2050_v24 = vld [vmem:[#allocation8 + $0x990] sm:$0xff] }
 0x265   :  { %5185 = vmatprep.subr.bf16.mxu1 %v6950_v45  ;;  %v6576_v45 = vcombine.high %v1834_v33, %v1838_v36  ;;  %v1994_v28 = vld [vmem:[#allocation8 + $0x7d0] sm:$0xff] }
 0x266   :  { %5215 = vmatpush1.bf16.msra.mxu0 %v6495_v49  ;;  %v1902_v49 = vld [vmem:[#allocation8 + $0x4f0] sm:$0xff] }
 0x267   :  { %5216 = vmatprep.subr.bf16.mxu0 %v6488_v52  ;;  %v6647_v52 = vcombine.low %v1906_v55, %v1910_v56  ;;  %v6640_v57 = vcombine.high %v1898_v11, %v1902_v49  ;;  %v2046_v55 = vld [vmem:[#allocation8 + $0x970] sm:$0xff] }
 0x268   :  { %5186 = vmatpush2.bf16.msra.mxu1 %v6949_v51  ;;  %v6575_v51 = vcombine.low %v1834_v33, %v1838_v36  ;;  %v2042_v36 = vld [vmem:[#allocation8 + $0x950] sm:$0xff] }
 0x269   :  { %5187 = vmatprep.subr.bf16.mxu1 %v6942_v53  ;;  %v6568_v53 = vcombine.high %v1826_v48, %v1830_v10  ;;  %v1986_v56 = vld [vmem:[#allocation8 + $0x790] sm:$0xff] }
 0x26a   :  { %5217 = vmatpush1.bf16.msra.mxu0 %v6487_v0  ;;  %v1894_v0 = vld [vmem:[#allocation8 + $0x4b0] sm:$0xff] }
 0x26b   :  { %5218 = vmatprep.subr.bf16.mxu0 %v6608_v39  ;;  %v6639_v39 = vcombine.low %v1898_v11, %v1902_v49  ;;  %v6632_v4 = vcombine.high %v1890_v61, %v1894_v0  ;;  %v2038_v11 = vld [vmem:[#allocation8 + $0x930] sm:$0xff] }
 0x26c   :  { %5188 = vmatpush2.bf16.msra.mxu1 %v6941_v2  ;;  %v6567_v2 = vcombine.low %v1826_v48, %v1830_v10  ;;  %v2034_v10 = vld [vmem:[#allocation8 + $0x910] sm:$0xff] }
 0x26d   :  { %5189 = vmatprep.subr.bf16.mxu1 %v6934_v3  ;;  %v6560_v3 = vcombine.high %v1818_v59, %v1822_v60  ;;  %v1978_v49 = vld [vmem:[#allocation8 + $0x750] sm:$0xff] }
 0x26e   :  { %5219 = vmatpush2.bf16.msra.mxu0 %v6607_v6  ;;  %v1886_v6 = vld [vmem:[#allocation8 + $0x470] sm:$0xff] }
 0x26f   :  { %5220 = vmatprep.subr.bf16.mxu0 %v6600_v26  ;;  %v6631_v26 = vcombine.low %v1890_v61, %v1894_v0  ;;  %v6624_v9 = vcombine.high %v1882_v19, %v1886_v6  ;;  %v2030_v61 = vld [vmem:[#allocation8 + $0x8f0] sm:$0xff] }
 0x270   :  { %5190 = vmatpush2.bf16.msra.mxu1 %v6933_v7  ;;  %v6559_v7 = vcombine.low %v1818_v59, %v1822_v60  ;;  %v2026_v60 = vld [vmem:[#allocation8 + $0x8d0] sm:$0xff] }
 0x271   :  { %5245 = vmatprep.subr.bf16.mxu1 %v6672_v8  ;;  %v6552_v8 = vcombine.high %v1810_v5, %v1814_v18  ;;  %v1970_v0 = vld [vmem:[#allocation8 + $0x710] sm:$0xff] }
 0x272   :  { %5221 = vmatpush2.bf16.msra.mxu0 %v6599_v14  ;;  %v1878_v14 = vld [vmem:[#allocation8 + $0x430] sm:$0xff] }
 0x273   :  { %5192 = vmatmul.mubr.bf16.vlgmr.msra.gmra.mxu1 %v7605_v58  ;;  %5222 = vmatprep.subr.bf16.mxu0 %v6592_v17  ;;  %v6623_v17 = vcombine.low %v1882_v19, %v1886_v6  ;;  %v6616_v22 = vcombine.high %v1874_v63, %v1878_v14  ;;  %v2022_v19 = vld [vmem:[#allocation8 + $0x8b0] sm:$0xff] }
 0x274   :  { %5246 = vmatpush1.bf16.msra.mxu1 %v6671_v16  ;;  %5277 = vmatprep.mubr.bf16.mxu1 %v7556_v23  ;;  %v6551_v16 = vcombine.low %v1810_v5, %v1814_v18  ;;  %v2018_v18 = vld [vmem:[#allocation8 + $0x890] sm:$0xff] }
 0x275   :  { %5247 = vmatprep.subr.bf16.mxu1 %v6664_v20  ;;  %v6800_v20 = vcombine.high %v2058_v21, %v2062_v12  ;;  %v1962_v6 = vld [vmem:[#allocation8 + $0x6d0] sm:$0xff] }
 0x276   :  { %5223 = vmatpush2.bf16.msra.mxu0 %v6591_v44  ;;  %v1998_v44 = vld [vmem:[#allocation8 + $0x7f0] sm:$0xff] }
 0x277   :  { %5224 = vmatprep.subr.bf16.mxu0 %v6584_v31  ;;  %v6615_v31 = vcombine.low %v1874_v63, %v1878_v14  ;;  %v6736_v33 = vcombine.high %v1994_v28, %v1998_v44  ;;  %v2014_v63 = vld [vmem:[#allocation8 + $0x870] sm:$0xff] }
 0x278   :  { %5248 = vmatpush1.bf16.msra.mxu1 %v6663_v30  ;;  %v6799_v30 = vcombine.low %v2058_v21, %v2062_v12  ;;  %v2010_v12 = vld [vmem:[#allocation8 + $0x850] sm:$0xff] }
 0x279   :  { %5249 = vmatprep.subr.bf16.mxu1 %v6656_v32  ;;  %v6792_v32 = vcombine.high %v2050_v24, %v2054_v25  ;;  %v1954_v14 = vld [vmem:[#allocation8 + $0x690] sm:$0xff] }
 0x27a   :  { %5225 = vmatpush2.bf16.msra.mxu0 %v6583_v38  ;;  %v1990_v38 = vld [vmem:[#allocation8 + $0x7b0] sm:$0xff] }
 0x27b   :  { %5226 = vmatprep.subr.bf16.mxu0 %v6576_v45  ;;  %v6735_v45 = vcombine.low %v1994_v28, %v1998_v44  ;;  %v6728_v48 = vcombine.high %v1986_v56, %v1990_v38  ;;  %v2006_v28 = vld [vmem:[#allocation8 + $0x830] sm:$0xff] }
 0x27c   :  { %5250 = vmatpush1.bf16.msra.mxu1 %v6655_v43  ;;  %v6791_v43 = vcombine.low %v2050_v24, %v2054_v25  ;;  %v2002_v25 = vld [vmem:[#allocation8 + $0x810] sm:$0xff] }
 0x27d   :  { %5251 = vmatprep.subr.bf16.mxu1 %v6648_v46  ;;  %v6784_v46 = vcombine.high %v2042_v36, %v2046_v55  ;;  %v1946_v44 = vld [vmem:[#allocation8 + $0x650] sm:$0xff] }
 0x27e   :  { %5227 = vmatpush2.bf16.msra.mxu0 %v6575_v51  ;;  %v1982_v51 = vld [vmem:[#allocation8 + $0x770] sm:$0xff] }
 0x27f   :  { %5228 = vmatprep.subr.bf16.mxu0 %v6568_v53  ;;  %v6727_v53 = vcombine.low %v1986_v56, %v1990_v38  ;;  %v6720_v59 = vcombine.high %v1978_v49, %v1982_v51  ;;  %v2126_v56 = vld [vmem:[#allocation8 + $0xbf0] sm:$0xff] }
 0x280   :  { %5252 = vmatpush1.bf16.msra.mxu1 %v6647_v52  ;;  %v6783_v52 = vcombine.low %v2042_v36, %v2046_v55  ;;  %v2122_v55 = vld [vmem:[#allocation8 + $0xbd0] sm:$0xff] }
 0x281   :  { %5253 = vmatprep.subr.bf16.mxu1 %v6640_v57  ;;  %v6776_v57 = vcombine.high %v2034_v10, %v2038_v11  ;;  %v1938_v38 = vld [vmem:[#allocation8 + $0x610] sm:$0xff] }
 0x282   :  { %5229 = vmatpush2.bf16.msra.mxu0 %v6567_v2  ;;  %v1974_v2 = vld [vmem:[#allocation8 + $0x730] sm:$0xff] }
 0x283   :  { %5230 = vmatprep.subr.bf16.mxu0 %v6560_v3  ;;  %v6719_v3 = vcombine.low %v1978_v49, %v1982_v51  ;;  %v6712_v5 = vcombine.high %v1970_v0, %v1974_v2  ;;  %v2118_v49 = vld [vmem:[#allocation8 + $0xbb0] sm:$0xff] }
 0x284   :  { %5254 = vmatpush1.bf16.msra.mxu1 %v6639_v39  ;;  %v6775_v39 = vcombine.low %v2034_v10, %v2038_v11  ;;  %v2114_v11 = vld [vmem:[#allocation8 + $0xb90] sm:$0xff] }
 0x285   :  { %5255 = vmatprep.subr.bf16.mxu1 %v6632_v4  ;;  %v6768_v4 = vcombine.high %v2026_v60, %v2030_v61  ;;  %v2186_v51 = vld [vmem:[#allocation8 + $0xdd0] sm:$0xff] }
 0x286   :  { %5231 = vmatpush2.bf16.msra.mxu0 %v6559_v7  ;;  %v1966_v7 = vld [vmem:[#allocation8 + $0x6f0] sm:$0xff] }
 0x287   :  { %5232 = vmatprep.subr.bf16.mxu0 %v6552_v8  ;;  %v6711_v8 = vcombine.low %v1970_v0, %v1974_v2  ;;  %v6704_v21 = vcombine.high %v1962_v6, %v1966_v7  ;;  %v2110_v0 = vld [vmem:[#allocation8 + $0xb70] sm:$0xff] }
 0x288   :  { %5256 = vmatpush1.bf16.msra.mxu1 %v6631_v26  ;;  %v6767_v26 = vcombine.low %v2026_v60, %v2030_v61  ;;  %v2106_v61 = vld [vmem:[#allocation8 + $0xb50] sm:$0xff] }
 0x289   :  { %5257 = vmatprep.subr.bf16.mxu1 %v6624_v9  ;;  %v6760_v9 = vcombine.high %v2018_v18, %v2022_v19  ;;  %v2178_v2 = vld [vmem:[#allocation8 + $0xd90] sm:$0xff] }
 0x28a   :  { %5233 = vmatpush2.bf16.msra.mxu0 %v6551_v16  ;;  %v1958_v16 = vld [vmem:[#allocation8 + $0x6b0] sm:$0xff] }
 0x28b   :  { %5288 = vmatprep.subr.bf16.mxu0 %v6800_v20  ;;  %v6703_v20 = vcombine.low %v1962_v6, %v1966_v7  ;;  %v6696_v24 = vcombine.high %v1954_v14, %v1958_v16  ;;  %v2102_v6 = vld [vmem:[#allocation8 + $0xb30] sm:$0xff] }
 0x28c   :  { %5258 = vmatpush1.bf16.msra.mxu1 %v6623_v17  ;;  %v6759_v17 = vcombine.low %v2018_v18, %v2022_v19  ;;  %v2098_v19 = vld [vmem:[#allocation8 + $0xb10] sm:$0xff] }
 0x28d   :  { %5259 = vmatprep.subr.bf16.mxu1 %v6616_v22  ;;  %5235 = vmatmul.mubr.bf16.vlgmr.msra.gmra.mxu0 %v7544_v15  ;;  %v6752_v22 = vcombine.high %v2010_v12, %v2014_v63  ;;  %v2170_v7 = vld [vmem:[#allocation8 + $0xd50] sm:$0xff] }
 0x28e   :  { %5289 = vmatpush1.bf16.msra.mxu0 %v6799_v30  ;;  %5320 = vmatprep.mubr.bf16.mxu0 %v7584_v34  ;;  %v1950_v30 = vld [vmem:[#allocation8 + $0x670] sm:$0xff] }
 0x28f   :  { %5290 = vmatprep.subr.bf16.mxu0 %v6792_v32  ;;  %v6695_v32 = vcombine.low %v1954_v14, %v1958_v16  ;;  %v6688_v36 = vcombine.high %v1946_v44, %v1950_v30  ;;  %v2094_v14 = vld [vmem:[#allocation8 + $0xaf0] sm:$0xff] }
 0x290   :  { %5260 = vmatpush1.bf16.msra.mxu1 %v6615_v31  ;;  %v6751_v31 = vcombine.low %v2010_v12, %v2014_v63  ;;  %v2090_v63 = vld [vmem:[#allocation8 + $0xad0] sm:$0xff] }
 0x291   :  { %5261 = vmatprep.subr.bf16.mxu1 %v6736_v33  ;;  %v6744_v33 = vcombine.high %v2002_v25, %v2006_v28  ;;  %v2162_v16 = vld [vmem:[#allocation8 + $0xd10] sm:$0xff] }
 0x292   :  { %5291 = vmatpush1.bf16.msra.mxu0 %v6791_v43  ;;  %v1942_v43 = vld [vmem:[#allocation8 + $0x630] sm:$0xff] }
 0x293   :  { %5292 = vmatprep.subr.bf16.mxu0 %v6784_v46  ;;  %v6687_v46 = vcombine.low %v1946_v44, %v1950_v30  ;;  %v6680_v10 = vcombine.high %v1938_v38, %v1942_v43  ;;  %v2086_v44 = vld [vmem:[#allocation8 + $0xab0] sm:$0xff] }
 0x294   :  { %5262 = vmatpush2.bf16.msra.mxu1 %v6735_v45  ;;  %v6743_v45 = vcombine.low %v2002_v25, %v2006_v28  ;;  %v2082_v28 = vld [vmem:[#allocation8 + $0xa90] sm:$0xff] }
 0x295   :  { %5263 = vmatprep.subr.bf16.mxu1 %v6728_v48  ;;  %v6864_v48 = vcombine.high %v2122_v55, %v2126_v56  ;;  %v2154_v30 = vld [vmem:[#allocation8 + $0xcd0] sm:$0xff] }
 0x296   :  { %5293 = vmatpush1.bf16.msra.mxu0 %v6783_v52  ;;  %v2190_v52 = vld [vmem:[#allocation8 + $0xdf0] sm:$0xff] }
 0x297   :  { %5294 = vmatprep.subr.bf16.mxu0 %v6776_v57  ;;  %v6679_v57 = vcombine.low %v1938_v38, %v1942_v43  ;;  %v6928_v60 = vcombine.high %v2186_v51, %v2190_v52  ;;  %v2078_v38 = vld [vmem:[#allocation8 + $0xa70] sm:$0xff] }
 0x298   :  { %5264 = vmatpush2.bf16.msra.mxu1 %v6727_v53  ;;  %v6863_v53 = vcombine.low %v2122_v55, %v2126_v56  ;;  %v2074_v56 = vld [vmem:[#allocation8 + $0xa50] sm:$0xff] }
 0x299   :  { %5265 = vmatprep.subr.bf16.mxu1 %v6720_v59  ;;  %v6856_v59 = vcombine.high %v2114_v11, %v2118_v49  ;;  %v2146_v43 = vld [vmem:[#allocation8 + $0xc90] sm:$0xff] }
 0x29a   :  { %5295 = vmatpush1.bf16.msra.mxu0 %v6775_v39  ;;  %v2182_v39 = vld [vmem:[#allocation8 + $0xdb0] sm:$0xff] }
 0x29b   :  { %5296 = vmatprep.subr.bf16.mxu0 %v6768_v4  ;;  %v6927_v4 = vcombine.low %v2186_v51, %v2190_v52  ;;  %v6920_v18 = vcombine.high %v2178_v2, %v2182_v39  ;;  %v2070_v51 = vld [vmem:[#allocation8 + $0xa30] sm:$0xff] }
 0x29c   :  { %5266 = vmatpush2.bf16.msra.mxu1 %v6719_v3  ;;  %v6855_v3 = vcombine.low %v2114_v11, %v2118_v49  ;;  %v2066_v49 = vld [vmem:[#allocation8 + $0xa10] sm:$0xff] }
 0x29d   :  { %5267 = vmatprep.subr.bf16.mxu1 %v6712_v5  ;;  %v6848_v5 = vcombine.high %v2106_v61, %v2110_v0  ;;  %v2138_v52 = vld [vmem:[#allocation8 + $0xc50] sm:$0xff] }
 0x29e   :  { %5297 = vmatpush1.bf16.msra.mxu0 %v6767_v26  ;;  %v2174_v26 = vld [vmem:[#allocation8 + $0xd70] sm:$0xff] }
 0x29f   :  { %5298 = vmatprep.subr.bf16.mxu0 %v6760_v9  ;;  %v6919_v9 = vcombine.low %v2178_v2, %v2182_v39  ;;  %v6912_v12 = vcombine.high %v2170_v7, %v2174_v26  ;;  %v1807_v2 = vld [vmem:[#allocation8 + $0x1f8] sm:$0xff]  ;;  %v2130_v39 = vld [vmem:[#allocation8 + $0xc10] sm:$0xff] }
 0x2a0   :  { %5268 = vmatpush2.bf16.msra.mxu1 %v6711_v8  ;;  %v6847_v8 = vcombine.low %v2106_v61, %v2110_v0  ;;  %v1803_v0 = vld [vmem:[#allocation8 + $0x1d8] sm:$0xff] }
 0x2a1   :  { %5269 = vmatprep.subr.bf16.mxu1 %v6704_v21  ;;  %v6840_v21 = vcombine.high %v2098_v19, %v2102_v6 }
 0x2a2   :  { %5299 = vmatpush1.bf16.msra.mxu0 %v6759_v17  ;;  %v2166_v17 = vld [vmem:[#allocation8 + $0xd30] sm:$0xff] }
 0x2a3   :  { %5300 = vmatprep.subr.bf16.mxu0 %v6752_v22  ;;  %v6911_v22 = vcombine.low %v2170_v7, %v2174_v26  ;;  %v6904_v25 = vcombine.high %v2162_v16, %v2166_v17  ;;  %v1799_v7 = vld [vmem:[#allocation8 + $0x1b8] sm:$0xff]  ;;  %v2250_v26 = vld [vmem:[#allocation8 + $0xfd0] sm:$0xff] }
 0x2a4   :  { %5270 = vmatpush2.bf16.msra.mxu1 %v6703_v20  ;;  %v6839_v20 = vcombine.low %v2098_v19, %v2102_v6  ;;  %v1795_v6 = vld [vmem:[#allocation8 + $0x198] sm:$0xff] }
 0x2a5   :  { %5271 = vmatprep.subr.bf16.mxu1 %v6696_v24  ;;  %v6832_v24 = vcombine.high %v2090_v63, %v2094_v14 }
 0x2a6   :  { %5301 = vmatpush1.bf16.msra.mxu0 %v6751_v31  ;;  %v2158_v31 = vld [vmem:[#allocation8 + $0xcf0] sm:$0xff] }
 0x2a7   :  { %5302 = vmatprep.subr.bf16.mxu0 %v6744_v33  ;;  %v6903_v33 = vcombine.low %v2162_v16, %v2166_v17  ;;  %v6896_v55 = vcombine.high %v2154_v30, %v2158_v31  ;;  %v1791_v16 = vld [vmem:[#allocation8 + $0x178] sm:$0xff]  ;;  %v2242_v17 = vld [vmem:[#allocation8 + $0xf90] sm:$0xff] }
 0x2a8   :  { %5272 = vmatpush2.bf16.msra.mxu1 %v6695_v32  ;;  %v6831_v32 = vcombine.low %v2090_v63, %v2094_v14  ;;  %v1787_v14 = vld [vmem:[#allocation8 + $0x158] sm:$0xff] }
 0x2a9   :  { %5273 = vmatprep.subr.bf16.mxu1 %v6688_v36  ;;  %v6824_v36 = vcombine.high %v2082_v28, %v2086_v44 }
 0x2aa   :  { %5303 = vmatpush1.bf16.msra.mxu0 %v6743_v45  ;;  %v2150_v45 = vld [vmem:[#allocation8 + $0xcb0] sm:$0xff] }
 0x2ab   :  { %5304 = vmatprep.subr.bf16.mxu0 %v6864_v48  ;;  %v6895_v48 = vcombine.low %v2154_v30, %v2158_v31  ;;  %v6888_v11 = vcombine.high %v2146_v43, %v2150_v45  ;;  %v1783_v30 = vld [vmem:[#allocation8 + $0x138] sm:$0xff]  ;;  %v2234_v31 = vld [vmem:[#allocation8 + $0xf50] sm:$0xff] }
 0x2ac   :  { %5274 = vmatpush2.bf16.msra.mxu1 %v6687_v46  ;;  %v6823_v46 = vcombine.low %v2082_v28, %v2086_v44  ;;  %v1779_v44 = vld [vmem:[#allocation8 + $0x118] sm:$0xff] }
 0x2ad   :  { %5275 = vmatprep.subr.bf16.mxu1 %v6680_v10  ;;  %v6816_v10 = vcombine.high %v2074_v56, %v2078_v38 }
 0x2ae   :  { %5305 = vmatpush2.bf16.msra.mxu0 %v6863_v53  ;;  %v2142_v53 = vld [vmem:[#allocation8 + $0xc70] sm:$0xff] }
 0x2af   :  { %5306 = vmatprep.subr.bf16.mxu0 %v6856_v59  ;;  %v6887_v59 = vcombine.low %v2146_v43, %v2150_v45  ;;  %v6880_v61 = vcombine.high %v2138_v52, %v2142_v53  ;;  %v2226_v43 = vld [vmem:[#allocation8 + $0xf10] sm:$0xff] }
 0x2b0   :  { %5276 = vmatpush2.bf16.msra.mxu1 %v6679_v57  ;;  %v6815_v57 = vcombine.low %v2074_v56, %v2078_v38  ;;  %v1775_v38 = vld [vmem:[#allocation8 + $0xf8] sm:$0xff]  ;;  %v2230_v45 = vld [vmem:[#allocation8 + $0xf30] sm:$0xff] }
 0x2b1   :  { %5331 = vmatprep.subr.bf16.mxu1 %v6928_v60  ;;  %v6808_v60 = vcombine.high %v2066_v49, %v2070_v51 }
 0x2b2   :  { %5307 = vmatpush2.bf16.msra.mxu0 %v6855_v3  ;;  %v2134_v3 = vld [vmem:[#allocation8 + $0xc30] sm:$0xff] }
 0x2b3   :  { %5278 = vmatmul.mubr.bf16.vlgmr.msra.gmra.mxu1 %v7560_v27  ;;  %5308 = vmatprep.subr.bf16.mxu0 %v6848_v5  ;;  %v6879_v5 = vcombine.low %v2138_v52, %v2142_v53  ;;  %v6872_v19 = vcombine.high %v2130_v39, %v2134_v3  ;;  %v2218_v52 = vld [vmem:[#allocation8 + $0xed0] sm:$0xff] }
 0x2b4   :  { %5332 = vmatpush1.bf16.msra.mxu1 %v6927_v4  ;;  %5363 = vmatprep.mubr.bf16.mxu1 %v7601_v54  ;;  %v6807_v4 = vcombine.low %v2066_v49, %v2070_v51  ;;  %v1763_v49 = vld [vmem:[#allocation8 + $0x98] sm:$0xff]  ;;  %v2222_v53 = vld [vmem:[#allocation8 + $0xef0] sm:$0xff] }
 0x2b5   :  { %5333 = vmatprep.subr.bf16.mxu1 %v6920_v18  ;;  %v6546_v18 = vcombine.high %v1803_v0, %v1807_v2  ;;  %v1767_v51 = vld [vmem:[#allocation8 + $0xb8] sm:$0xff] }
 0x2b6   :  { %5309 = vmatpush2.bf16.msra.mxu0 %v6847_v8  ;;  %v2254_v8 = vld [vmem:[#allocation8 + $0xff0] sm:$0xff] }
 0x2b7   :  { %5310 = vmatprep.subr.bf16.mxu0 %v6840_v21  ;;  %v6871_v21 = vcombine.low %v2130_v39, %v2134_v3  ;;  %v6992_v63 = vcombine.high %v2250_v26, %v2254_v8  ;;  %v2210_v39 = vld [vmem:[#allocation8 + $0xe90] sm:$0xff] }
 0x2b8   :  { %5334 = vmatpush1.bf16.msra.mxu1 %v6919_v9  ;;  %v6545_v9 = vcombine.low %v1803_v0, %v1807_v2  ;;  %v1755_v0 = vld [vmem:[#allocation8 + $0x58] sm:$0xff]  ;;  %v2214_v3 = vld [vmem:[#allocation8 + $0xeb0] sm:$0xff] }
 0x2b9   :  { %5335 = vmatprep.subr.bf16.mxu1 %v6912_v12  ;;  %v6538_v12 = vcombine.high %v1795_v6, %v1799_v7  ;;  %v1759_v2 = vld [vmem:[#allocation8 + $0x78] sm:$0xff] }
 0x2ba   :  { %5311 = vmatpush2.bf16.msra.mxu0 %v6839_v20  ;;  %v2246_v20 = vld [vmem:[#allocation8 + $0xfb0] sm:$0xff] }
 0x2bb   :  { %5312 = vmatprep.subr.bf16.mxu0 %v6832_v24  ;;  %v6991_v24 = vcombine.low %v2250_v26, %v2254_v8  ;;  %v6984_v28 = vcombine.high %v2242_v17, %v2246_v20  ;;  %v2202_v26 = vld [vmem:[#allocation8 + $0xe50] sm:$0xff] }
 0x2bc   :  { %5336 = vmatpush1.bf16.msra.mxu1 %v6911_v22  ;;  %v6537_v22 = vcombine.low %v1795_v6, %v1799_v7  ;;  %v1747_v6 = vld [vmem:[#allocation8 + $0x18] sm:$0xff]  ;;  %v2206_v8 = vld [vmem:[#allocation8 + $0xe70] sm:$0xff] }
 0x2bd   :  { %5337 = vmatprep.subr.bf16.mxu1 %v6904_v25  ;;  %v6530_v25 = vcombine.high %v1787_v14, %v1791_v16  ;;  %v1751_v7 = vld [vmem:[#allocation8 + $0x38] sm:$0xff] }
 0x2be   :  { %5313 = vmatpush2.bf16.msra.mxu0 %v6831_v32  ;;  %v2238_v32 = vld [vmem:[#allocation8 + $0xf70] sm:$0xff] }
 0x2bf   :  { %5314 = vmatprep.subr.bf16.mxu0 %v6824_v36  ;;  %v6983_v36 = vcombine.low %v2242_v17, %v2246_v20  ;;  %v6976_v56 = vcombine.high %v2234_v31, %v2238_v32  ;;  %v2194_v17 = vld [vmem:[#allocation8 + $0xe10] sm:$0xff] }
 0x2c0   :  { %5338 = vmatpush1.bf16.msra.mxu1 %v6903_v33  ;;  %v6529_v33 = vcombine.low %v1787_v14, %v1791_v16  ;;  %v1867_v14 = vld [vmem:[#allocation8 + $0x3d8] sm:$0xff]  ;;  %v2198_v20 = vld [vmem:[#allocation8 + $0xe30] sm:$0xff] }
 0x2c1   :  { %5339 = vmatprep.subr.bf16.mxu1 %v6896_v55  ;;  %v6522_v55 = vcombine.high %v1779_v44, %v1783_v30  ;;  %v1871_v16 = vld [vmem:[#allocation8 + $0x3f8] sm:$0xff] }
 0x2c2   :  { %5315 = vmatpush2.bf16.msra.mxu0 %v6823_v46  ;;  %v6521_v46 = vcombine.low %v1779_v44, %v1783_v30  ;;  %v1859_v44 = vld [vmem:[#allocation8 + $0x398] sm:$0xff] }
 0x2c3   :  { %5316 = vmatprep.subr.bf16.mxu0 %v6816_v10  ;;  %v1863_v30 = vld [vmem:[#allocation8 + $0x3b8] sm:$0xff] }
 0x2c4   :  { %5340 = vmatpush1.bf16.msra.mxu1 %v6895_v48  ;;  %v6975_v48 = vcombine.low %v2234_v31, %v2238_v32  ;;  %v1931_v31 = vld [vmem:[#allocation8 + $0x5d8] sm:$0xff] }
 0x2c5   :  { %5341 = vmatprep.subr.bf16.mxu1 %v6888_v11  ;;  %v6968_v11 = vcombine.high %v2226_v43, %v2230_v45  ;;  %v1935_v32 = vld [vmem:[#allocation8 + $0x5f8] sm:$0xff] }
 0x2c6   :  { %5317 = vmatpush2.bf16.msra.mxu0 %v6815_v57 }
 0x2c7   :  { %5318 = vmatprep.subr.bf16.mxu0 %v6808_v60  ;;  %v6506_v60 = vcombine.high %v1763_v49, %v1767_v51 }
 0x2c8   :  { %5342 = vmatpush1.bf16.msra.mxu1 %v6887_v59  ;;  %v6967_v59 = vcombine.low %v2226_v43, %v2230_v45  ;;  %v1923_v43 = vld [vmem:[#allocation8 + $0x598] sm:$0xff] }
 0x2c9   :  { %5343 = vmatprep.subr.bf16.mxu1 %v6880_v61  ;;  %v6960_v61 = vcombine.high %v2218_v52, %v2222_v53  ;;  %v1927_v45 = vld [vmem:[#allocation8 + $0x5b8] sm:$0xff] }
 0x2ca   :  { %5319 = vmatpush2.bf16.msra.mxu0 %v6807_v4  ;;  %v6505_v4 = vcombine.low %v1763_v49, %v1767_v51  ;;  %v1843_v49 = vld [vmem:[#allocation8 + $0x318] sm:$0xff] }
 0x2cb   :  { %5374 = vmatprep.subr.bf16.mxu0 %v6546_v18  ;;  %v6498_v18 = vcombine.high %v1755_v0, %v1759_v2  ;;  %v1847_v51 = vld [vmem:[#allocation8 + $0x338] sm:$0xff] }
 0x2cc   :  { %5344 = vmatpush1.bf16.msra.mxu1 %v6879_v5  ;;  %v6959_v5 = vcombine.low %v2218_v52, %v2222_v53  ;;  %v1915_v52 = vld [vmem:[#allocation8 + $0x558] sm:$0xff] }
 0x2cd   :  { %5345 = vmatprep.subr.bf16.mxu1 %v6872_v19  ;;  %5321 = vmatmul.mubr.bf16.vlgmr.msra.gmra.mxu0 %v7588_v37  ;;  %v6952_v19 = vcombine.high %v2210_v39, %v2214_v3  ;;  %v1919_v53 = vld [vmem:[#allocation8 + $0x578] sm:$0xff] }
 0x2ce   :  { %5375 = vmatpush1.bf16.msra.mxu0 %v6545_v9  ;;  %5406 = vmatprep.mubr.bf16.mxu0 %v7542_v13  ;;  %v1771_v13 = vld [vmem:[#allocation8 + $0xd8] sm:$0xff]  ;;  %v6497_v9 = vcombine.low %v1755_v0, %v1759_v2 }
 0x2cf   :  { %5376 = vmatprep.subr.bf16.mxu0 %v6538_v12  ;;  %v6514_v10 = vcombine.high %v1771_v13, %v1775_v38  ;;  %v6513_v57 = vcombine.low %v1771_v13, %v1775_v38  ;;  %v6490_v12 = vcombine.high %v1747_v6, %v1751_v7  ;;  %v1851_v13 = vld [vmem:[#allocation8 + $0x358] sm:$0xff] }
 0x2d0   :  { %5346 = vmatpush1.bf16.msra.mxu1 %v6871_v21  ;;  %v6951_v21 = vcombine.low %v2210_v39, %v2214_v3  ;;  %v1855_v38 = vld [vmem:[#allocation8 + $0x378] sm:$0xff] }
 0x2d1   :  { %5347 = vmatprep.subr.bf16.mxu1 %v6992_v63  ;;  %v6944_v63 = vcombine.high %v2202_v26, %v2206_v8  ;;  %v1835_v0 = vld [vmem:[#allocation8 + $0x2d8] sm:$0xff] }
 0x2d2   :  { %5377 = vmatpush1.bf16.msra.mxu0 %v6537_v22  ;;  %v6489_v22 = vcombine.low %v1747_v6, %v1751_v7  ;;  %v1839_v2 = vld [vmem:[#allocation8 + $0x2f8] sm:$0xff] }
 0x2d3   :  { %5378 = vmatprep.subr.bf16.mxu0 %v6530_v25  ;;  %v6610_v25 = vcombine.high %v1867_v14, %v1871_v16  ;;  %v1907_v39 = vld [vmem:[#allocation8 + $0x518] sm:$0xff] }
 0x2d4   :  { %5348 = vmatpush2.bf16.msra.mxu1 %v6991_v24  ;;  %v6943_v24 = vcombine.low %v2202_v26, %v2206_v8  ;;  %v1911_v3 = vld [vmem:[#allocation8 + $0x538] sm:$0xff]  ;;  %v6577_v8 = vcombine.low %v1835_v0, %v1839_v2 }
 0x2d5   :  { %5349 = vmatprep.subr.bf16.mxu1 %v6984_v28  ;;  %v6936_v28 = vcombine.high %v2194_v17, %v2198_v20  ;;  %v1827_v6 = vld [vmem:[#allocation8 + $0x298] sm:$0xff] }
 0x2d6   :  { %5379 = vmatpush1.bf16.msra.mxu0 %v6529_v33  ;;  %v6609_v33 = vcombine.low %v1867_v14, %v1871_v16  ;;  %v1831_v7 = vld [vmem:[#allocation8 + $0x2b8] sm:$0xff] }
 0x2d7   :  { %5380 = vmatprep.subr.bf16.mxu0 %v6522_v55  ;;  %v6602_v55 = vcombine.high %v1859_v44, %v1863_v30  ;;  %v1903_v26 = vld [vmem:[#allocation8 + $0x4f8] sm:$0xff] }
 0x2d8   :  { %5350 = vmatpush2.bf16.msra.mxu1 %v6983_v36  ;;  %v6935_v36 = vcombine.low %v2194_v17, %v2198_v20  ;;  %v1823_v14 = vld [vmem:[#allocation8 + $0x278] sm:$0xff]  ;;  %v6569_v20 = vcombine.low %v1827_v6, %v1831_v7 }
 0x2d9   :  { %5351 = vmatprep.subr.bf16.mxu1 %v6976_v56  ;;  %v6674_v56 = vcombine.high %v1931_v31, %v1935_v32  ;;  %v1891_v16 = vld [vmem:[#allocation8 + $0x498] sm:$0xff] }
 0x2da   :  { %5381 = vmatpush1.bf16.msra.mxu0 %v6521_v46  ;;  %v6601_v46 = vcombine.low %v1859_v44, %v1863_v30  ;;  %v1895_v17 = vld [vmem:[#allocation8 + $0x4b8] sm:$0xff] }
 0x2db   :  { %5382 = vmatprep.subr.bf16.mxu0 %v6514_v10  ;;  %v6594_v10 = vcombine.high %v1851_v13, %v1855_v38  ;;  %v1815_v44 = vld [vmem:[#allocation8 + $0x238] sm:$0xff] }
 0x2dc   :  { %5352 = vmatpush2.bf16.msra.mxu1 %v6975_v48  ;;  %v6673_v48 = vcombine.low %v1931_v31, %v1935_v32  ;;  %v1883_v30 = vld [vmem:[#allocation8 + $0x458] sm:$0xff] }
 0x2dd   :  { %5353 = vmatprep.subr.bf16.mxu1 %v6968_v11  ;;  %v6666_v11 = vcombine.high %v1923_v43, %v1927_v45  ;;  %v1887_v31 = vld [vmem:[#allocation8 + $0x478] sm:$0xff] }
 0x2de   :  { %5383 = vmatpush1.bf16.msra.mxu0 %v6513_v57  ;;  %v6593_v57 = vcombine.low %v1851_v13, %v1855_v38  ;;  %v2063_v13 = vld [vmem:[#allocation8 + $0x9f8] sm:$0xff] }
 0x2df   :  { %5384 = vmatprep.subr.bf16.mxu0 %v6506_v60  ;;  %v6586_v60 = vcombine.high %v1843_v49, %v1847_v51  ;;  %v1875_v38 = vld [vmem:[#allocation8 + $0x418] sm:$0xff] }
 0x2e0   :  { %5354 = vmatpush2.bf16.msra.mxu1 %v6967_v59  ;;  %v6665_v59 = vcombine.low %v1923_v43, %v1927_v45  ;;  %v1879_v43 = vld [vmem:[#allocation8 + $0x438] sm:$0xff] }
 0x2e1   :  { %5355 = vmatprep.subr.bf16.mxu1 %v6960_v61  ;;  %v6658_v61 = vcombine.high %v1915_v52, %v1919_v53 }
 0x2e2   :  { %5385 = vmatpush1.bf16.msra.mxu0 %v6505_v4  ;;  %v6585_v4 = vcombine.low %v1843_v49, %v1847_v51  ;;  %v2055_v49 = vld [vmem:[#allocation8 + $0x9b8] sm:$0xff] }
 0x2e3   :  { %5386 = vmatprep.subr.bf16.mxu0 %v6498_v18  ;;  %v6578_v18 = vcombine.high %v1835_v0, %v1839_v2  ;;  %v1995_v51 = vld [vmem:[#allocation8 + $0x7d8] sm:$0xff] }
 0x2e4   :  { %5356 = vmatpush2.bf16.msra.mxu1 %v6959_v5  ;;  %v6657_v5 = vcombine.low %v1915_v52, %v1919_v53  ;;  %v1999_v52 = vld [vmem:[#allocation8 + $0x7f8] sm:$0xff] }
 0x2e5   :  { %5357 = vmatprep.subr.bf16.mxu1 %v6952_v19  ;;  %v6650_v19 = vcombine.high %v1907_v39, %v1911_v3  ;;  %v2047_v0 = vld [vmem:[#allocation8 + $0x978] sm:$0xff] }
 0x2e6   :  { %5387 = vmatpush1.bf16.msra.mxu0 %v6497_v9  ;;  %v6649_v9 = vcombine.low %v1907_v39, %v1911_v3  ;;  %v1987_v2 = vld [vmem:[#allocation8 + $0x798] sm:$0xff] }
 0x2e7   :  { %5388 = vmatprep.subr.bf16.mxu0 %v6490_v12  ;;  %v1991_v39 = vld [vmem:[#allocation8 + $0x7b8] sm:$0xff] }
 0x2e8   :  { %5358 = vmatpush2.bf16.msra.mxu1 %v6951_v21  ;;  %v6570_v21 = vcombine.high %v1827_v6, %v1831_v7  ;;  %v2039_v6 = vld [vmem:[#allocation8 + $0x938] sm:$0xff] }
 0x2e9   :  { %5359 = vmatprep.subr.bf16.mxu1 %v6944_v63  ;;  %v1819_v63 = vld [vmem:[#allocation8 + $0x258] sm:$0xff] }
 0x2ea   :  { %5389 = vmatpush1.bf16.msra.mxu0 %v6489_v22  ;;  %v6561_v32 = vcombine.low %v1819_v63, %v1823_v14  ;;  %v1979_v7 = vld [vmem:[#allocation8 + $0x758] sm:$0xff] }
 0x2eb   :  { %5390 = vmatprep.subr.bf16.mxu0 %v6610_v25  ;;  %v6634_v25 = vcombine.high %v1891_v16, %v1895_v17 }
 0x2ec   :  { %5360 = vmatpush2.bf16.msra.mxu1 %v6943_v24  ;;  %v6562_v24 = vcombine.high %v1819_v63, %v1823_v14  ;;  %v1975_v63 = vld [vmem:[#allocation8 + $0x738] sm:$0xff] }
 0x2ed   :  { %5361 = vmatprep.subr.bf16.mxu1 %v6936_v28  ;;  %v1811_v28 = vld [vmem:[#allocation8 + $0x218] sm:$0xff] }
 0x2ee   :  { %5391 = vmatpush2.bf16.msra.mxu0 %v6609_v33  ;;  %v6633_v33 = vcombine.low %v1891_v16, %v1895_v17  ;;  %v6553_v45 = vcombine.low %v1811_v28, %v1815_v44 }
 0x2ef   :  { %5392 = vmatprep.subr.bf16.mxu0 %v6602_v55  ;;  %v6626_v55 = vcombine.high %v1883_v30, %v1887_v31 }
 0x2f0   :  { %5362 = vmatpush2.bf16.msra.mxu1 %v6935_v36  ;;  %v6554_v36 = vcombine.high %v1811_v28, %v1815_v44  ;;  %v1967_v28 = vld [vmem:[#allocation8 + $0x6f8] sm:$0xff] }
 0x2f1   :  { %5417 = vmatprep.subr.bf16.mxu1 %v6674_v56  ;;  %v2059_v56 = vld [vmem:[#allocation8 + $0x9d8] sm:$0xff] }
 0x2f2   :  { %5393 = vmatpush2.bf16.msra.mxu0 %v6601_v46  ;;  %v6625_v46 = vcombine.low %v1883_v30, %v1887_v31  ;;  %v6801_v53 = vcombine.low %v2059_v56, %v2063_v13 }
 0x2f3   :  { %5364 = vmatmul.mubr.bf16.vlgmr.msra.gmra.mxu1 %v7605_v58  ;;  %5394 = vmatprep.subr.bf16.mxu0 %v6594_v10  ;;  %v6618_v10 = vcombine.high %v1875_v38, %v1879_v43 }
 0x2f4   :  { %5418 = vmatpush1.bf16.msra.mxu1 %v6673_v48  ;;  %5449 = vmatprep.mubr.bf16.mxu1 %v7556_v23  ;;  %v1899_v23 = vld [vmem:[#allocation8 + $0x4d8] sm:$0xff]  ;;  %v6802_v48 = vcombine.high %v2059_v56, %v2063_v13 }
 0x2f5   :  { %5419 = vmatprep.subr.bf16.mxu1 %v6666_v11  ;;  %v6642_v12 = vcombine.high %v1899_v23, %v1903_v26  ;;  %v6641_v22 = vcombine.low %v1899_v23, %v1903_v26  ;;  %v2051_v11 = vld [vmem:[#allocation8 + $0x998] sm:$0xff] }
 0x2f6   :  { %5395 = vmatpush2.bf16.msra.mxu0 %v6593_v57  ;;  %v6617_v57 = vcombine.low %v1875_v38, %v1879_v43  ;;  %v6793_v3 = vcombine.low %v2051_v11, %v2055_v49  ;;  %v1983_v23 = vld [vmem:[#allocation8 + $0x778] sm:$0xff] }
 0x2f7   :  { %5396 = vmatprep.subr.bf16.mxu0 %v6586_v60  ;;  %v6738_v60 = vcombine.high %v1995_v51, %v1999_v52  ;;  %v6721_v16 = vcombine.low %v1979_v7, %v1983_v23  ;;  %v1959_v56 = vld [vmem:[#allocation8 + $0x6b8] sm:$0xff] }
 0x2f8   :  { %5420 = vmatpush1.bf16.msra.mxu1 %v6665_v59  ;;  %v6794_v59 = vcombine.high %v2051_v11, %v2055_v49  ;;  %v1951_v11 = vld [vmem:[#allocation8 + $0x678] sm:$0xff] }
 0x2f9   :  { %5421 = vmatprep.subr.bf16.mxu1 %v6658_v61  ;;  %v2043_v61 = vld [vmem:[#allocation8 + $0x958] sm:$0xff] }
 0x2fa   :  { %5397 = vmatpush2.bf16.msra.mxu0 %v6585_v4  ;;  %v6737_v4 = vcombine.low %v1995_v51, %v1999_v52  ;;  %v6785_v26 = vcombine.low %v2043_v61, %v2047_v0 }
 0x2fb   :  { %5398 = vmatprep.subr.bf16.mxu0 %v6578_v18  ;;  %v6730_v18 = vcombine.high %v1987_v2, %v1991_v39 }
 0x2fc   :  { %5422 = vmatpush1.bf16.msra.mxu1 %v6657_v5  ;;  %v6786_v5 = vcombine.high %v2043_v61, %v2047_v0  ;;  %v1939_v61 = vld [vmem:[#allocation8 + $0x618] sm:$0xff] }
 0x2fd   :  { %5423 = vmatprep.subr.bf16.mxu1 %v6650_v19  ;;  %v2035_v19 = vld [vmem:[#allocation8 + $0x918] sm:$0xff] }
 0x2fe   :  { %5399 = vmatpush2.bf16.msra.mxu0 %v6577_v8  ;;  %v6778_v8 = vcombine.high %v2035_v19, %v2039_v6  ;;  %v6777_v14 = vcombine.low %v2035_v19, %v2039_v6  ;;  %v1943_v0 = vld [vmem:[#allocation8 + $0x638] sm:$0xff] }
 0x2ff   :  { %5400 = vmatprep.subr.bf16.mxu0 %v6570_v21  ;;  %v2031_v21 = vld [vmem:[#allocation8 + $0x8f8] sm:$0xff] }
 0x300   :  { %5424 = vmatpush1.bf16.msra.mxu1 %v6649_v9  ;;  %v6722_v9 = vcombine.high %v1979_v7, %v1983_v23  ;;  %v2119_v19 = vld [vmem:[#allocation8 + $0xbb8] sm:$0xff] }
 0x301   :  { %5425 = vmatprep.subr.bf16.mxu1 %v6642_v12  ;;  %v1971_v12 = vld [vmem:[#allocation8 + $0x718] sm:$0xff] }
 0x302   :  { %5401 = vmatpush2.bf16.msra.mxu0 %v6569_v20  ;;  %v6714_v20 = vcombine.high %v1971_v12, %v1975_v63  ;;  %v6713_v30 = vcombine.low %v1971_v12, %v1975_v63  ;;  %v2187_v7 = vld [vmem:[#allocation8 + $0xdd8] sm:$0xff] }
 0x303   :  { %5402 = vmatprep.subr.bf16.mxu0 %v6562_v24  ;;  %v2023_v24 = vld [vmem:[#allocation8 + $0x8b8] sm:$0xff] }
 0x304   :  { %5426 = vmatpush1.bf16.msra.mxu1 %v6641_v22  ;;  %v2019_v22 = vld [vmem:[#allocation8 + $0x898] sm:$0xff] }
 0x305   :  { %5427 = vmatprep.subr.bf16.mxu1 %v6634_v25  ;;  %v1963_v25 = vld [vmem:[#allocation8 + $0x6d8] sm:$0xff]  ;;  %v6762_v31 = vcombine.high %v2019_v22, %v2023_v24  ;;  %v6761_v13 = vcombine.low %v2019_v22, %v2023_v24 }
 0x306   :  { %5403 = vmatpush2.bf16.msra.mxu0 %v6561_v32  ;;  %v6706_v32 = vcombine.high %v1963_v25, %v1967_v28  ;;  %v6705_v38 = vcombine.low %v1963_v25, %v1967_v28  ;;  %v2191_v23 = vld [vmem:[#allocation8 + $0xdf8] sm:$0xff] }
 0x307   :  { %5404 = vmatprep.subr.bf16.mxu0 %v6554_v36  ;;  %v2015_v36 = vld [vmem:[#allocation8 + $0x878] sm:$0xff]  ;;  %v6929_v22 = vcombine.low %v2187_v7, %v2191_v23 }
 0x308   :  { %5428 = vmatpush1.bf16.msra.mxu1 %v6633_v33  ;;  %v2011_v33 = vld [vmem:[#allocation8 + $0x858] sm:$0xff] }
 0x309   :  { %5429 = vmatprep.subr.bf16.mxu1 %v6626_v55  ;;  %v1955_v55 = vld [vmem:[#allocation8 + $0x698] sm:$0xff]  ;;  %v6754_v43 = vcombine.high %v2011_v33, %v2015_v36  ;;  %v6753_v49 = vcombine.low %v2011_v33, %v2015_v36 }
 0x30a   :  { %5405 = vmatpush2.bf16.msra.mxu0 %v6553_v45  ;;  %v6698_v45 = vcombine.high %v1955_v55, %v1959_v56  ;;  %v6697_v51 = vcombine.low %v1955_v55, %v1959_v56  ;;  %v2111_v63 = vld [vmem:[#allocation8 + $0xb78] sm:$0xff] }
 0x30b   :  { %5460 = vmatprep.subr.bf16.mxu0 %v6802_v48  ;;  %v2007_v48 = vld [vmem:[#allocation8 + $0x838] sm:$0xff] }
 0x30c   :  { %5430 = vmatpush1.bf16.msra.mxu1 %v6625_v46  ;;  %v2003_v46 = vld [vmem:[#allocation8 + $0x818] sm:$0xff] }
 0x30d   :  { %5431 = vmatprep.subr.bf16.mxu1 %v6618_v10  ;;  %5407 = vmatmul.mubr.bf16.vlgmr.msra.gmra.mxu0 %v7544_v15  ;;  %v6729_v15 = vcombine.low %v1987_v2, %v1991_v39  ;;  %v1947_v10 = vld [vmem:[#allocation8 + $0x658] sm:$0xff]  ;;  %v6746_v52 = vcombine.high %v2003_v46, %v2007_v48  ;;  %v6745_v2 = vcombine.low %v2003_v46, %v2007_v48  ;;  %v7630_v39 = vpop.f32.mrf.mxu1 }
 0x30e   :  { %5461 = vmatpush1.bf16.msra.mxu0 %v6801_v53  ;;  %5492 = vmatprep.mubr.bf16.mxu0 %v7584_v34  ;;  %v2027_v34 = vld [vmem:[#allocation8 + $0x8d8] sm:$0xff]  ;;  %v6690_v53 = vcombine.high %v1947_v10, %v1951_v11 }
 0x30f   :  { %5462 = vmatprep.subr.bf16.mxu0 %v6794_v59  ;;  %v6770_v17 = vcombine.high %v2027_v34, %v2031_v21  ;;  %v6769_v44 = vcombine.low %v2027_v34, %v2031_v21  ;;  %v2127_v59 = vld [vmem:[#allocation8 + $0xbf8] sm:$0xff]  ;;  %v6930_v34 = vcombine.high %v2187_v7, %v2191_v23 }
 0x310   :  { %5432 = vmatpush1.bf16.msra.mxu1 %v6617_v57  ;;  %v2123_v57 = vld [vmem:[#allocation8 + $0xbd8] sm:$0xff] }
 0x311   :  { %5433 = vmatprep.subr.bf16.mxu1 %v6738_v60  ;;  %v7628_v60 = vpop.f32.mrf.mxu0  ;;  %v2107_v21 = vld [vmem:[#allocation8 + $0xb58] sm:$0xff] }
 0x312   :  { %5463 = vmatpush1.bf16.msra.mxu0 %v6793_v3  ;;  %v6689_v3 = vcombine.low %v1947_v10, %v1951_v11  ;;  %v6850_v24 = vcombine.high %v2107_v21, %v2111_v63  ;;  %v2099_v28 = vld [vmem:[#allocation8 + $0xb18] sm:$0xff]  ;;  %v6849_v33 = vcombine.low %v2107_v21, %v2111_v63 }
 0x313   :  { %5464 = vmatprep.subr.bf16.mxu0 %v6786_v5  ;;  %v6682_v5 = vcombine.high %v1939_v61, %v1943_v0  ;;  %v7632_v6 = vpop.f32.mrf.mxu0  ;;  %v2163_v48 = vld [vmem:[#allocation8 + $0xd18] sm:$0xff] }
 0x314   :  { %5434 = vmatpush2.bf16.msra.mxu1 %v6737_v4  ;;  %v6866_v4 = vcombine.high %v2123_v57, %v2127_v59  ;;  %v2167_v10 = vld [vmem:[#allocation8 + $0xd38] sm:$0xff] }
 0x315   :  { %5435 = vmatprep.subr.bf16.mxu1 %v6730_v18  ;;  %v2115_v18 = vld [vmem:[#allocation8 + $0xb98] sm:$0xff]  ;;  %v7636_v12 = vpop.f32.mrf.mxu0 }
 0x316   :  { %5465 = vmatpush1.bf16.msra.mxu0 %v6785_v26  ;;  %v6865_v26 = vcombine.low %v2123_v57, %v2127_v59  ;;  %v2155_v59 = vld [vmem:[#allocation8 + $0xcd8] sm:$0xff] }
 0x317   :  { %5466 = vmatprep.subr.bf16.mxu0 %v6778_v8  ;;  %v6681_v8 = vcombine.low %v1939_v61, %v1943_v0  ;;  %v2159_v61 = vld [vmem:[#allocation8 + $0xcf8] sm:$0xff] }
 0x318   :  { %5436 = vmatpush2.bf16.msra.mxu1 %v6729_v15  ;;  %v7634_v15 = vpop.f32.mrf.mxu1  ;;  %v2075_v7 = vld [vmem:[#allocation8 + $0xa58] sm:$0xff] }
 0x319   :  { %5437 = vmatprep.subr.bf16.mxu1 %v6722_v9  ;;  %v6858_v9 = vcombine.high %v2115_v18, %v2119_v19  ;;  %v2079_v23 = vld [vmem:[#allocation8 + $0xa78] sm:$0xff] }
 0x31a   :  { %5467 = vmatpush1.bf16.msra.mxu0 %v6777_v14  ;;  %v2179_v14 = vld [vmem:[#allocation8 + $0xd98] sm:$0xff] }
 0x31b   :  { %5468 = vmatprep.subr.bf16.mxu0 %v6770_v17  ;;  %v6857_v17 = vcombine.low %v2115_v18, %v2119_v19  ;;  %v6898_v19 = vcombine.high %v2155_v59, %v2159_v61 }
 0x31c   :  { %5438 = vmatpush2.bf16.msra.mxu1 %v6721_v16  ;;  %v2183_v16 = vld [vmem:[#allocation8 + $0xdb8] sm:$0xff] }
 0x31d   :  { %5439 = vmatprep.subr.bf16.mxu1 %v6714_v20  ;;  %v7638_v20 = vpop.f32.mrf.mxu1  ;;  %v6922_v25 = vcombine.high %v2179_v14, %v2183_v16  ;;  %v6921_v56 = vcombine.low %v2179_v14, %v2183_v16  ;;  %v6897_v14 = vcombine.low %v2155_v59, %v2159_v61  ;;  %v6818_v16 = vcombine.high %v2075_v7, %v2079_v23 }
 0x31e   :  { %5469 = vmatpush1.bf16.msra.mxu0 %v6769_v44  ;;  %v2103_v44 = vld [vmem:[#allocation8 + $0xb38] sm:$0xff] }
 0x31f   :  { %5470 = vmatprep.subr.bf16.mxu0 %v6762_v31  ;;  %v2171_v31 = vld [vmem:[#allocation8 + $0xd58] sm:$0xff]  ;;  %v4941_v36 = vpop.f32.mrf.mxu1 }
 0x320   :  { %5440 = vmatpush2.bf16.msra.mxu1 %v6713_v30  ;;  %v4898_v30 = vpop.f32.mrf.mxu0 }
 0x321   :  { %5441 = vmatprep.subr.bf16.mxu1 %v6706_v32  ;;  %v2175_v32 = vld [vmem:[#allocation8 + $0xd78] sm:$0xff]  ;;  %v7644_v46 = vpop.f32.mrf.mxu1 }
 0x322   :  { %5471 = vmatpush1.bf16.msra.mxu0 %v6761_v13  ;;  %v7641_v55 = vpop.f32.mrf.mxu0  ;;  %v6842_v13 = vcombine.high %v2099_v28, %v2103_v44 }
 0x323   :  { %5472 = vmatprep.subr.bf16.mxu0 %v6754_v43  ;;  %v2091_v43 = vld [vmem:[#allocation8 + $0xad8] sm:$0xff]  ;;  %v5023_v57 = vpop.f32.mrf.mxu1 }
 0x324   :  { %5442 = vmatpush2.bf16.msra.mxu1 %v6705_v38  ;;  %v6914_v38 = vcombine.high %v2171_v31, %v2175_v32  ;;  %v4980_v11 = vpop.f32.mrf.mxu0 }
 0x325   :  { %5443 = vmatprep.subr.bf16.mxu1 %v6698_v45  ;;  %v2095_v45 = vld [vmem:[#allocation8 + $0xaf8] sm:$0xff] }
 0x326   :  { %5473 = vmatpush1.bf16.msra.mxu0 %v6753_v49  ;;  %v6913_v49 = vcombine.low %v2171_v31, %v2175_v32  ;;  %v6833_v0 = vcombine.low %v2091_v43, %v2095_v45  ;;  %v2143_v31 = vld [vmem:[#allocation8 + $0xc78] sm:$0xff] }
 0x327   :  { %5474 = vmatprep.subr.bf16.mxu0 %v6746_v52  ;;  %v2083_v52 = vld [vmem:[#allocation8 + $0xa98] sm:$0xff] }
 0x328   :  { %5444 = vmatpush2.bf16.msra.mxu1 %v6697_v51  ;;  %v6834_v51 = vcombine.high %v2091_v43, %v2095_v45  ;;  %v2135_v45 = vld [vmem:[#allocation8 + $0xc38] sm:$0xff] }
 0x329   :  { %5445 = vmatprep.subr.bf16.mxu1 %v6690_v53  ;;  %v2087_v53 = vld [vmem:[#allocation8 + $0xab8] sm:$0xff] }
 0x32a   :  { %5475 = vmatpush1.bf16.msra.mxu0 %v6745_v2  ;;  %v7646_v2 = vld [vmem:[#allocation10] sm:$0xff]  ;;  %v6825_v21 = vcombine.low %v2083_v52, %v2087_v53 }
 0x32b   :  { %5476 = vmatprep.subr.bf16.mxu0 %v6866_v4  ;;  %v6905_v4 = vcombine.low %v2163_v48, %v2167_v10  ;;  %v2265_v18 = vrot.slane %v7646_v2, %v333_v35 }
 0x32c   :  { %5446 = vmatpush2.bf16.msra.mxu1 %v6689_v3  ;;  %v7648_v3 = vpop.f32.mrf.mxu0 }
 0x32d   :  { %5447 = vmatprep.subr.bf16.mxu1 %v6682_v5  ;;  %v6826_v5 = vcombine.high %v2083_v52, %v2087_v53  ;;  %v2255_v52 = vld [vmem:[#allocation8 + $0xff8] sm:$0xff] }
 0x32e   :  { %5477 = vmatpush2.bf16.msra.mxu0 %v6865_v26  ;;  %v7653_v26 = vpop.f32.mrf.mxu1  ;;  %v4984_v63 = vpop.f32.mrf.mxu0 }
 0x32f   :  { %5478 = vmatprep.subr.bf16.mxu0 %v6858_v9  ;;  %v2151_v9 = vld [vmem:[#allocation8 + $0xcb8] sm:$0xff] }
 0x330   :  { %5448 = vmatpush2.bf16.msra.mxu1 %v6681_v8  ;;  %v2147_v8 = vld [vmem:[#allocation8 + $0xc98] sm:$0xff]  ;;  %v7657_v59 = vpop.f32.mrf.mxu0 }
 0x331   :  { %5503 = vmatprep.subr.bf16.mxu1 %v6930_v34  ;;  %v4899_v34 = vadd.f32 %v4898_v30, %v2265_v18  ;;  %v6890_v35 = vcombine.high %v2147_v8, %v2151_v9 }
 0x332   :  { %5479 = vmatpush2.bf16.msra.mxu0 %v6857_v17  ;;  %v4895_v17 = vadd.f32 %v7632_v6, %v2265_v18  ;;  %v2243_v18 = vld [vmem:[#allocation8 + $0xf98] sm:$0xff] }
 0x333   :  { %5450 = vmatmul.mubr.bf16.vlgmr.msra.gmra.mxu1 %v7560_v27  ;;  %5480 = vmatprep.subr.bf16.mxu0 %v6850_v24  ;;  %v6841_v27 = vcombine.low %v2099_v28, %v2103_v44  ;;  %v2067_v24 = vld [vmem:[#allocation8 + $0xa18] sm:$0xff]  ;;  %v5027_v28 = vpop.f32.mrf.mxu1 }
 0x334   :  { %5504 = vmatpush1.bf16.msra.mxu1 %v6929_v22  ;;  %5535 = vmatprep.mubr.bf16.mxu1 %v7601_v54  ;;  %v6906_v54 = vcombine.high %v2163_v48, %v2167_v10  ;;  %v4942_v22 = vadd.f32 %v4941_v36, %v4899_v34  ;;  %v2139_v44 = vld [vmem:[#allocation8 + $0xc58] sm:$0xff]  ;;  %v4938_v32 = vadd.f32 %v7634_v15, %v4895_v17  ;;  %v7170_v15 = vld [vmem:[#allocation11 + $0x78] sm:$0xff]  }
 0x335   :  { %5505 = vmatprep.subr.bf16.mxu1 %v6922_v25  ;;  %v2071_v25 = vld [vmem:[#allocation8 + $0xa38] sm:$0xff]  ;;  %v6882_v6 = vcombine.high %v2139_v44, %v2143_v31 }
 0x336   :  { %5481 = vmatpush2.bf16.msra.mxu0 %v6849_v33  ;;  %v4985_v30 = vadd.f32 %v4984_v63, %v4942_v22  ;;  %v6817_v33 = vcombine.low %v2075_v7, %v2079_v23  ;;  %v2131_v36 = vld [vmem:[#allocation8 + $0xc18] sm:$0xff]  ;;  %v6809_v10 = vcombine.low %v2067_v24, %v2071_v25  ;;  %v7662_v7 = vpop.f32.mrf.mxu0  ;;  %v7176_v22 = vld [vmem:[#allocation11 + $0x60] sm:$0xff]  }
 0x337   :  { %5482 = vmatprep.subr.bf16.mxu0 %v6842_v13  ;;  %v6810_v13 = vcombine.high %v2067_v24, %v2071_v25  ;;  %v6873_v61 = vcombine.low %v2131_v36, %v2135_v45  ;;  %v7173_v23 = vld [vmem:[#allocation11 + $0x30] sm:$0xff]  }
 0x338   :  { %5506 = vmatpush1.bf16.msra.mxu1 %v6921_v56  ;;  %v6889_v56 = vcombine.low %v2147_v8, %v2151_v9  ;;  %v5028_v43 = vadd.f32 %v5027_v28, %v4985_v30  ;;  %v7174_v9 = vld [vmem:[#allocation11 + $0x68] sm:$0xff]   ;;  %v2235_v63 = vld [vmem:[#allocation8 + $0xf58] sm:$0xff]  ;;  %v7178_v30 = vld [vmem:[#allocation11 + $0x58] sm:$0xff]  }
 0x339   :  { %5507 = vmatprep.subr.bf16.mxu1 %v6914_v38  ;;  %v4981_v38 = vadd.f32 %v4980_v11, %v4938_v32  ;;  %v7171_v11 = vld [vmem:[#allocation11 + $0x38] sm:$0xff]   ;;  %v2227_v25 = vld [vmem:[#allocation8 + $0xf18] sm:$0xff] }
 0x33a   :  { %5483 = vmatpush2.bf16.msra.mxu0 %v6841_v27  ;;  %v6881_v27 = vcombine.low %v2139_v44, %v2143_v31  ;;  %v2231_v28 = vld [vmem:[#allocation8 + $0xf38] sm:$0xff]  ;;  %v7177_v31 = vld [vmem:[#allocation11 + $0x20] sm:$0xff]  }
 0x33b   :  { %5484 = vmatprep.subr.bf16.mxu0 %v6834_v51  ;;  %v5024_v48 = vadd.f32 %v5023_v57, %v4981_v38  ;;  %v6874_v51 = vcombine.high %v2131_v36, %v2135_v45  ;;  %v7172_v57 = vld [vmem:[#allocation11 + $0x70] sm:$0xff]   ;;  %v7179_v45 = vld [vmem:[#allocation11 + $0x18] sm:$0xff]  }
 0x33c   :  { %5508 = vmatpush1.bf16.msra.mxu1 %v6913_v49  ;;  %v5555_v49 = vmax.f32 %v5028_v43, 0.0  ;;  %v2219_v38 = vld [vmem:[#allocation8 + $0xed8] sm:$0xff] }
 0x33d   :  { %5509 = vmatprep.subr.bf16.mxu1 %v6906_v54  ;;  %v2251_v54 = vld [vmem:[#allocation8 + $0xfd8] sm:$0xff]  ;;  %v5547_v53 = vmax.f32 %v5024_v48, 0.0  ;;  %v6969_v48 = vcombine.low %v2227_v25, %v2231_v28 }
 0x33e   :  { %5485 = vmatpush2.bf16.msra.mxu0 %v6833_v0  ;;  %v6993_v8 = vcombine.low %v2251_v54, %v2255_v52  ;;  %v2223_v43 = vld [vmem:[#allocation8 + $0xef8] sm:$0xff] }
 0x33f   :  { %5486 = vmatprep.subr.bf16.mxu0 %v6826_v5  ;;  %v5563_v0 = vpack.c.bf16 %v5555_v49, %v5547_v53  ;;  %v6994_v5 = vcombine.high %v2251_v54, %v2255_v52  ;;  %v2215_v54 = vld [vmem:[#allocation8 + $0xeb8] sm:$0xff] }
 0x340   :  { %5510 = vmatpush1.bf16.msra.mxu1 %v6905_v4  ;;  %v7659_v4 = vpop.f32.mrf.mxu1 }
 0x341   :  { %5511 = vmatprep.subr.bf16.mxu1 %v6898_v19  ;;  %v2247_v19 = vld [vmem:[#allocation8 + $0xfb8] sm:$0xff] }
 0x342   :  { %5487 = vmatpush2.bf16.msra.mxu0 %v6825_v21  ;;  %v7664_v34 = vpop.f32.mrf.mxu1  ;;  %v6986_v21 = vcombine.high %v2243_v18, %v2247_v19  ;;  %v6985_v17 = vcombine.low %v2243_v18, %v2247_v19  ;;  %v2203_v19 = vld [vmem:[#allocation8 + $0xe58] sm:$0xff] }
 0x343   :  { %5488 = vmatprep.subr.bf16.mxu0 %v6818_v16  ;;  %v7666_v16 = vpop.f32.mrf.mxu0 }
 0x344   :  { %5512 = vmatpush1.bf16.msra.mxu1 %v6897_v14  ;;  %v2239_v14 = vld [vmem:[#allocation8 + $0xf78] sm:$0xff] }
 0x345   :  { %5513 = vmatprep.subr.bf16.mxu1 %v6890_v35  ;;  %v7668_v35 = vpop.f32.mrf.mxu1  ;;  %v6978_v24 = vcombine.high %v2235_v63, %v2239_v14  ;;  %v5070_v44 = vpop.f32.mrf.mxu0  ;;  %v6977_v32 = vcombine.low %v2235_v63, %v2239_v14  ;;  %v7184_v14 = vld [vmem:[#allocation11 + $0x40] sm:$0xff]  }
 0x346   :  { %5489 = vmatpush2.bf16.msra.mxu0 %v6817_v33 }
 0x347   :  { %5490 = vmatprep.subr.bf16.mxu0 %v6810_v13  ;;  %v5113_v33 = vpop.f32.mrf.mxu1  ;;  %v6970_v13 = vcombine.high %v2227_v25, %v2231_v28  ;;  %v7185_v28 = vld [vmem:[#allocation11] sm:$0xff]  }
 0x348   :  { %5514 = vmatpush1.bf16.msra.mxu1 %v6889_v56  ;;  %v7670_v56 = vpop.f32.mrf.mxu0 }
 0x349   :  { %5515 = vmatprep.subr.bf16.mxu1 %v6882_v6  ;;  %v2261_v6 = vrot.slane %v7646_v2, %v329_v41  ;;  %v7675_v36 = vpop.f32.mrf.mxu1  ;;  %v7181_v41 = vld [vmem:[#allocation11 + $0x10] sm:$0xff]  }
 0x34a   :  { %5491 = vmatpush2.bf16.msra.mxu0 %v6809_v10  ;;  %v7180_v10 = vld [vmem:[#allocation11 + $0x50] sm:$0xff]  }
 0x34b   :  { %7060 = vmatprep.subr.bf16.mxu0 %v7170_v15  ;;  %v6962_v15 = vcombine.high %v2219_v38, %v2223_v43  ;;  %v4897_v49 = vadd.f32 %v7636_v12, %v2261_v6  ;;  %v4893_v52 = vadd.f32 %v7628_v60, %v2261_v6  ;;  %v5195_v53 = vpop.f32.mrf.mxu1  ;;  %v2273_v60 = vrot.slane %v7646_v2, %v341_v40 }
 0x34c   :  { %5516 = vmatpush1.bf16.msra.mxu1 %v6881_v27  ;;  %v5152_v27 = vpop.f32.mrf.mxu0 }
 0x34d   :  { %5517 = vmatprep.subr.bf16.mxu1 %v6874_v51  ;;  %5493 = vmatmul.mubr.bf16.vlgmr.msra.gmra.mxu0 %v7588_v37  ;;  %v7175_v37 = vld [vmem:[#allocation11 + $0x28] sm:$0xff]   ;;  %v2211_v51 = vld [vmem:[#allocation8 + $0xe98] sm:$0xff] }
 0x34e   :  { %7061 = vmatpush3.bf16.msra.mxu0 %v7171_v11  ;;  %6121 = vmatprep.mubr.bf16.mxu0 %v5563_v0  ;;  %v4940_v11 = vadd.f32 %v7638_v20, %v4897_v49  ;;  %v4936_v0 = vadd.f32 %v7630_v39, %v4893_v52  ;;  %v6954_v18 = vcombine.high %v2211_v51, %v2215_v54 }
 0x34f   :  { %7062 = vmatprep.subr.bf16.mxu0 %v7172_v57  ;;  %v7182_v57 = vld [vmem:[#allocation11 + $0x48] sm:$0xff]   ;;  %v6953_v63 = vcombine.low %v2211_v51, %v2215_v54  ;;  %v7187_v51 = vld [vmem:[#allocation11 + $0xb8] sm:$0xff]  }
 0x350   :  { %5518 = vmatpush1.bf16.msra.mxu1 %v6873_v61  ;;  %v6961_v61 = vcombine.low %v2219_v38, %v2223_v43  ;;  %v4983_v12 = vadd.f32 %v7648_v3, %v4940_v11  ;;  %v4979_v20 = vadd.f32 %v7641_v55, %v4936_v0  ;;  %v2195_v55 = vld [vmem:[#allocation8 + $0xe18] sm:$0xff]  ;;  %v7206_v54 = vld [vmem:[#allocation11 + $0x168] sm:$0xff]   ;;  %v7208_v11 = vld [vmem:[#allocation11 + $0x160] sm:$0xff]  }
 0x351   :  { %5519 = vmatprep.subr.bf16.mxu1 %v6994_v5  ;;  %v7681_v5 = vpop.f32.mrf.mxu0  ;;  %v7191_v0 = vld [vmem:[#allocation11 + $0xa8] sm:$0xff]  }
 0x352   :  { %7063 = vmatpush3.bf16.msra.mxu0 %v7173_v23  ;;  %v2207_v23 = vld [vmem:[#allocation8 + $0xe78] sm:$0xff]  ;;  %v5026_v39 = vadd.f32 %v7653_v26, %v4983_v12  ;;  %v5022_v40 = vadd.f32 %v7644_v46, %v4979_v20  ;;  %v7192_v12 = vld [vmem:[#allocation11 + $0xe0] sm:$0xff]  }
 0x353   :  { %7064 = vmatprep.subr.bf16.mxu0 %v7174_v9  ;;  %v7183_v9 = vld [vmem:[#allocation11 + $0x8] sm:$0xff]   ;;  %v5156_v3 = vpop.f32.mrf.mxu0  ;;  %v7213_v20 = vld [vmem:[#allocation11 + $0x110] sm:$0xff]  }
 0x354   :  { %5520 = vmatpush2.bf16.msra.mxu1 %v6993_v8  ;;  %v7688_v8 = vpop.f32.mrf.mxu1  ;;  %v5546_v38 = vmax.f32 %v5022_v40, 0.0  ;;  %v7216_v40 = vld [vmem:[#allocation11 + $0x140] sm:$0xff]  }
 0x355   :  { %5521 = vmatprep.subr.bf16.mxu1 %v6986_v21  ;;  %v5071_v21 = vadd.f32 %v5070_v44, %v2273_v60 }
 0x356   :  { %7065 = vmatpush3.bf16.msra.mxu0 %v7175_v37  ;;  %v6946_v37 = vcombine.high %v2203_v19, %v2207_v23  ;;  %v5199_v25 = vpop.f32.mrf.mxu1 }
 0x357   :  { %7066 = vmatprep.subr.bf16.mxu0 %v7176_v22  ;;  %v5114_v22 = vadd.f32 %v5113_v33, %v5071_v21  ;;  %v2269_v21 = vrot.slane %v7646_v2, %v337_v42 }
 0x358   :  { %5522 = vmatpush2.bf16.msra.mxu1 %v6985_v17  ;;  %v5067_v17 = vadd.f32 %v7662_v7, %v2273_v60  ;;  %v7203_v7 = vld [vmem:[#allocation11 + $0x138] sm:$0xff]  }
 0x359   :  { %5523 = vmatprep.subr.bf16.mxu1 %v6978_v24  ;;  %v2199_v24 = vld [vmem:[#allocation8 + $0xe38] sm:$0xff]  ;;  %v5157_v44 = vadd.f32 %v5156_v3, %v5114_v22  ;;  %v7211_v60 = vld [vmem:[#allocation11 + $0x118] sm:$0xff]   ;;  %v7215_v3 = vld [vmem:[#allocation11 + $0x108] sm:$0xff]  }
 0x35a   :  { %7067 = vmatpush3.bf16.msra.mxu0 %v7177_v31  ;;  %v5554_v31 = vmax.f32 %v5026_v39, 0.0  ;;  %v5110_v26 = vadd.f32 %v7664_v34, %v5067_v17  ;;  %v7186_v34 = vld [vmem:[#allocation11 + $0xf8] sm:$0xff]   ;;  %v7214_v39 = vld [vmem:[#allocation11 + $0x148] sm:$0xff]   ;;  %v5065_v17 = vadd.f32 %v7657_v59, %v2269_v21 }
 0x35b   :  { %7068 = vmatprep.subr.bf16.mxu0 %v7178_v30  ;;  %v7202_v30 = vld [vmem:[#allocation11 + $0x178] sm:$0xff]   ;;  %v5200_v43 = vadd.f32 %v5199_v25, %v5157_v44  ;;  %v7217_v25 = vld [vmem:[#allocation11 + $0x100] sm:$0xff]  }
 0x35c   :  { %5524 = vmatpush2.bf16.msra.mxu1 %v6977_v32  ;;  %v6945_v32 = vcombine.low %v2203_v19, %v2207_v23  ;;  %v5153_v46 = vadd.f32 %v5152_v27, %v5110_v26  ;;  %v5562_v33 = vpack.c.bf16 %v5554_v31, %v5546_v38  ;;  %v7188_v27 = vld [vmem:[#allocation11 + $0xf0] sm:$0xff]   ;;  %v7194_v23 = vld [vmem:[#allocation11 + $0xd8] sm:$0xff]   ;;  %v7200_v26 = vld [vmem:[#allocation11 + $0xc0] sm:$0xff]   ;;  %v5236_v38 = vpop.f32.mrf.mxu0 }
 0x35d   :  { %5525 = vmatprep.subr.bf16.mxu1 %v6970_v13  ;;  %v6938_v13 = vcombine.high %v2195_v55, %v2199_v24  ;;  %v7212_v19 = vld [vmem:[#allocation11 + $0x150] sm:$0xff]  }
 0x35e   :  { %7069 = vmatpush3.bf16.msra.mxu0 %v7179_v45  ;;  %v5196_v6 = vadd.f32 %v5195_v53, %v5153_v46  ;;  %v6937_v45 = vcombine.low %v2195_v55, %v2199_v24  ;;  %v7207_v53 = vld [vmem:[#allocation11 + $0x128] sm:$0xff]   ;;  %v5108_v24 = vadd.f32 %v7659_v4, %v5065_v17  ;;  %v7224_v46 = vld [vmem:[#allocation11 + $0x1e0] sm:$0xff]  }
 0x35f   :  { %7070 = vmatprep.subr.bf16.mxu0 %v7180_v10  ;;  %v5557_v10 = vmax.f32 %v5200_v43, 0.0  ;;  %v7198_v55 = vld [vmem:[#allocation11 + $0xc8] sm:$0xff]   ;;  %v5238_v43 = vpop.f32.mrf.mxu0 }
 0x360   :  { %5526 = vmatpush2.bf16.msra.mxu1 %v6969_v48  ;;  %v7204_v48 = vld [vmem:[#allocation11 + $0x170] sm:$0xff]   ;;  %v5549_v49 = vmax.f32 %v5196_v6, 0.0 }
 0x361   :  { %5527 = vmatprep.subr.bf16.mxu1 %v6962_v15  ;;  %v7205_v15 = vld [vmem:[#allocation11 + $0x130] sm:$0xff]  }
 0x362   :  { %7071 = vmatpush3.bf16.msra.mxu0 %v7181_v41  ;;  %v5565_v52 = vpack.c.bf16 %v5557_v10, %v5549_v49  ;;  %v7189_v41 = vld [vmem:[#allocation11 + $0xb0] sm:$0xff]   ;;  %v2281_v49 = vrot.slane %v7646_v2, %v349_v47 }
 0x363   :  { %7072 = vmatprep.subr.bf16.mxu0 %v7182_v57  ;;  %v7209_v57 = vld [vmem:[#allocation11 + $0x120] sm:$0xff]  }
 0x364   :  { %5528 = vmatpush2.bf16.msra.mxu1 %v6961_v61  ;;  %v7190_v61 = vld [vmem:[#allocation11 + $0xe8] sm:$0xff]  }
 0x365   :  { %5529 = vmatprep.subr.bf16.mxu1 %v6954_v18  ;;  %v7210_v18 = vld [vmem:[#allocation11 + $0x158] sm:$0xff]  }
 0x366   :  { %7073 = vmatpush3.bf16.msra.mxu0 %v7183_v9  ;;  %v7195_v9 = vld [vmem:[#allocation11 + $0x98] sm:$0xff]  }
 0x367   :  { %7074 = vmatprep.subr.bf16.mxu0 %v7184_v14  ;;  %v5069_v14 = vadd.f32 %v7666_v16, %v2269_v21  ;;  %v7199_v16 = vld [vmem:[#allocation11 + $0x88] sm:$0xff]  }
 0x368   :  { %5530 = vmatpush2.bf16.msra.mxu1 %v6953_v63  ;;  %v7196_v63 = vld [vmem:[#allocation11 + $0xd0] sm:$0xff]  }
 0x369   :  { %5531 = vmatprep.subr.bf16.mxu1 %v6946_v37  ;;  %v7197_v37 = vld [vmem:[#allocation11 + $0x90] sm:$0xff]   ;;  %v5112_v22 = vadd.f32 %v7668_v35, %v5069_v14  ;;  %v7201_v35 = vld [vmem:[#allocation11 + $0x80] sm:$0xff]  }
 0x36a   :  { %7075 = vmatpush3.bf16.msra.mxu0 %v7185_v28  ;;  %v5151_v28 = vadd.f32 %v7670_v56, %v5108_v24  ;;  %v7221_v56 = vld [vmem:[#allocation11 + $0x1b0] sm:$0xff]  }
 0x36b   :  { %7104 = vmatprep.subr.bf16.mxu0 %v7202_v30  ;;  %v5155_v42 = vadd.f32 %v7681_v5, %v5112_v22  ;;  %v7219_v30 = vld [vmem:[#allocation11 + $0x1b8] sm:$0xff]  }
 0x36c   :  { %5532 = vmatpush2.bf16.msra.mxu1 %v6945_v32  ;;  %v5194_v59 = vadd.f32 %v7675_v36, %v5151_v28  ;;  %v7218_v32 = vld [vmem:[#allocation11 + $0x1f8] sm:$0xff]   ;;  %v7223_v36 = vld [vmem:[#allocation11 + $0x1a8] sm:$0xff]   ;;  %v7233_v28 = vld [vmem:[#allocation11 + $0x180] sm:$0xff]  }
 0x36d   :  { %5533 = vmatprep.subr.bf16.mxu1 %v6938_v13  ;;  %6122 = vmatmul.mubr.bf16.vlgmr.msra.gmra.mxu0 %v5562_v33  ;;  %v5198_v31 = vadd.f32 %v7688_v8, %v5155_v42  ;;  %v7220_v13 = vld [vmem:[#allocation11 + $0x1f0] sm:$0xff]   ;;  %v7222_v8 = vld [vmem:[#allocation11 + $0x1e8] sm:$0xff]   ;;  %v5240_v33 = vpop.f32.mrf.mxu0  ;;  %v7232_v42 = vld [vmem:[#allocation11 + $0x1c0] sm:$0xff]  }
 0x36e   :  { %7105 = vmatpush3.bf16.msra.mxu0 %v7203_v7  ;;  %v5548_v4 = vmax.f32 %v5194_v59, 0.0  ;;  %v7225_v7 = vld [vmem:[#allocation11 + $0x1a0] sm:$0xff]  }
 0x36f   :  { %7106 = vmatprep.subr.bf16.mxu0 %v7204_v48  ;;  %v5556_v44 = vmax.f32 %v5198_v31, 0.0 }
 0x370   :  { %5534 = vmatpush2.bf16.msra.mxu1 %v6937_v45  ;;  %v5242_v45 = vpop.f32.mrf.mxu0 }
 0x371   :  { %7082 = vmatprep.subr.bf16.mxu1 %v7186_v34  ;;  %v5564_v5 = vpack.c.bf16 %v5556_v44, %v5548_v4 }
 0x372   :  { %7107 = vmatpush3.bf16.msra.mxu0 %v7205_v15 }
 0x373   :  { %5536 = vmatmul.mubr.bf16.vlgmr.msra.gmra.mxu1 %v7605_v58  ;;  %7108 = vmatprep.subr.bf16.mxu0 %v7206_v54  ;;  %v7193_v58 = vld [vmem:[#allocation11 + $0xa0] sm:$0xff]   ;;  %v5279_v6 = vpop.f32.mrf.mxu1  ;;  %v7227_v54 = vld [vmem:[#allocation11 + $0x198] sm:$0xff]  }
 0x374   :  { %7083 = vmatpush3.bf16.msra.mxu1 %v7187_v51  ;;  %6162 = vmatprep.mubr.bf16.mxu1 %v5565_v52  ;;  %v2277_v51 = vrot.slane %v7646_v2, %v345_v50 }
 0x375   :  { %7084 = vmatprep.subr.bf16.mxu1 %v7188_v27  ;;  %v5281_v48 = vpop.f32.mrf.mxu1  ;;  %v7226_v27 = vld [vmem:[#allocation11 + $0x1d8] sm:$0xff]  }
 0x376   :  { %7109 = vmatpush3.bf16.msra.mxu0 %v7207_v53 }
 0x377   :  { %7110 = vmatprep.subr.bf16.mxu0 %v7208_v11  ;;  %v5283_v10 = vpop.f32.mrf.mxu1  ;;  %v5241_v11 = vadd.f32 %v5240_v33, %v2277_v51 }
 0x378   :  { %7085 = vmatpush3.bf16.msra.mxu1 %v7189_v41  ;;  %v5239_v41 = vadd.f32 %v5238_v43, %v2281_v49 }
 0x379   :  { %7086 = vmatprep.subr.bf16.mxu1 %v7190_v61  ;;  %v5285_v52 = vpop.f32.mrf.mxu1  ;;  %v5237_v61 = vadd.f32 %v5236_v38, %v2277_v51  ;;  %v2289_v38 = vrot.slane %v7646_v2, %v357_v62 }
 0x37a   :  { %7111 = vmatpush3.bf16.msra.mxu0 %v7209_v57 }
 0x37b   :  { %7112 = vmatprep.subr.bf16.mxu0 %v7210_v18  ;;  %v5243_v18 = vadd.f32 %v5242_v45, %v2281_v49  ;;  %v5280_v47 = vadd.f32 %v5279_v6, %v5237_v61 }
 0x37c   :  { %7087 = vmatpush3.bf16.msra.mxu1 %v7191_v0  ;;  %v7228_v0 = vld [vmem:[#allocation11 + $0x1d0] sm:$0xff]  }
 0x37d   :  { %7088 = vmatprep.subr.bf16.mxu1 %v7192_v12  ;;  %v5282_v12 = vadd.f32 %v5281_v48, %v5239_v41  ;;  %v5286_v50 = vadd.f32 %v5285_v52, %v5243_v18 }
 0x37e   :  { %7113 = vmatpush3.bf16.msra.mxu0 %v7211_v60  ;;  %v5284_v60 = vadd.f32 %v5283_v10, %v5241_v11 }
 0x37f   :  { %7114 = vmatprep.subr.bf16.mxu0 %v7212_v19 }
 0x380   :  { %7089 = vmatpush3.bf16.msra.mxu1 %v7193_v58  ;;  %v7229_v58 = vld [vmem:[#allocation11 + $0x190] sm:$0xff]  }
 0x381   :  { %7090 = vmatprep.subr.bf16.mxu1 %v7194_v23 }
 0x382   :  { %7115 = vmatpush3.bf16.msra.mxu0 %v7213_v20 }
 0x383   :  { %7116 = vmatprep.subr.bf16.mxu0 %v7214_v39 }
 0x384   :  { %7091 = vmatpush3.bf16.msra.mxu1 %v7195_v9 }
 0x385   :  { %7092 = vmatprep.subr.bf16.mxu1 %v7196_v63  ;;  %v7230_v63 = vld [vmem:[#allocation11 + $0x1c8] sm:$0xff]  }
 0x386   :  { %7117 = vmatpush3.bf16.msra.mxu0 %v7215_v3 }
 0x387   :  { %7118 = vmatprep.subr.bf16.mxu0 %v7216_v40  ;;  %v7231_v40 = vld [vmem:[#allocation11 + $0x188] sm:$0xff]  }
 0x388   :  { %7093 = vmatpush3.bf16.msra.mxu1 %v7197_v37 }
 0x389   :  { %7094 = vmatprep.subr.bf16.mxu1 %v7198_v55 }
 0x38a   :  { %7119 = vmatpush3.bf16.msra.mxu0 %v7217_v25 }
 0x38c   :  { %7095 = vmatpush3.bf16.msra.mxu1 %v7199_v16 }
 0x38d   :  { %7096 = vmatprep.subr.bf16.mxu1 %v7200_v26  ;;  %v5322_v34 = vpop.f32.mrf.mxu0 }
 0x38e   :  { %v5323_v39 = vadd.f32 %v5322_v34, %v5280_v47 }
 0x38f   :  { %v5324_v15 = vpop.f32.mrf.mxu0 }
 0x390   :  { %7097 = vmatpush3.bf16.msra.mxu1 %v7201_v35  ;;  %v5325_v20 = vadd.f32 %v5324_v15, %v5282_v12 }
 0x391   :  { %7126 = vmatprep.subr.bf16.mxu1 %v7218_v32  ;;  %v5326_v53 = vpop.f32.mrf.mxu0 }
 0x392   :  { %v5327_v9 = vadd.f32 %v5326_v53, %v5284_v60 }
 0x393   :  { %6163 = vmatmul.mubr.bf16.vlgmr.msra.gmra.mxu1 %v5564_v5  ;;  %v5328_v19 = vpop.f32.mrf.mxu0 }
 0x394   :  { %7127 = vmatpush3.bf16.msra.mxu1 %v7219_v30  ;;  %v5329_v14 = vadd.f32 %v5328_v19, %v5286_v50 }
 0x395   :  { %7128 = vmatprep.subr.bf16.mxu1 %v7220_v13 }
 0x398   :  { %7129 = vmatpush3.bf16.msra.mxu1 %v7221_v56 }
 0x399   :  { %7130 = vmatprep.subr.bf16.mxu1 %v7222_v8 }
 0x39c   :  { %7131 = vmatpush3.bf16.msra.mxu1 %v7223_v36  ;;  %v2285_v36 = vrot.slane %v7646_v2, %v353_v1 }
 0x39d   :  { %7132 = vmatprep.subr.bf16.mxu1 %v7224_v46 }
 0x3a0   :  { %7133 = vmatpush3.bf16.msra.mxu1 %v7225_v7 }
 0x3a1   :  { %7134 = vmatprep.subr.bf16.mxu1 %v7226_v27 }
 0x3a4   :  { %7135 = vmatpush3.bf16.msra.mxu1 %v7227_v54 }
 0x3a5   :  { %7136 = vmatprep.subr.bf16.mxu1 %v7228_v0 }
 0x3a8   :  { %7137 = vmatpush3.bf16.msra.mxu1 %v7229_v58 }
 0x3a9   :  { %7138 = vmatprep.subr.bf16.mxu1 %v7230_v63 }
 0x3ac   :  { %7139 = vmatpush3.bf16.msra.mxu1 %v7231_v40 }
 0x3ad   :  { %7140 = vmatprep.subr.bf16.mxu1 %v7232_v42 }
 0x3b0   :  { %7141 = vmatpush3.bf16.msra.mxu1 %v7233_v28 }
 0x3b3   :  { %v5365_v57 = vpop.f32.mrf.mxu1 }
 0x3b4   :  { %v5366_v17 = vadd.f32 %v5365_v57, %v5323_v39 }
 0x3b5   :  { %v5367_v23 = vpop.f32.mrf.mxu1 }
 0x3b6   :  { %v5368_v3 = vadd.f32 %v5367_v23, %v5325_v20  ;;  %v5550_v31 = vmax.f32 %v5366_v17, 0.0 }
 0x3b7   :  { %v5369_v21 = vpop.f32.mrf.mxu1 }
 0x3b8   :  { %v5370_v37 = vadd.f32 %v5369_v21, %v5327_v9  ;;  %v5551_v25 = vmax.f32 %v5368_v3, 0.0  ;;  %v6995_v3 = vld [vmem:[#allocation13] ss:$0 sm:$0xff] }
 0x3b9   :  { %v5371_v22 = vpop.f32.mrf.mxu1 }
 0x3ba   :  { %v5372_v55 = vadd.f32 %v5371_v22, %v5329_v14  ;;  %v5558_v24 = vmax.f32 %v5370_v37, 0.0 }
 0x3bc   :  { %v5559_v16 = vmax.f32 %v5372_v55, 0.0  ;;  %v5566_v59 = vpack.c.bf16 %v5558_v24, %v5550_v31 }
 0x3be   :  { %v5567_v26 = vpack.c.bf16 %v5559_v16, %v5551_v25 }
 0x3c0   :  { %6203 = vmatprep.mubr.bf16.mxu0 %v5567_v26 }
 0x3c1   :  { %6204 = vmatmul.mubr.bf16.vlgmr.msra.gmra.mxu0 %v5566_v59 }
 0x3cd   :  { %v5408_v35 = vpop.f32.mrf.mxu0 }
 0x3ce   :  { %v5409_v6 = vadd.f32 %v5408_v35, %v2285_v36 }
 0x3cf   :  { %v5410_v44 = vpop.f32.mrf.mxu0 }
 0x3d0   :  { %v5411_v7 = vadd.f32 %v5410_v44, %v2289_v38 }
 0x3d1   :  { %v5412_v4 = vpop.f32.mrf.mxu0 }
 0x3d2   :  { %v5413_v33 = vadd.f32 %v5412_v4, %v2285_v36 }
 0x3d3   :  { %v5414_v32 = vpop.f32.mrf.mxu0 }
 0x3d4   :  { %v5415_v48 = vadd.f32 %v5414_v32, %v2289_v38 }
 0x3f3   :  { %v5451_v5 = vpop.f32.mrf.mxu1 }
 0x3f4   :  { %v5452_v15 = vadd.f32 %v5451_v5, %v5409_v6 }
 0x3f5   :  { %v5453_v30 = vpop.f32.mrf.mxu1 }
 0x3f6   :  { %v5454_v34 = vadd.f32 %v5453_v30, %v5411_v7 }
 0x3f7   :  { %v5455_v56 = vpop.f32.mrf.mxu1 }
 0x3f8   :  { %v5456_v10 = vadd.f32 %v5455_v56, %v5413_v33 }
 0x3f9   :  { %v5457_v46 = vpop.f32.mrf.mxu1 }
 0x3fa   :  { %v5458_v27 = vadd.f32 %v5457_v46, %v5415_v48 }
 0x40d   :  { %v5494_v13 = vpop.f32.mrf.mxu0 }
 0x40e   :  { %v5495_v62 = vadd.f32 %v5494_v13, %v5452_v15 }
 0x40f   :  { %v5496_v8 = vpop.f32.mrf.mxu0 }
 0x410   :  { %v5497_v54 = vadd.f32 %v5496_v8, %v5454_v34 }
 0x411   :  { %v5498_v43 = vpop.f32.mrf.mxu0 }
 0x412   :  { %v5499_v52 = vadd.f32 %v5498_v43, %v5456_v10 }
 0x413   :  { %v5500_v49 = vpop.f32.mrf.mxu0 }
 0x414   :  { %v5501_v29 = vadd.f32 %v5500_v49, %v5458_v27 }
 0x42d   :  { %v7076_v47 = vpop.f32.mrf.mxu0 }
 0x42f   :  { %v7077_v19 = vpop.f32.mrf.mxu0 }
 0x430   :  { %v7078_v14 = vadd.f32 %v7077_v19, %v7076_v47 }
 0x431   :  { %v7079_v23 = vpop.f32.mrf.mxu0 }
 0x432   :  { %v6124_v22 = vadd.f32 %v7078_v14, %v6995_v3 }
 0x433   :  { %v5537_v45 = vpop.f32.mrf.mxu1  ;;  %v7080_v50 = vpop.f32.mrf.mxu0 }
 0x434   :  { %v5538_v2 = vadd.f32 %v5537_v45, %v5495_v62  ;;  %v7081_v55 = vadd.f32 %v7080_v50, %v7079_v23 }
 0x435   :  { %v5539_v51 = vpop.f32.mrf.mxu1 }
 0x436   :  { %v5540_v41 = vadd.f32 %v5539_v51, %v5497_v54  ;;  %v5552_v12 = vmax.f32 %v5538_v2, 0.0  ;;  %v6127_v26 = vadd.f32 %v7081_v55, %v6995_v3 }
 0x437   :  { %v5541_v53 = vpop.f32.mrf.mxu1 }
 0x438   :  { %v5542_v1 = vadd.f32 %v5541_v53, %v5499_v52  ;;  %v5553_v0 = vmax.f32 %v5540_v41, 0.0 }
 0x439   :  { %v5543_v11 = vpop.f32.mrf.mxu1 }
 0x43a   :  { %v5544_v61 = vadd.f32 %v5543_v11, %v5501_v29  ;;  %v5560_v57 = vmax.f32 %v5542_v1, 0.0 }
 0x43c   :  { %v5561_v18 = vmax.f32 %v5544_v61, 0.0  ;;  %v5568_v58 = vpack.c.bf16 %v5560_v57, %v5552_v12 }
 0x43e   :  { %v5569_v60 = vpack.c.bf16 %v5561_v18, %v5553_v0 }
 0x440   :  { %6244 = vmatprep.mubr.bf16.mxu1 %v5569_v60 }
 0x441   :  { %6245 = vmatmul.mubr.bf16.vlgmr.msra.gmra.mxu1 %v5568_v58 }
 0x453   :  { %v7098_v20 = vpop.f32.mrf.mxu1 }
 0x455   :  { %v7099_v39 = vpop.f32.mrf.mxu1 }
 0x456   :  { %v7100_v40 = vadd.f32 %v7099_v39, %v7098_v20 }
 0x457   :  { %v7101_v63 = vpop.f32.mrf.mxu1 }
 0x458   :  { %v6165_v16 = vadd.f32 %v7100_v40, %v6124_v22 }
 0x459   :  { %v7102_v17 = vpop.f32.mrf.mxu1 }
 0x45a   :  { %v7103_v28 = vadd.f32 %v7102_v17, %v7101_v63 }
 0x45c   :  { %v6168_v5 = vadd.f32 %v7103_v28, %v6127_v26 }
 0x481   :  { %v7120_v9 = vpop.f32.mrf.mxu0 }
 0x483   :  { %v7121_v21 = vpop.f32.mrf.mxu0 }
 0x484   :  { %v7122_v24 = vadd.f32 %v7121_v21, %v7120_v9 }
 0x485   :  { %v7123_v37 = vpop.f32.mrf.mxu0 }
 0x486   :  { %v6206_v59 = vadd.f32 %v7122_v24, %v6165_v16 }
 0x487   :  { %v7124_v42 = vpop.f32.mrf.mxu0 }
 0x488   :  { %v7125_v35 = vadd.f32 %v7124_v42, %v7123_v37 }
 0x48a   :  { %v6209_v13 = vadd.f32 %v7125_v35, %v6168_v5 }
 0x501   :  { %v7142_v25 = vpop.f32.mrf.mxu1 }
 0x503   :  { %v7143_v31 = vpop.f32.mrf.mxu1 }
 0x504   :  { %v7144_v44 = vadd.f32 %v7143_v31, %v7142_v25 }
 0x505   :  { %v7145_v4 = vpop.f32.mrf.mxu1 }
 0x506   :  { %v6247_v32 = vadd.f32 %v7144_v44, %v6206_v59 }
 0x507   :  { %v7146_v30 = vpop.f32.mrf.mxu1 }
 0x508   :  { %6253 = vst [vmem:[#allocation14] sm:$0xff] %v6247_v32  ;;  %v7147_v56 = vadd.f32 %v7146_v30, %v7145_v4 }
 0x50a   :  { %v6250_v8 = vadd.f32 %v7147_v56, %v6209_v13 }
 0x50c   :  { %6254 = vst [vmem:[#allocation14 + $0x8] sm:$0xff] %v6250_v8 }
 0x50d   :  { %7385 = shalt.err (!%p7382_p11)
}
 0x50e   :  { %s7416_s14 = smov 128   ;;  %s7417_s15 = smov 8  }
 0x50f   :  { %6266 = dma.vmem_to_hbm [thread:$0]  %s6261_s6, 256, %s7728_s7, [#allocation4], %s7416_s14, %s7416_s14, %s7417_s15  }
 0x510   :  { %7402 = dma.done.wait [#allocation4], 256  }
 0x511   :  { %7403 = vsyncadd [#allocation4], 4294967040 }
 0x512   :  { %6270 = vsyncpa [#allocation3], 1 }
 0x513   :  { %6271 = vsyncpa [#allocation6], 1 }
 0x514   :  { %6272 = vsyncpa [#allocation9], 1 }
 0x515   :  { %6273 = vsyncpa [#allocation12], 1 }
 0x516   :  { %6274 = vsyncpa [#allocation4], 1 }

</bundles_post_ra>
